<compile_context>
chip_gen: v7x
topology: tpu7x:2x2x1
jax: 0.10.0
libtpu: 0.0.40
codegen_flags: <defaults>
</compile_context>

<pallas_src>
import math

import jax
import jax.numpy as jnp
from jax import lax
from jax.experimental import pallas as pl
from jax.experimental.pallas import tpu as pltpu


# -----------------------------------------------------------------------------
# Kernel 1: one-shot coefficient MLP (runs once per forward, not on hot path)
# -----------------------------------------------------------------------------
def _coef_kernel(tv_ref, bias_ref, w1_ref, b1_ref, w2_ref, b2_ref,
                 w3_ref, b3_ref, wa_ref, ba_ref, wg_ref, bg_ref, coef_ref):
    x = tv_ref[...] + bias_ref[...]                                     # (1,1024)
    h = jnp.sin(jnp.dot(x, w1_ref[...],
                        preferred_element_type=jnp.float32) + b1_ref[...])  # (1,512)
    h = jnp.sin(jnp.dot(h, w2_ref[...],
                        preferred_element_type=jnp.float32) + b2_ref[...])  # (1,256)
    h = jnp.sin(jnp.dot(h, w3_ref[...],
                        preferred_element_type=jnp.float32) + b3_ref[...])  # (1,128)
    # wa/ba (resp. wg/bg) hold layer-4's "a" (resp. "g") column replicated into
    # output lanes 0..2 and zero elsewhere, so a and g land in the SAME lanes
    # and the coefficient math below needs no cross-lane moves at all.
    a = jnp.tanh(jnp.dot(h, wa_ref[...],
                         preferred_element_type=jnp.float32) + ba_ref[...])  # lanes 0..2 = a
    g = jnp.tanh(jnp.dot(h, wg_ref[...],
                         preferred_element_type=jnp.float32) + bg_ref[...])  # lanes 0..2 = g
    s = a + g                            # lanes 0..2 = a + g
    den = 1.0 + a * g                    # lanes 0..2 = 1 + a*g
    inv = 1.0 / den                      # lanes 0..2 = 1 / (1 + a*g)
    lane = lax.broadcasted_iota(jnp.int32, s.shape, 1)
    coef_ref[...] = jnp.where(lane == 0, s,
                    jnp.where(lane == 1, den,
                    jnp.where(lane == 2, inv, 0.0)))   # lanes: [s, den, inv, 0...]


def _allpass_coeffs(params):
    """Run the MLP once; return a (1,128) f32 array with lanes [s, den, inv_den]."""
    tv = params["trainable_vector"].reshape(1, 1024)
    bias = params["bias"].reshape(1, 1024)

    # Split the (128, 2) final layer into two (128, 128) matrices whose live
    # column is replicated into output lanes 0..2 (zero elsewhere).
    wa = jnp.zeros((128, 128), jnp.float32).at[:, :3].set(params["w4"][:, 0:1])
    wg = jnp.zeros((128, 128), jnp.float32).at[:, :3].set(params["w4"][:, 1:2])
    ba = jnp.zeros((1, 128), jnp.float32).at[0, :3].set(params["b4"][0])
    bg = jnp.zeros((1, 128), jnp.float32).at[0, :3].set(params["b4"][1])

    vmem = pl.BlockSpec(memory_space=pltpu.MemorySpace.VMEM)
    return pl.pallas_call(
        _coef_kernel,
        out_shape=jax.ShapeDtypeStruct((1, 128), jnp.float32),
        in_specs=[vmem] * 12,
        out_specs=vmem,
    )(
        tv, bias,
        params["w1"], params["b1"].reshape(1, -1),
        params["w2"], params["b2"].reshape(1, -1),
        params["w3"], params["b3"].reshape(1, -1),
        wa, ba, wg, bg,
    )


# -----------------------------------------------------------------------------
# Kernel 2: tiled, pipelined elementwise all-pass recurrence (hot path)
# -----------------------------------------------------------------------------
def _allpass_elem_kernel(coef_ref, inp_ref, st_ref, out_ref, newst_ref):
    s = coef_ref[0, 0]        # cheap SMEM scalar loads, broadcast by the VPU
    den = coef_ref[0, 1]
    inv_den = coef_ref[0, 2]

    inp = inp_ref[...]
    st = st_ref[...]
    out = (s * inp + st) * inv_den          # multiply by precomputed reciprocal
    out_ref[...] = out
    newst_ref[...] = den * inp - s * out


_TILE_BYTES = 2 << 20          # one f32 block; 4 streams x 2 buffers = 16 MiB VMEM


def _plan(total, max_tile_bytes=_TILE_BYTES):
    """Pick a lane-dense (rows_padded, lanes) layout and a sublane-aligned row tile.

    Guarantees: lanes is a multiple of 128 (unmasked full-width stores);
    rows_padded % row_tile == 0; rows_padded * lanes >= total; and whenever the
    problem has >= 16 rows the grid gets >= 2 steps (v7x has two TensorCores).
    """
    # Lane width: prefer an exact factor of `total` (no padding copy needed).
    lanes = 0
    for cand in (2048, 1024, 512, 256, 128):
        if total % cand == 0:
            lanes = cand
            break
    if lanes == 0:
        lanes = 1024                       # awkward size -> pad up to 1024 lanes
    rows = -(-total // lanes)

    # Row tile: one f32 block <= max_tile_bytes, sublane-aligned, and capped so
    # there are >= 2 grid steps when there is enough work to split across TCs.
    tile_cap = max(8, (max_tile_bytes // (4 * lanes)) // 8 * 8)
    if rows >= 16:
        tile_cap = min(tile_cap, max(8, (rows // 2) // 8 * 8))

    if rows <= tile_cap and rows < 16:
        return rows, lanes, rows           # single full-extent block, no padding

    row_tile = tile_cap
    if rows % 8 == 0:
        for cand in range(tile_cap, 7, -8):
            if rows % cand == 0:
                row_tile = cand            # exact divisor -> no row padding
                break
    else:
        row_tile = min(tile_cap, -(-rows // 8) * 8)
    steps = -(-rows // row_tile)
    return steps * row_tile, lanes, row_tile


def _vmem_limit_bytes():
    """Generation-aware VMEM budget (48 MiB on v7x, 64 MiB on v5e/v6e)."""
    try:
        phys = int(pltpu.get_tpu_info().vmem_capacity_bytes)
    except Exception:
        return 32 << 20                    # safe everywhere, > v5e's 16 MiB default
    return int(min(max(phys - (16 << 20), 32 << 20), 64 << 20))


def allpass_forward(params, inp, state):
    """params: dict of weights; inp/state: float32 arrays of identical shape."""
    coef = _allpass_coeffs(params)                     # (1,128): [s, den, inv, 0..]

    orig_shape = inp.shape
    total = math.prod(orig_shape)
    rows_pad, lanes, row_tile = _plan(total)
    padded = rows_pad * lanes

    inp_f = inp.reshape(-1).astype(jnp.float32)
    st_f = state.reshape(-1).astype(jnp.float32)
    if padded != total:
        # Pad once so every block is (8,128)-aligned and every store is a full
        # unmasked vst; only taken for awkward sizes (cost: one bounded copy).
        inp_f = jnp.pad(inp_f, (0, padded - total))
        st_f = jnp.pad(st_f, (0, padded - total))
    inp2d = inp_f.reshape(rows_pad, lanes)
    st2d = st_f.reshape(rows_pad, lanes)

    blk = pl.BlockSpec((row_tile, lanes), lambda i: (i, 0))
    smem = pl.BlockSpec(memory_space=pltpu.MemorySpace.SMEM)

    # NOTE: no input_output_aliases here on purpose — without buffer donation it
    # only forces XLA to defensively copy `state`, costing an extra HBM pass.
    out2d, new2d = pl.pallas_call(
        _allpass_elem_kernel,
        out_shape=(jax.ShapeDtypeStruct((rows_pad, lanes), jnp.float32),
                   jax.ShapeDtypeStruct((rows_pad, lanes), jnp.float32)),
        grid=(rows_pad // row_tile,),
        in_specs=[smem, blk, blk],
        out_specs=(blk, blk),
        compiler_params=pltpu.CompilerParams(
            dimension_semantics=("parallel",),
            vmem_limit_bytes=_vmem_limit_bytes(),
        ),
    )(coef, inp2d, st2d)

    if padded != total:
        out_flat = out2d.reshape(-1)[:total]
        new_flat = new2d.reshape(-1)[:total]
        return out_flat.reshape(orig_shape), new_flat.reshape(orig_shape)
    return out2d.reshape(orig_shape), new2d.reshape(orig_shape)


# -----------------------------------------------------------------------------
# Deterministic parameter init (mirrors nn.Linear / nn.Parameter shapes)
# -----------------------------------------------------------------------------
def init_params(key):
    def linear(key, fan_in, fan_out):
        # PyTorch nn.Linear default: U(-1/sqrt(fan_in), 1/sqrt(fan_in)).
        kw, kb = jax.random.split(key)
        bound = 1.0 / jnp.sqrt(float(fan_in))
        w = jax.random.uniform(kw, (fan_in, fan_out), jnp.float32, -bound, bound)
        b = jax.random.uniform(kb, (fan_out,), jnp.float32, -bound, bound)
        return w, b

    k_bias, k1, k2, k3, k4 = jax.random.split(key, 5)
    w1, b1 = linear(k1, 1024, 512)
    w2, b2 = linear(k2, 512, 256)
    w3, b3 = linear(k3, 256, 128)
    w4, b4 = linear(k4, 128, 2)
    return {
        "trainable_vector": jnp.zeros((1024,), jnp.float32),
        "bias": jax.random.uniform(k_bias, (1024,), jnp.float32),  # torch.rand
        "w1": w1, "b1": b1,
        "w2": w2, "b2": b2,
        "w3": w3, "b3": b3,
        "w4": w4, "b4": b4,
    }


# -----------------------------------------------------------------------------
# Pure-JAX reference for a sanity check
# -----------------------------------------------------------------------------
def reference_forward(params, inp, state):
    x = params["trainable_vector"] + params["bias"]
    x = jnp.sin(x @ params["w1"] + params["b1"])
    x = jnp.sin(x @ params["w2"] + params["b2"])
    x = jnp.sin(x @ params["w3"] + params["b3"])
    x = jnp.tanh(x @ params["w4"] + params["b4"])
    a, g = x[0], x[1]
    out = ((a + g) * inp + state) / (1.0 + a * g)
    new_state = (1.0 + a * g) * inp - (a + g) * out
    return out, new_state


if __name__ == "__main__":
    key = jax.random.PRNGKey(0)
    k_params, k_inp = jax.random.split(key, 2)

    params = init_params(k_params)

    B, N = 8, 128  # small audio-like block: batch=8, 128 samples per row
    inp = jax.random.normal(k_inp, (B, N), jnp.float32)
    state = jnp.zeros((B, N), jnp.float32)  # init_states(size) -> zeros

    fwd = jax.jit(allpass_forward)
    out, new_state = fwd(params, inp, state)
    out, new_state = jax.block_until_ready((out, new_state))

    ref_out, ref_state = reference_forward(params, inp, state)
    assert jnp.allclose(out, ref_out, atol=1e-5, rtol=1e-5)
    assert jnp.allclose(new_state, ref_state, atol=1e-5, rtol=1e-5)

    print("KERNEL_OK")
</pallas_src>

<mosaic_0001>
module attributes {stable_mosaic.version = 11 : i64} {
  func.func @_coef_kernel(%arg0: memref<1x1024xf32, #tpu.memory_space<vmem>>, %arg1: memref<1x1024xf32, #tpu.memory_space<vmem>>, %arg2: memref<1024x512xf32, #tpu.memory_space<vmem>>, %arg3: memref<1x512xf32, #tpu.memory_space<vmem>>, %arg4: memref<512x256xf32, #tpu.memory_space<vmem>>, %arg5: memref<1x256xf32, #tpu.memory_space<vmem>>, %arg6: memref<256x128xf32, #tpu.memory_space<vmem>>, %arg7: memref<1x128xf32, #tpu.memory_space<vmem>>, %arg8: memref<128x128xf32, #tpu.memory_space<vmem>>, %arg9: memref<1x128xf32, #tpu.memory_space<vmem>>, %arg10: memref<128x128xf32, #tpu.memory_space<vmem>>, %arg11: memref<1x128xf32, #tpu.memory_space<vmem>>, %arg12: memref<1x128xf32, #tpu.memory_space<vmem>>) attributes {dimension_semantics = [], scalar_prefetch = 0 : i64, scratch_operands = 0 : i64, tpu.core_type = #tpu.core_type<tc>} {
    %c0 = arith.constant 0 : index
    %c0_0 = arith.constant 0 : index
    %0 = vector.load %arg0[%c0, %c0_0] : memref<1x1024xf32, #tpu.memory_space<vmem>>, vector<1x1024xf32>
    %c0_1 = arith.constant 0 : index
    %c0_2 = arith.constant 0 : index
    %1 = vector.load %arg1[%c0_1, %c0_2] : memref<1x1024xf32, #tpu.memory_space<vmem>>, vector<1x1024xf32>
    %2 = arith.addf %0, %1 : vector<1x1024xf32>
    %c0_3 = arith.constant 0 : index
    %c0_4 = arith.constant 0 : index
    %3 = vector.load %arg2[%c0_3, %c0_4] : memref<1024x512xf32, #tpu.memory_space<vmem>>, vector<1024x512xf32>
    %cst = arith.constant dense<0.000000e+00> : vector<1x512xf32>
    %4 = tpu.matmul %2, %3, %cst {dimension_numbers = #tpu.dot_dimension_numbers<[1], [0], [0], [1], [0, 0, 1, 1], [], []>} : vector<1x1024xf32>, vector<1024x512xf32>, vector<1x512xf32> -> vector<1x512xf32>
    %c0_5 = arith.constant 0 : index
    %c0_6 = arith.constant 0 : index
    %5 = vector.load %arg3[%c0_5, %c0_6] : memref<1x512xf32, #tpu.memory_space<vmem>>, vector<1x512xf32>
    %6 = arith.addf %4, %5 : vector<1x512xf32>
    %7 = math.sin %6 : vector<1x512xf32>
    %c0_7 = arith.constant 0 : index
    %c0_8 = arith.constant 0 : index
    %8 = vector.load %arg4[%c0_7, %c0_8] : memref<512x256xf32, #tpu.memory_space<vmem>>, vector<512x256xf32>
    %cst_9 = arith.constant dense<0.000000e+00> : vector<1x256xf32>
    %9 = tpu.matmul %7, %8, %cst_9 {dimension_numbers = #tpu.dot_dimension_numbers<[1], [0], [0], [1], [0, 0, 1, 1], [], []>} : vector<1x512xf32>, vector<512x256xf32>, vector<1x256xf32> -> vector<1x256xf32>
    %c0_10 = arith.constant 0 : index
    %c0_11 = arith.constant 0 : index
    %10 = vector.load %arg5[%c0_10, %c0_11] : memref<1x256xf32, #tpu.memory_space<vmem>>, vector<1x256xf32>
    %11 = arith.addf %9, %10 : vector<1x256xf32>
    %12 = math.sin %11 : vector<1x256xf32>
    %c0_12 = arith.constant 0 : index
    %c0_13 = arith.constant 0 : index
    %13 = vector.load %arg6[%c0_12, %c0_13] : memref<256x128xf32, #tpu.memory_space<vmem>>, vector<256x128xf32>
    %cst_14 = arith.constant dense<0.000000e+00> : vector<1x128xf32>
    %14 = tpu.matmul %12, %13, %cst_14 {dimension_numbers = #tpu.dot_dimension_numbers<[1], [0], [0], [1], [0, 0, 1, 1], [], []>} : vector<1x256xf32>, vector<256x128xf32>, vector<1x128xf32> -> vector<1x128xf32>
    %c0_15 = arith.constant 0 : index
    %c0_16 = arith.constant 0 : index
    %15 = vector.load %arg7[%c0_15, %c0_16] : memref<1x128xf32, #tpu.memory_space<vmem>>, vector<1x128xf32>
    %16 = arith.addf %14, %15 : vector<1x128xf32>
    %17 = math.sin %16 : vector<1x128xf32>
    %c0_17 = arith.constant 0 : index
    %c0_18 = arith.constant 0 : index
    %18 = vector.load %arg8[%c0_17, %c0_18] : memref<128x128xf32, #tpu.memory_space<vmem>>, vector<128x128xf32>
    %cst_19 = arith.constant dense<0.000000e+00> : vector<1x128xf32>
    %19 = tpu.matmul %17, %18, %cst_19 {dimension_numbers = #tpu.dot_dimension_numbers<[1], [0], [0], [1], [0, 0, 1, 1], [], []>} : vector<1x128xf32>, vector<128x128xf32>, vector<1x128xf32> -> vector<1x128xf32>
    %c0_20 = arith.constant 0 : index
    %c0_21 = arith.constant 0 : index
    %20 = vector.load %arg9[%c0_20, %c0_21] : memref<1x128xf32, #tpu.memory_space<vmem>>, vector<1x128xf32>
    %21 = arith.addf %19, %20 : vector<1x128xf32>
    %22 = math.tanh %21 : vector<1x128xf32>
    %c0_22 = arith.constant 0 : index
    %c0_23 = arith.constant 0 : index
    %23 = vector.load %arg10[%c0_22, %c0_23] : memref<128x128xf32, #tpu.memory_space<vmem>>, vector<128x128xf32>
    %cst_24 = arith.constant dense<0.000000e+00> : vector<1x128xf32>
    %24 = tpu.matmul %17, %23, %cst_24 {dimension_numbers = #tpu.dot_dimension_numbers<[1], [0], [0], [1], [0, 0, 1, 1], [], []>} : vector<1x128xf32>, vector<128x128xf32>, vector<1x128xf32> -> vector<1x128xf32>
    %c0_25 = arith.constant 0 : index
    %c0_26 = arith.constant 0 : index
    %25 = vector.load %arg11[%c0_25, %c0_26] : memref<1x128xf32, #tpu.memory_space<vmem>>, vector<1x128xf32>
    %26 = arith.addf %24, %25 : vector<1x128xf32>
    %27 = math.tanh %26 : vector<1x128xf32>
    %28 = arith.addf %22, %27 : vector<1x128xf32>
    %29 = arith.mulf %22, %27 : vector<1x128xf32>
    %cst_27 = arith.constant 1.000000e+00 : f32
    %30 = vector.broadcast %cst_27 : f32 to vector<1x128xf32>
    %31 = arith.addf %30, %29 : vector<1x128xf32>
    %cst_28 = arith.constant 1.000000e+00 : f32
    %32 = vector.broadcast %cst_28 : f32 to vector<1x128xf32>
    %33 = arith.divf %32, %31 : vector<1x128xf32>
    %34 = tpu.iota {dimensions = array<i32: 1>} : vector<1x128xi32>
    %c0_i32 = arith.constant 0 : i32
    %35 = vector.broadcast %c0_i32 : i32 to vector<1x128xi32>
    %36 = arith.cmpi eq, %34, %35 : vector<1x128xi32>
    %c1_i32 = arith.constant 1 : i32
    %37 = vector.broadcast %c1_i32 : i32 to vector<1x128xi32>
    %38 = arith.cmpi eq, %34, %37 : vector<1x128xi32>
    %c2_i32 = arith.constant 2 : i32
    %39 = vector.broadcast %c2_i32 : i32 to vector<1x128xi32>
    %40 = arith.cmpi eq, %34, %39 : vector<1x128xi32>
    %cst_29 = arith.constant 0.000000e+00 : f32
    %41 = vector.broadcast %cst_29 : f32 to vector<1x128xf32>
    %42 = arith.select %40, %33, %41 : vector<1x128xi1>, vector<1x128xf32>
    %43 = arith.select %38, %31, %42 : vector<1x128xi1>, vector<1x128xf32>
    %44 = arith.select %36, %28, %43 : vector<1x128xi1>, vector<1x128xf32>
    %c0_30 = arith.constant 0 : index
    %c0_31 = arith.constant 0 : index
    %45 = vector.load %arg12[%c0_30, %c0_31] : memref<1x128xf32, #tpu.memory_space<vmem>>, vector<1x128xf32>
    tpu.vector_store %arg12[%c0_30, %c0_31], %44 {strides = array<i32>} : memref<1x128xf32, #tpu.memory_space<vmem>>, vector<1x128xf32>,
    return
  }
}

module attributes {stable_mosaic.version = 11 : i64} {
  func.func @_allpass_elem_kernel(%arg0: i32, %arg1: memref<1x128xf32, #tpu.memory_space<smem>>, %arg2: memref<1x1024xf32, #tpu.memory_space<vmem>>, %arg3: memref<1x1024xf32, #tpu.memory_space<vmem>>, %arg4: memref<1x1024xf32, #tpu.memory_space<vmem>>, %arg5: memref<1x1024xf32, #tpu.memory_space<vmem>>) attributes {dimension_semantics = [#tpu.dimension_semantics<parallel>], iteration_bounds = array<i64: 1>, scalar_prefetch = 0 : i64, scratch_operands = 0 : i64, tpu.core_type = #tpu.core_type<tc>, window_params = [{transform_indices = @transform_0, window_bounds = array<i64: 1, 128>}, {transform_indices = @transform_1, window_bounds = array<i64: 1, 1024>}, {transform_indices = @transform_2, window_bounds = array<i64: 1, 1024>}, {transform_indices = @transform_3, window_bounds = array<i64: 1, 1024>}, {transform_indices = @transform_4, window_bounds = array<i64: 1, 1024>}]} {
    %c0 = arith.constant 0 : index
    %c0_0 = arith.constant 0 : index
    %0 = memref.load %arg1[%c0, %c0_0] : memref<1x128xf32, #tpu.memory_space<smem>>
    %c0_1 = arith.constant 0 : index
    %c1 = arith.constant 1 : index
    %1 = memref.load %arg1[%c0_1, %c1] : memref<1x128xf32, #tpu.memory_space<smem>>
    %c0_2 = arith.constant 0 : index
    %c2 = arith.constant 2 : index
    %2 = memref.load %arg1[%c0_2, %c2] : memref<1x128xf32, #tpu.memory_space<smem>>
    %c0_3 = arith.constant 0 : index
    %c0_4 = arith.constant 0 : index
    %3 = vector.load %arg2[%c0_3, %c0_4] : memref<1x1024xf32, #tpu.memory_space<vmem>>, vector<1x1024xf32>
    %c0_5 = arith.constant 0 : index
    %c0_6 = arith.constant 0 : index
    %4 = vector.load %arg3[%c0_5, %c0_6] : memref<1x1024xf32, #tpu.memory_space<vmem>>, vector<1x1024xf32>
    %5 = vector.broadcast %0 : f32 to vector<1x1024xf32>
    %6 = arith.mulf %5, %3 : vector<1x1024xf32>
    %7 = arith.addf %6, %4 : vector<1x1024xf32>
    %8 = vector.broadcast %2 : f32 to vector<1x1024xf32>
    %9 = arith.mulf %7, %8 : vector<1x1024xf32>
    %c0_7 = arith.constant 0 : index
    %c0_8 = arith.constant 0 : index
    %10 = vector.load %arg4[%c0_7, %c0_8] : memref<1x1024xf32, #tpu.memory_space<vmem>>, vector<1x1024xf32>
    tpu.vector_store %arg4[%c0_7, %c0_8], %9 {strides = array<i32>} : memref<1x1024xf32, #tpu.memory_space<vmem>>, vector<1x1024xf32>,
    %11 = vector.broadcast %1 : f32 to vector<1x1024xf32>
    %12 = arith.mulf %11, %3 : vector<1x1024xf32>
    %13 = vector.broadcast %0 : f32 to vector<1x1024xf32>
    %14 = arith.mulf %13, %9 : vector<1x1024xf32>
    %15 = arith.subf %12, %14 : vector<1x1024xf32>
    %c0_9 = arith.constant 0 : index
    %c0_10 = arith.constant 0 : index
    %16 = vector.load %arg5[%c0_9, %c0_10] : memref<1x1024xf32, #tpu.memory_space<vmem>>, vector<1x1024xf32>
    tpu.vector_store %arg5[%c0_9, %c0_10], %15 {strides = array<i32>} : memref<1x1024xf32, #tpu.memory_space<vmem>>, vector<1x1024xf32>,
    return
  }
  func.func @transform_0(%arg0: i32) -> (i32, i32) {
    %c0_i32 = arith.constant 0 : i32
    %c0_i32_0 = arith.constant 0 : i32
    %c0_i32_1 = arith.constant 0 : i32
    return %c0_i32, %c0_i32_0 : i32, i32
  }
  func.func @transform_1(%arg0: i32) -> (i32, i32) {
    %c0_i32 = arith.constant 0 : i32
    %c0_i32_0 = arith.constant 0 : i32
    return %arg0, %c0_i32 : i32, i32
  }
  func.func @transform_2(%arg0: i32) -> (i32, i32) {
    %c0_i32 = arith.constant 0 : i32
    %c0_i32_0 = arith.constant 0 : i32
    return %arg0, %c0_i32 : i32, i32
  }
  func.func @transform_3(%arg0: i32) -> (i32, i32) {
    %c0_i32 = arith.constant 0 : i32
    %c0_i32_0 = arith.constant 0 : i32
    return %arg0, %c0_i32 : i32, i32
  }
  func.func @transform_4(%arg0: i32) -> (i32, i32) {
    %c0_i32 = arith.constant 0 : i32
    %c0_i32_0 = arith.constant 0 : i32
    return %arg0, %c0_i32 : i32, i32
  }
}

</mosaic_0001>

<bundles_post_ra>
// kernel: allpass_forward.3
= control target key start
LH: loop header
LB: loop body
LE: loop exit
PB: predicated region body
PF: predicated region fallthrough
CT: control target
= control target key end

     0   :  { %10 = vsyncpa [#allocation4], 0  ;;  %s204_s0 = inlined_call_operand.vmem [shape: f32[1,128], index: 0, kind: input, shape index: {}]   ;;  %s205_s1 = inlined_call_operand.vmem [shape: f32[1,1024], index: 1, kind: input, shape index: {}]   ;;  %s206_s2 = inlined_call_operand.vmem [shape: f32[1,1024], index: 2, kind: input, shape index: {}]   ;;  %s207_s3 = inlined_call_operand.hbm [shape: f32[1,1024], index: 3, kind: output, shape index: {0}]   ;;  %s208_s4 = inlined_call_operand.hbm [shape: f32[1,1024], index: 4, kind: output, shape index: {1}]  }
   0x1   :  { %11 = vsyncpa [#allocation3], 0 }
   0x2   :  { %12 = vsyncpa [#allocation7], 0  ;;  %s19_s17 = sshll.u32 %s204_s0, 4  ;;  %s20_s17 = int_to_ptr.vmem [resolvable:$true] %s19_s17 }
   0x3   :  { %s81_s18 = scalar_lea.vmem %s20_s17, 16  ;;  %p86_p1 = scmp.lt.s32.totalorder %s20_s17, %s20_s17 }
   0x4   :  { %p82_p0 = scmp.ne.s32.totalorder %s20_s17, %s81_s18  ;;  %p87_p2 = scmp.lt.s32.totalorder %s81_s18, %s81_s18 }
   0x6   :  { %p88_p3 = por %p87_p2, %p86_p1 }
   0x8   :  { %p89_p4 = pnand %p88_p3, %p82_p0 }
   0xa   :  { %92 = shalt.err (!%p89_p4)
}
   0xb   :  { %s143_s19 = smov [#allocation2]  }
   0xc   :  { %22 = dma.vmem_to_smem %s20_s17, 16, %s143_s19, [#allocation4]  }
   0xd   :  { %137 = dma.done.wait [#allocation4], 16  }
   0xe   :  { %138 = vsyncadd [#allocation4], 4294967280 }
   0xf   :  { %30 = sfence }
  0x10   :  { %s31_s20 = sld [smem:[#allocation2]]  ;;  %s77_s21 = sld [smem:[#allocation2 + $0x2]]  ;;  %v34_v0 = vld [vmem:[%s205_s1] sm:$0xff] }
  0x11   :  { %s76_s22 = sld [smem:[#allocation2 + $0x1]]  ;;  %v35_v1 = vld [vmem:[%s206_s2] sm:$0xff]  ;;  %s144_s26 = smov [#allocation5]  }
  0x12   :  { %s53_s27 = sshll.u32 %s144_s26, 4  ;;  %s145_s28 = smov [#allocation6]   ;;  %s54_s27 = int_to_ptr.vmem [resolvable:$true] %s53_s27 }
  0x13   :  { %s63_s29 = sshll.u32 %s145_s28, 4  ;;  %s93_s30 = scalar_lea.vmem %s54_s27, 128  ;;  %s64_s29 = int_to_ptr.vmem [resolvable:$true] %s63_s29 }
  0x14   :  { %p94_p5 = scmp.ne.s32.totalorder %s54_s27, %s93_s30  ;;  %p98_p6 = scmp.lt.s32.totalorder %s54_s27, %s54_s27 }
  0x15   :  { %p99_p7 = scmp.lt.s32.totalorder %s93_s30, %s93_s30 }
  0x16   :  { %v36_v2 = vstv %s31_s20  ;;  %v39_v4 = vstv %s77_s21 }
  0x17   :  { %v37_v3 = vmul.f32 %v36_v2, %v34_v0  ;;  %v42_v5 = vstv %s76_s22  ;;  %p100_p8 = por %p99_p7, %p98_p6 }
  0x18   :  { %v43_v8 = vmul.f32 %v42_v5, %v34_v0 }
  0x19   :  { %v38_v6 = vadd.f32 %v37_v3, %v35_v1  ;;  %p101_p9 = pnand %p100_p8, %p94_p5 }
  0x1b   :  { %v40_v7 = vmul.f32 %v39_v4, %v38_v6 }
  0x1d   :  { %41 = vst [vmem:[#allocation5] sm:$0xff] %v40_v7  ;;  %v44_v9 = vmul.f32 %v40_v7, %v36_v2 }
  0x1e   :  { %104 = shalt.err (!%p101_p9)
}
  0x1f   :  { %s105_s5 = scalar_lea.hbm %s207_s3, 128 }
  0x20   :  { %p106_p10 = scmp.ne.s32.totalorder %s207_s3, %s105_s5  ;;  %p109_p11 = scmp.lt.u32.totalorder %s105_s5, %s207_s3 }
  0x22   :  { %p111_p12 = pnand %p109_p11, %p106_p10 }
  0x24   :  { %114 = shalt.err (!%p111_p12)
}
  0x25   :  { %56 = dma.vmem_to_hbm [thread:$0]  %s54_s27, 128, %s207_s3, [#allocation3]   ;;  %v45_v10 = vsub.f32 %v43_v8, %v44_v9 }
  0x26   :  { %s115_s12 = scalar_lea.vmem %s64_s29, 128  ;;  %p120_p0 = scmp.lt.s32.totalorder %s64_s29, %s64_s29 }
  0x27   :  { %46 = vst [vmem:[#allocation6] sm:$0xff] %v45_v10  ;;  %p116_p13 = scmp.ne.s32.totalorder %s64_s29, %s115_s12  ;;  %p121_p1 = scmp.lt.s32.totalorder %s115_s12, %s115_s12 }
  0x29   :  { %p122_p2 = por %p121_p1, %p120_p0 }
  0x2b   :  { %p123_p3 = pnand %p122_p2, %p116_p13 }
  0x2d   :  { %126 = shalt.err (!%p123_p3)
}
  0x2e   :  { %s127_s15 = scalar_lea.hbm %s208_s4, 128 }
  0x2f   :  { %p128_p4 = scmp.ne.s32.totalorder %s208_s4, %s127_s15  ;;  %p131_p5 = scmp.lt.u32.totalorder %s127_s15, %s208_s4 }
  0x31   :  { %p133_p6 = pnand %p131_p5, %p128_p4 }
  0x33   :  { %136 = shalt.err (!%p133_p6)
}
  0x34   :  { %66 = dma.vmem_to_hbm [thread:$0]  %s64_s29, 128, %s208_s4, [#allocation7]  }
  0x35   :  { %139 = dma.done.wait [#allocation3], 128  }
  0x36   :  { %140 = vsyncadd [#allocation3], 4294967168 }
  0x37   :  { %141 = dma.done.wait [#allocation7], 128  }
  0x38   :  { %142 = vsyncadd [#allocation7], 4294967168 }
  0x39   :  { %73 = vsyncpa [#allocation3], 1 }
  0x3a   :  { %74 = vsyncpa [#allocation7], 1 }
  0x3b   :  { %75 = vsyncpa [#allocation4], 1 }

// kernel: allpass_forward.2
= control target key start
LH: loop header
LB: loop body
LE: loop exit
PB: predicated region body
PF: predicated region fallthrough
CT: control target
= control target key end

     0   :  { %17 = vsyncpa [#allocation3], 0  ;;  %s4530_s0 = inlined_call_operand.hbm [shape: f32[1,1024], index: 0, kind: input, shape index: {}]   ;;  %s4531_s1 = inlined_call_operand.hbm [shape: f32[1,1024], index: 1, kind: input, shape index: {}]   ;;  %s4532_s2 = inlined_call_operand.hbm [shape: f32[1024,512], index: 2, kind: input, shape index: {}]   ;;  %s4533_s3 = inlined_call_operand.hbm [shape: f32[1,512], index: 3, kind: input, shape index: {}]   ;;  %s4534_s4 = inlined_call_operand.hbm [shape: f32[512,256], index: 4, kind: input, shape index: {}]   ;;  %s4535_s5 = inlined_call_operand.hbm [shape: f32[1,256], index: 5, kind: input, shape index: {}]   ;;  %s4536_s6 = inlined_call_operand.hbm [shape: f32[256,128], index: 6, kind: input, shape index: {}]   ;;  %s4537_s7 = inlined_call_operand.hbm [shape: f32[1,128], index: 7, kind: input, shape index: {}]   ;;  %s4538_s8 = inlined_call_operand.vmem [shape: f32[128,128], index: 8, kind: input, shape index: {}]   ;;  %s4539_s9 = inlined_call_operand.vmem [shape: f32[1,128], index: 9, kind: input, shape index: {}]   ;;  %s4540_s10 = inlined_call_operand.vmem [shape: f32[128,128], index: 10, kind: input, shape index: {}]   ;;  %s4541_s11 = inlined_call_operand.vmem [shape: f32[1,128], index: 11, kind: input, shape index: {}]   ;;  %s4542_s12 = inlined_call_operand.vmem [shape: f32[1,128], index: 12, kind: output, shape index: {}]  }
   0x1   :  { %18 = vsyncpa [#allocation5], 0 }
   0x2   :  { %19 = vsyncpa [#allocation8], 0 }
   0x3   :  { %20 = vsyncpa [#allocation11], 0 }
   0x4   :  { %21 = vsyncpa [#allocation14], 0  ;;  %s3776_s21 = smov [#allocation4]   ;;  %s3777_s23 = smov [#allocation7]  }
   0x5   :  { %s38_s22 = sshll.u32 %s3776_s21, 4  ;;  %s60_s24 = sshll.u32 %s3777_s23, 4  ;;  %s39_s22 = int_to_ptr.vmem [resolvable:$true] %s38_s22  ;;  %s61_s24 = int_to_ptr.vmem [resolvable:$true] %s60_s24 }
   0x6   :  { %s3590_s27 = scalar_lea.hbm %s4531_s1, 128 }
   0x7   :  { %p3591_p0 = scmp.ne.s32.totalorder %s4531_s1, %s3590_s27  ;;  %p3594_p1 = scmp.lt.u32.totalorder %s3590_s27, %s4531_s1 }
   0x9   :  { %p3596_p2 = pnand %p3594_p1, %p3591_p0 }
   0xb   :  { %3599 = shalt.err (!%p3596_p2)
}
   0xc   :  { %s3600_s14 = scalar_lea.vmem %s39_s22, 128  ;;  %p3605_p4 = scmp.lt.s32.totalorder %s39_s22, %s39_s22 }
   0xd   :  { %p3601_p3 = scmp.ne.s32.totalorder %s39_s22, %s3600_s14  ;;  %p3606_p5 = scmp.lt.s32.totalorder %s3600_s14, %s3600_s14 }
   0xf   :  { %p3607_p6 = por %p3606_p5, %p3605_p4 }
  0x11   :  { %p3608_p7 = pnand %p3607_p6, %p3601_p3 }
  0x13   :  { %3611 = shalt.err (!%p3608_p7)
}
  0x14   :  { %41 = dma.hbm_to_vmem [thread:$0]  %s4531_s1, 128, %s39_s22, [#allocation5]  }
  0x15   :  { %s3612_s19 = scalar_lea.hbm %s4533_s3, 64 }
  0x16   :  { %p3613_p8 = scmp.ne.s32.totalorder %s4533_s3, %s3612_s19  ;;  %p3616_p9 = scmp.lt.u32.totalorder %s3612_s19, %s4533_s3 }
  0x18   :  { %p3618_p10 = pnand %p3616_p9, %p3613_p8 }
  0x1a   :  { %3621 = shalt.err (!%p3618_p10)
}
  0x1b   :  { %s3622_s26 = scalar_lea.vmem %s61_s24, 64  ;;  %p3627_p12 = scmp.lt.s32.totalorder %s61_s24, %s61_s24 }
  0x1c   :  { %p3623_p11 = scmp.ne.s32.totalorder %s61_s24, %s3622_s26  ;;  %p3628_p13 = scmp.lt.s32.totalorder %s3622_s26, %s3622_s26 }
  0x1e   :  { %p3629_p0 = por %p3628_p13, %p3627_p12 }
  0x20   :  { %p3630_p1 = pnand %p3629_p0, %p3623_p11 }
  0x22   :  { %3633 = shalt.err (!%p3630_p1)
}
  0x23   :  { %63 = dma.hbm_to_vmem [thread:$0]  %s4533_s3, 64, %s61_s24, [#allocation8]  }
  0x24   :  { %s3778_s27 = smov [#allocation10]   ;;  %s3779_s29 = smov [#allocation2]  }
  0x25   :  { %s82_s28 = sshll.u32 %s3778_s27, 4  ;;  %s28_s30 = sshll.u32 %s3779_s29, 4  ;;  %s83_s28 = int_to_ptr.vmem [resolvable:$true] %s82_s28  ;;  %s29_s30 = int_to_ptr.vmem [resolvable:$true] %s28_s30 }
  0x26   :  { %s3634_s15 = scalar_lea.hbm %s4535_s5, 32 }
  0x27   :  { %p3635_p2 = scmp.ne.s32.totalorder %s4535_s5, %s3634_s15  ;;  %p3638_p3 = scmp.lt.u32.totalorder %s3634_s15, %s4535_s5 }
  0x29   :  { %p3640_p4 = pnand %p3638_p3, %p3635_p2 }
  0x2b   :  { %3643 = shalt.err (!%p3640_p4)
}
  0x2c   :  { %s3644_s3 = scalar_lea.vmem %s83_s28, 32  ;;  %p3649_p6 = scmp.lt.s32.totalorder %s83_s28, %s83_s28 }
  0x2d   :  { %p3645_p5 = scmp.ne.s32.totalorder %s83_s28, %s3644_s3  ;;  %p3650_p7 = scmp.lt.s32.totalorder %s3644_s3, %s3644_s3 }
  0x2f   :  { %p3651_p8 = por %p3650_p7, %p3649_p6 }
  0x31   :  { %p3652_p9 = pnand %p3651_p8, %p3645_p5 }
  0x33   :  { %3655 = shalt.err (!%p3652_p9)
}
  0x34   :  { %85 = dma.hbm_to_vmem [thread:$0]  %s4535_s5, 32, %s83_s28, [#allocation11]  }
  0x35   :  { %s3656_s25 = scalar_lea.hbm %s4530_s0, 128 }
  0x36   :  { %p3657_p10 = scmp.ne.s32.totalorder %s4530_s0, %s3656_s25  ;;  %p3660_p11 = scmp.lt.u32.totalorder %s3656_s25, %s4530_s0 }
  0x38   :  { %p3662_p12 = pnand %p3660_p11, %p3657_p10 }
  0x3a   :  { %3665 = shalt.err (!%p3662_p12)
}
  0x3b   :  { %s3666_s29 = scalar_lea.vmem %s29_s30, 128  ;;  %p3671_p0 = scmp.lt.s32.totalorder %s29_s30, %s29_s30 }
  0x3c   :  { %p3667_p13 = scmp.ne.s32.totalorder %s29_s30, %s3666_s29  ;;  %p3672_p1 = scmp.lt.s32.totalorder %s3666_s29, %s3666_s29 }
  0x3e   :  { %p3673_p2 = por %p3672_p1, %p3671_p0 }
  0x40   :  { %p3674_p3 = pnand %p3673_p2, %p3667_p13 }
  0x42   :  { %3677 = shalt.err (!%p3674_p3)
}
  0x43   :  { %31 = dma.hbm_to_vmem [thread:$0]  %s4530_s0, 128, %s29_s30, [#allocation3]  }
  0x44   :  { %s3780_s13 = smov [#allocation6]   ;;  %s3678_s17 = scalar_lea.hbm %s4532_s2, 65536 }
  0x45   :  { %s47_s14 = sshll.u32 %s3780_s13, 4  ;;  %p3679_p4 = scmp.ne.s32.totalorder %s4532_s2, %s3678_s17  ;;  %s48_s14 = int_to_ptr.vmem [resolvable:$true] %s47_s14 }
  0x46   :  { %p3682_p5 = scmp.lt.u32.totalorder %s3678_s17, %s4532_s2 }
  0x48   :  { %p3684_p6 = pnand %p3682_p5, %p3679_p4 }
  0x4a   :  { %3687 = shalt.err (!%p3684_p6)
}
  0x4b   :  { %s3688_s20 = scalar_lea.vmem %s48_s14, 65536  ;;  %p3693_p8 = scmp.lt.s32.totalorder %s48_s14, %s48_s14 }
  0x4c   :  { %p3689_p7 = scmp.ne.s32.totalorder %s48_s14, %s3688_s20  ;;  %p3694_p9 = scmp.lt.s32.totalorder %s3688_s20, %s3688_s20 }
  0x4e   :  { %p3695_p10 = por %p3694_p9, %p3693_p8 }
  0x50   :  { %p3696_p11 = pnand %p3695_p10, %p3689_p7 }
  0x52   :  { %3699 = shalt.err (!%p3696_p11)
}
  0x53   :  { %s3781_s0 = smov 512   ;;  %s3782_s30 = smov 32  }
  0x54   :  { %53 = dma.hbm_to_vmem [thread:$0]  %s4532_s2, 65536, %s48_s14, [#allocation5], %s3781_s0, %s3781_s0, %s3782_s30  }
  0x55   :  { %s3783_s25 = smov [#allocation9]   ;;  %s3700_s27 = scalar_lea.hbm %s4534_s4, 16384 }
  0x56   :  { %s69_s26 = sshll.u32 %s3783_s25, 4  ;;  %p3701_p12 = scmp.ne.s32.totalorder %s4534_s4, %s3700_s27  ;;  %s70_s26 = int_to_ptr.vmem [resolvable:$true] %s69_s26 }
  0x57   :  { %p3704_p13 = scmp.lt.u32.totalorder %s3700_s27, %s4534_s4 }
  0x59   :  { %p3706_p0 = pnand %p3704_p13, %p3701_p12 }
  0x5b   :  { %3709 = shalt.err (!%p3706_p0)
}
  0x5c   :  { %s3710_s15 = scalar_lea.vmem %s70_s26, 16384  ;;  %p3715_p2 = scmp.lt.s32.totalorder %s70_s26, %s70_s26 }
  0x5d   :  { %p3711_p1 = scmp.ne.s32.totalorder %s70_s26, %s3710_s15  ;;  %p3716_p3 = scmp.lt.s32.totalorder %s3710_s15, %s3710_s15 }
  0x5f   :  { %p3717_p4 = por %p3716_p3, %p3715_p2 }
  0x61   :  { %p3718_p5 = pnand %p3717_p4, %p3711_p1 }
  0x63   :  { %3721 = shalt.err (!%p3718_p5)
}
  0x64   :  { %s3784_s2 = smov 256   ;;  %s3785_s14 = smov 16  }
  0x65   :  { %75 = dma.hbm_to_vmem [thread:$0]  %s4534_s4, 16384, %s70_s26, [#allocation8], %s3784_s2, %s3784_s2, %s3785_s14  }
  0x66   :  { %s3786_s18 = smov [#allocation12]   ;;  %s3722_s20 = scalar_lea.hbm %s4536_s6, 4096 }
  0x67   :  { %s91_s19 = sshll.u32 %s3786_s18, 4  ;;  %p3723_p6 = scmp.ne.s32.totalorder %s4536_s6, %s3722_s20  ;;  %s92_s19 = int_to_ptr.vmem [resolvable:$true] %s91_s19 }
  0x68   :  { %p3726_p7 = scmp.lt.u32.totalorder %s3722_s20, %s4536_s6 }
  0x6a   :  { %p3728_p8 = pnand %p3726_p7, %p3723_p6 }
  0x6c   :  { %3731 = shalt.err (!%p3728_p8)
}
  0x6d   :  { %s3732_s25 = scalar_lea.vmem %s92_s19, 4096  ;;  %p3737_p10 = scmp.lt.s32.totalorder %s92_s19, %s92_s19 }
  0x6e   :  { %p3733_p9 = scmp.ne.s32.totalorder %s92_s19, %s3732_s25  ;;  %p3738_p11 = scmp.lt.s32.totalorder %s3732_s25, %s3732_s25 }
  0x70   :  { %p3739_p12 = por %p3738_p11, %p3737_p10 }
  0x72   :  { %p3740_p13 = pnand %p3739_p12, %p3733_p9 }
  0x74   :  { %3743 = shalt.err (!%p3740_p13)
}
  0x75   :  { %s3787_s4 = smov 128   ;;  %s3788_s26 = smov 8  }
  0x76   :  { %97 = dma.hbm_to_vmem [thread:$0]  %s4536_s6, 4096, %s92_s19, [#allocation11], %s3787_s4, %s3787_s4, %s3788_s26  }
  0x77   :  { %s3789_s27 = smov [#allocation13]   ;;  %s3744_s13 = scalar_lea.hbm %s4537_s7, 16 }
  0x78   :  { %s104_s29 = sshll.u32 %s3789_s27, 4  ;;  %p3745_p0 = scmp.ne.s32.totalorder %s4537_s7, %s3744_s13  ;;  %s105_s29 = int_to_ptr.vmem [resolvable:$true] %s104_s29 }
  0x79   :  { %p3748_p1 = scmp.lt.u32.totalorder %s3744_s13, %s4537_s7 }
  0x7b   :  { %p3750_p2 = pnand %p3748_p1, %p3745_p0 }
  0x7d   :  { %3753 = shalt.err (!%p3750_p2)
}
  0x7e   :  { %s3754_s17 = scalar_lea.vmem %s105_s29, 16  ;;  %s3758_s6 = scalar_lea.vmem %s105_s29, 32 }
  0x7f   :  { %p3755_p3 = scmp.ne.s32.totalorder %s105_s29, %s3754_s17  ;;  %p3759_p4 = scmp.lt.s32.totalorder %s105_s29, %s105_s29 }
  0x80   :  { %p3760_p5 = scmp.lt.s32.totalorder %s3758_s6, %s3754_s17 }
  0x82   :  { %p3761_p6 = por %p3760_p5, %p3759_p4 }
  0x84   :  { %p3762_p7 = pnand %p3761_p6, %p3755_p3 }
  0x86   :  { %3765 = shalt.err (!%p3762_p7)
}
  0x87   :  { %107 = dma.hbm_to_vmem [thread:$0]  %s4537_s7, 16, %s105_s29, [#allocation14]  }
  0x88   :  { %3766 = dma.done.wait [#allocation3], 128  }
  0x89   :  { %3767 = vsyncadd [#allocation3], 4294967168 }
  0x8a   :  { %3768 = dma.done.wait [#allocation5], 65664  }
  0x8b   :  { %3769 = vsyncadd [#allocation5], 4294901632 }
  0x8c   :  { %3770 = dma.done.wait [#allocation8], 16448  }
  0x8d   :  { %3771 = vsyncadd [#allocation8], 4294950848 }
  0x8e   :  { %3772 = dma.done.wait [#allocation11], 4128  }
  0x8f   :  { %3773 = vsyncadd [#allocation11], 4294963168 }
  0x90   :  { %3774 = dma.done.wait [#allocation14], 16  }
  0x91   :  { %3775 = vsyncadd [#allocation14], 4294967280  ;;  %v144_v0 = vld [vmem:[#allocation6 + $0x8] sm:$0xff]  ;;  %v146_v2 = vld [vmem:[#allocation6 + $0x18] sm:$0xff] }
  0x92   :  { %v148_v1 = vld [vmem:[#allocation6 + $0x28] sm:$0xff]  ;;  %v150_v4 = vld [vmem:[#allocation6 + $0x38] sm:$0xff]  ;;  %v143_v5 = vld [vmem:[#allocation6] sm:$0xff] }
  0x93   :  { %v2765_v3 = vpack.c.bf16 %v148_v1, %v144_v0  ;;  %v147_v6 = vld [vmem:[#allocation6 + $0x20] sm:$0xff]  ;;  %v3021_v7 = vpack.c.bf16 %v150_v4, %v146_v2  ;;  %v145_v9 = vld [vmem:[#allocation6 + $0x10] sm:$0xff]  ;;  %v152_v11 = vld [vmem:[#allocation6 + $0x48] sm:$0xff] }
  0x94   :  { %v2767_v8 = vpack.c.bf16 %v147_v6, %v143_v5  ;;  %v149_v10 = vld [vmem:[#allocation6 + $0x30] sm:$0xff]  ;;  %v156_v13 = vld [vmem:[#allocation6 + $0x68] sm:$0xff]  ;;  %v154_v14 = vld [vmem:[#allocation6 + $0x58] sm:$0xff] }
  0x95   :  { %2766 = vmatprep.subr.bf16.mxu0 %v2765_v3  ;;  %v3023_v12 = vpack.c.bf16 %v149_v10, %v145_v9  ;;  %v158_v15 = vld [vmem:[#allocation6 + $0x78] sm:$0xff]  ;;  %3022 = vmatprep.subr.bf16.mxu1 %v3021_v7  ;;  %v2769_v16 = vpack.c.bf16 %v156_v13, %v152_v11  ;;  %v151_v18 = vld [vmem:[#allocation6 + $0x40] sm:$0xff]  ;;  %v153_v20 = vld [vmem:[#allocation6 + $0x50] sm:$0xff] }
  0x96   :  { %2768 = vmatpush1.bf16.msra.mxu0 %v2767_v8  ;;  %v3025_v17 = vpack.c.bf16 %v158_v15, %v154_v14  ;;  %v155_v19 = vld [vmem:[#allocation6 + $0x60] sm:$0xff]  ;;  %v157_v22 = vld [vmem:[#allocation6 + $0x70] sm:$0xff]  ;;  %v160_v23 = vld [vmem:[#allocation6 + $0x88] sm:$0xff] }
  0x97   :  { %3024 = vmatpush1.bf16.msra.mxu1 %v3023_v12  ;;  %v2771_v21 = vpack.c.bf16 %v155_v19, %v151_v18  ;;  %v164_v24 = vld [vmem:[#allocation6 + $0xa8] sm:$0xff]  ;;  %2770 = vmatprep.subr.bf16.mxu0 %v2769_v16  ;;  %v3027_v25 = vpack.c.bf16 %v157_v22, %v153_v20  ;;  %v162_v27 = vld [vmem:[#allocation6 + $0x98] sm:$0xff]  ;;  %v159_v29 = vld [vmem:[#allocation6 + $0x80] sm:$0xff] }
  0x98   :  { %3026 = vmatprep.subr.bf16.mxu1 %v3025_v17  ;;  %v2773_v26 = vpack.c.bf16 %v164_v24, %v160_v23  ;;  %v166_v28 = vld [vmem:[#allocation6 + $0xb8] sm:$0xff]  ;;  %v163_v31 = vld [vmem:[#allocation6 + $0xa0] sm:$0xff]  ;;  %v161_v32 = vld [vmem:[#allocation6 + $0x90] sm:$0xff] }
  0x99   :  { %v3029_v30 = vpack.c.bf16 %v166_v28, %v162_v27  ;;  %v165_v33 = vld [vmem:[#allocation6 + $0xb0] sm:$0xff]  ;;  %v2775_v34 = vpack.c.bf16 %v163_v31, %v159_v29  ;;  %v168_v35 = vld [vmem:[#allocation6 + $0xc8] sm:$0xff]  ;;  %v170_v37 = vld [vmem:[#allocation6 + $0xd8] sm:$0xff] }
  0x9a   :  { %2772 = vmatpush1.bf16.msra.mxu0 %v2771_v21  ;;  %v172_v36 = vld [vmem:[#allocation6 + $0xe8] sm:$0xff]  ;;  %v3031_v38 = vpack.c.bf16 %v165_v33, %v161_v32  ;;  %v174_v40 = vld [vmem:[#allocation6 + $0xf8] sm:$0xff]  ;;  %v167_v41 = vld [vmem:[#allocation6 + $0xc0] sm:$0xff] }
  0x9b   :  { %3028 = vmatpush1.bf16.msra.mxu1 %v3027_v25  ;;  %2774 = vmatprep.subr.bf16.mxu0 %v2773_v26  ;;  %v2777_v39 = vpack.c.bf16 %v172_v36, %v168_v35  ;;  %v171_v42 = vld [vmem:[#allocation6 + $0xe0] sm:$0xff]  ;;  %v3033_v43 = vpack.c.bf16 %v174_v40, %v170_v37  ;;  %v169_v44 = vld [vmem:[#allocation6 + $0xd0] sm:$0xff]  ;;  %v176_v46 = vld [vmem:[#allocation6 + $0x108] sm:$0xff] }
  0x9c   :  { %3030 = vmatprep.subr.bf16.mxu1 %v3029_v30  ;;  %v173_v45 = vld [vmem:[#allocation6 + $0xf0] sm:$0xff]  ;;  %v180_v47 = vld [vmem:[#allocation6 + $0x128] sm:$0xff]  ;;  %v178_v48 = vld [vmem:[#allocation6 + $0x118] sm:$0xff]  ;;  %v2779_v50 = vpack.c.bf16 %v171_v42, %v167_v41 }
  0x9d   :  { %v182_v49 = vld [vmem:[#allocation6 + $0x138] sm:$0xff]  ;;  %v3035_v51 = vpack.c.bf16 %v173_v45, %v169_v44  ;;  %v2781_v52 = vpack.c.bf16 %v180_v47, %v176_v46  ;;  %v175_v53 = vld [vmem:[#allocation6 + $0x100] sm:$0xff]  ;;  %v177_v55 = vld [vmem:[#allocation6 + $0x110] sm:$0xff] }
  0x9e   :  { %2776 = vmatpush1.bf16.msra.mxu0 %v2775_v34  ;;  %v179_v54 = vld [vmem:[#allocation6 + $0x120] sm:$0xff]  ;;  %v3037_v56 = vpack.c.bf16 %v182_v49, %v178_v48  ;;  %v181_v57 = vld [vmem:[#allocation6 + $0x130] sm:$0xff]  ;;  %v184_v58 = vld [vmem:[#allocation6 + $0x148] sm:$0xff] }
  0x9f   :  { %3032 = vmatpush1.bf16.msra.mxu1 %v3031_v38  ;;  %2778 = vmatprep.subr.bf16.mxu0 %v2777_v39  ;;  %v188_v59 = vld [vmem:[#allocation6 + $0x168] sm:$0xff]  ;;  %v186_v60 = vld [vmem:[#allocation6 + $0x158] sm:$0xff]  ;;  %v2783_v62 = vpack.c.bf16 %v179_v54, %v175_v53  ;;  %v3039_v63 = vpack.c.bf16 %v181_v57, %v177_v55  ;;  %v183_v1 = vld [vmem:[#allocation6 + $0x140] sm:$0xff] }
  0xa0   :  { %3034 = vmatprep.subr.bf16.mxu1 %v3033_v43  ;;  %v190_v61 = vld [vmem:[#allocation6 + $0x178] sm:$0xff]  ;;  %v2785_v0 = vpack.c.bf16 %v188_v59, %v184_v58  ;;  %v187_v2 = vld [vmem:[#allocation6 + $0x160] sm:$0xff]  ;;  %v185_v3 = vld [vmem:[#allocation6 + $0x150] sm:$0xff] }
  0xa1   :  { %v3041_v4 = vpack.c.bf16 %v190_v61, %v186_v60  ;;  %v189_v5 = vld [vmem:[#allocation6 + $0x170] sm:$0xff]  ;;  %v192_v6 = vld [vmem:[#allocation6 + $0x188] sm:$0xff]  ;;  %v194_v8 = vld [vmem:[#allocation6 + $0x198] sm:$0xff]  ;;  %v2787_v10 = vpack.c.bf16 %v187_v2, %v183_v1 }
  0xa2   :  { %2780 = vmatpush1.bf16.msra.mxu0 %v2779_v50  ;;  %v196_v7 = vld [vmem:[#allocation6 + $0x1a8] sm:$0xff]  ;;  %v198_v9 = vld [vmem:[#allocation6 + $0x1b8] sm:$0xff]  ;;  %v3043_v11 = vpack.c.bf16 %v189_v5, %v185_v3  ;;  %v191_v13 = vld [vmem:[#allocation6 + $0x180] sm:$0xff] }
  0xa3   :  { %3036 = vmatpush1.bf16.msra.mxu1 %v3035_v51  ;;  %2782 = vmatprep.subr.bf16.mxu0 %v2781_v52  ;;  %v2789_v12 = vpack.c.bf16 %v196_v7, %v192_v6  ;;  %v195_v14 = vld [vmem:[#allocation6 + $0x1a0] sm:$0xff]  ;;  %v193_v15 = vld [vmem:[#allocation6 + $0x190] sm:$0xff]  ;;  %v3045_v16 = vpack.c.bf16 %v198_v9, %v194_v8  ;;  %v200_v18 = vld [vmem:[#allocation6 + $0x1c8] sm:$0xff] }
  0xa4   :  { %3038 = vmatprep.subr.bf16.mxu1 %v3037_v56  ;;  %v197_v17 = vld [vmem:[#allocation6 + $0x1b0] sm:$0xff]  ;;  %v204_v19 = vld [vmem:[#allocation6 + $0x1e8] sm:$0xff]  ;;  %v202_v20 = vld [vmem:[#allocation6 + $0x1d8] sm:$0xff]  ;;  %v2791_v22 = vpack.c.bf16 %v195_v14, %v191_v13  ;;  %v657_v56 = vlaneseq }
  0xa5   :  { %v206_v21 = vld [vmem:[#allocation6 + $0x1f8] sm:$0xff]  ;;  %v3047_v23 = vpack.c.bf16 %v197_v17, %v193_v15  ;;  %v2793_v24 = vpack.c.bf16 %v204_v19, %v200_v18  ;;  %v199_v25 = vld [vmem:[#allocation6 + $0x1c0] sm:$0xff]  ;;  %v201_v27 = vld [vmem:[#allocation6 + $0x1d0] sm:$0xff] }
  0xa6   :  { %2784 = vmatpush1.bf16.msra.mxu0 %v2783_v62  ;;  %v203_v26 = vld [vmem:[#allocation6 + $0x1e0] sm:$0xff]  ;;  %v3049_v28 = vpack.c.bf16 %v206_v21, %v202_v20  ;;  %v205_v29 = vld [vmem:[#allocation6 + $0x1f0] sm:$0xff]  ;;  %v208_v30 = vld [vmem:[#allocation6 + $0x208] sm:$0xff]  ;;  %v3961_v5 = vshrl.u32 %v657_v56, 7 }
  0xa7   :  { %3040 = vmatpush1.bf16.msra.mxu1 %v3039_v63  ;;  %2786 = vmatprep.subr.bf16.mxu0 %v2785_v0  ;;  %v212_v31 = vld [vmem:[#allocation6 + $0x228] sm:$0xff]  ;;  %v210_v32 = vld [vmem:[#allocation6 + $0x218] sm:$0xff]  ;;  %v2795_v34 = vpack.c.bf16 %v203_v26, %v199_v25  ;;  %v3051_v35 = vpack.c.bf16 %v205_v29, %v201_v27  ;;  %v207_v37 = vld [vmem:[#allocation6 + $0x200] sm:$0xff] }
  0xa8   :  { %3042 = vmatprep.subr.bf16.mxu1 %v3041_v4  ;;  %v214_v33 = vld [vmem:[#allocation6 + $0x238] sm:$0xff]  ;;  %v2797_v36 = vpack.c.bf16 %v212_v31, %v208_v30  ;;  %v211_v38 = vld [vmem:[#allocation6 + $0x220] sm:$0xff]  ;;  %v209_v39 = vld [vmem:[#allocation6 + $0x210] sm:$0xff]  ;;  %v3964_v19 = vsub.s32 1, %v3961_v5 }
  0xa9   :  { %v3053_v40 = vpack.c.bf16 %v214_v33, %v210_v32  ;;  %v213_v41 = vld [vmem:[#allocation6 + $0x230] sm:$0xff]  ;;  %v216_v42 = vld [vmem:[#allocation6 + $0x248] sm:$0xff]  ;;  %v218_v44 = vld [vmem:[#allocation6 + $0x258] sm:$0xff]  ;;  %v2799_v46 = vpack.c.bf16 %v211_v38, %v207_v37 }
  0xaa   :  { %2788 = vmatpush1.bf16.msra.mxu0 %v2787_v10  ;;  %v220_v43 = vld [vmem:[#allocation6 + $0x268] sm:$0xff]  ;;  %v222_v45 = vld [vmem:[#allocation6 + $0x278] sm:$0xff]  ;;  %v3055_v47 = vpack.c.bf16 %v213_v41, %v209_v39  ;;  %v215_v49 = vld [vmem:[#allocation6 + $0x240] sm:$0xff] }
  0xab   :  { %3044 = vmatpush1.bf16.msra.mxu1 %v3043_v11  ;;  %2790 = vmatprep.subr.bf16.mxu0 %v2789_v12  ;;  %v2801_v48 = vpack.c.bf16 %v220_v43, %v216_v42  ;;  %v219_v50 = vld [vmem:[#allocation6 + $0x260] sm:$0xff]  ;;  %v217_v51 = vld [vmem:[#allocation6 + $0x250] sm:$0xff]  ;;  %v3057_v52 = vpack.c.bf16 %v222_v45, %v218_v44  ;;  %v224_v54 = vld [vmem:[#allocation6 + $0x288] sm:$0xff] }
  0xac   :  { %3046 = vmatprep.subr.bf16.mxu1 %v3045_v16  ;;  %v221_v53 = vld [vmem:[#allocation6 + $0x270] sm:$0xff]  ;;  %v228_v55 = vld [vmem:[#allocation6 + $0x2a8] sm:$0xff]  ;;  %v226_v57 = vld [vmem:[#allocation6 + $0x298] sm:$0xff]  ;;  %v2803_v59 = vpack.c.bf16 %v219_v50, %v215_v49 }
  0xad   :  { %v230_v58 = vld [vmem:[#allocation6 + $0x2b8] sm:$0xff]  ;;  %v3059_v60 = vpack.c.bf16 %v221_v53, %v217_v51  ;;  %v2805_v61 = vpack.c.bf16 %v228_v55, %v224_v54  ;;  %v223_v62 = vld [vmem:[#allocation6 + $0x280] sm:$0xff]  ;;  %v225_v0 = vld [vmem:[#allocation6 + $0x290] sm:$0xff] }
  0xae   :  { %2792 = vmatpush1.bf16.msra.mxu0 %v2791_v22  ;;  %v227_v63 = vld [vmem:[#allocation6 + $0x2a0] sm:$0xff]  ;;  %v3061_v1 = vpack.c.bf16 %v230_v58, %v226_v57  ;;  %v229_v2 = vld [vmem:[#allocation6 + $0x2b0] sm:$0xff]  ;;  %v232_v3 = vld [vmem:[#allocation6 + $0x2c8] sm:$0xff] }
  0xaf   :  { %3048 = vmatpush1.bf16.msra.mxu1 %v3047_v23  ;;  %2794 = vmatprep.subr.bf16.mxu0 %v2793_v24  ;;  %v236_v4 = vld [vmem:[#allocation6 + $0x2e8] sm:$0xff]  ;;  %v234_v6 = vld [vmem:[#allocation6 + $0x2d8] sm:$0xff]  ;;  %v2807_v8 = vpack.c.bf16 %v227_v63, %v223_v62  ;;  %v231_v9 = vld [vmem:[#allocation6 + $0x2c0] sm:$0xff]  ;;  %v3063_v10 = vpack.c.bf16 %v229_v2, %v225_v0 }
  0xb0   :  { %3050 = vmatprep.subr.bf16.mxu1 %v3049_v28  ;;  %v238_v7 = vld [vmem:[#allocation6 + $0x2f8] sm:$0xff]  ;;  %v2809_v11 = vpack.c.bf16 %v236_v4, %v232_v3  ;;  %v235_v12 = vld [vmem:[#allocation6 + $0x2e0] sm:$0xff]  ;;  %v233_v13 = vld [vmem:[#allocation6 + $0x2d0] sm:$0xff] }
  0xb1   :  { %v237_v14 = vld [vmem:[#allocation6 + $0x2f0] sm:$0xff]  ;;  %v3065_v15 = vpack.c.bf16 %v238_v7, %v234_v6  ;;  %v240_v16 = vld [vmem:[#allocation6 + $0x308] sm:$0xff]  ;;  %v242_v20 = vld [vmem:[#allocation6 + $0x318] sm:$0xff]  ;;  %v2811_v23 = vpack.c.bf16 %v235_v12, %v231_v9 }
  0xb2   :  { %2796 = vmatpush1.bf16.msra.mxu0 %v2795_v34  ;;  %v244_v17 = vld [vmem:[#allocation6 + $0x328] sm:$0xff]  ;;  %v140_v18 = vld [vmem:[#allocation2] sm:$0xff]  ;;  %v246_v21 = vld [vmem:[#allocation6 + $0x338] sm:$0xff]  ;;  %v3067_v25 = vpack.c.bf16 %v237_v14, %v233_v13 }
  0xb3   :  { %3052 = vmatpush1.bf16.msra.mxu1 %v3051_v35  ;;  %2798 = vmatprep.subr.bf16.mxu0 %v2797_v36  ;;  %v141_v22 = vld [vmem:[#allocation4] sm:$0xff]  ;;  %v2813_v26 = vpack.c.bf16 %v244_v17, %v240_v16  ;;  %v239_v27 = vld [vmem:[#allocation6 + $0x300] sm:$0xff]  ;;  %v241_v29 = vld [vmem:[#allocation6 + $0x310] sm:$0xff]  ;;  %v3069_v30 = vpack.c.bf16 %v246_v21, %v242_v20 }
  0xb4   :  { %3054 = vmatprep.subr.bf16.mxu1 %v3053_v40  ;;  %v3966_v24 = vadd.f32 %v141_v22, %v140_v18  ;;  %v243_v28 = vld [vmem:[#allocation6 + $0x320] sm:$0xff]  ;;  %v245_v31 = vld [vmem:[#allocation6 + $0x330] sm:$0xff]  ;;  %v248_v32 = vld [vmem:[#allocation6 + $0x348] sm:$0xff] }
  0xb5   :  { %v252_v33 = vld [vmem:[#allocation6 + $0x368] sm:$0xff]  ;;  %v250_v35 = vld [vmem:[#allocation6 + $0x358] sm:$0xff]  ;;  %v2815_v37 = vpack.c.bf16 %v243_v28, %v239_v27  ;;  %v3071_v38 = vpack.c.bf16 %v245_v31, %v241_v29  ;;  %v247_v40 = vld [vmem:[#allocation6 + $0x340] sm:$0xff] }
  0xb6   :  { %2800 = vmatpush1.bf16.msra.mxu0 %v2799_v46  ;;  %v664_v34 = vrot.slane %v3966_v24, %v3964_v19  ;;  %v254_v36 = vld [vmem:[#allocation6 + $0x378] sm:$0xff]  ;;  %v2817_v39 = vpack.c.bf16 %v252_v33, %v248_v32  ;;  %v251_v41 = vld [vmem:[#allocation6 + $0x360] sm:$0xff]  ;;  %v249_v42 = vld [vmem:[#allocation6 + $0x350] sm:$0xff] }
  0xb7   :  { %3056 = vmatpush1.bf16.msra.mxu1 %v3055_v47  ;;  %2802 = vmatprep.subr.bf16.mxu0 %v2801_v48  ;;  %v3073_v43 = vpack.c.bf16 %v254_v36, %v250_v35  ;;  %v253_v44 = vld [vmem:[#allocation6 + $0x370] sm:$0xff]  ;;  %v256_v45 = vld [vmem:[#allocation6 + $0x388] sm:$0xff]  ;;  %v258_v47 = vld [vmem:[#allocation6 + $0x398] sm:$0xff]  ;;  %v2819_v49 = vpack.c.bf16 %v251_v41, %v247_v40 }
  0xb8   :  { %3058 = vmatprep.subr.bf16.mxu1 %v3057_v52  ;;  %782 = vmatprep.mubr.f32.mxu0 %v664_v34  ;;  %v260_v46 = vld [vmem:[#allocation6 + $0x3a8] sm:$0xff]  ;;  %v262_v48 = vld [vmem:[#allocation6 + $0x3b8] sm:$0xff]  ;;  %v3075_v50 = vpack.c.bf16 %v253_v44, %v249_v42  ;;  %v255_v52 = vld [vmem:[#allocation6 + $0x380] sm:$0xff] }
  0xb9   :  { %1066 = vmatprep.mubr.f32.mxu1 %v664_v34  ;;  %v2821_v51 = vpack.c.bf16 %v260_v46, %v256_v45  ;;  %v259_v53 = vld [vmem:[#allocation6 + $0x3a0] sm:$0xff]  ;;  %v257_v54 = vld [vmem:[#allocation6 + $0x390] sm:$0xff]  ;;  %v3077_v55 = vpack.c.bf16 %v262_v48, %v258_v47  ;;  %v264_v58 = vld [vmem:[#allocation6 + $0x3c8] sm:$0xff] }
  0xba   :  { %2804 = vmatpush1.bf16.msra.mxu0 %v2803_v59  ;;  %v261_v57 = vld [vmem:[#allocation6 + $0x3b0] sm:$0xff]  ;;  %v268_v59 = vld [vmem:[#allocation6 + $0x3e8] sm:$0xff]  ;;  %v2823_v62 = vpack.c.bf16 %v259_v53, %v255_v52  ;;  %v267_v2 = vld [vmem:[#allocation6 + $0x3e0] sm:$0xff] }
  0xbb   :  { %3060 = vmatpush1.bf16.msra.mxu1 %v3059_v60  ;;  %2806 = vmatprep.subr.bf16.mxu0 %v2805_v61  ;;  %v266_v60 = vld [vmem:[#allocation6 + $0x3d8] sm:$0xff]  ;;  %v3079_v63 = vpack.c.bf16 %v261_v57, %v257_v54  ;;  %v2825_v0 = vpack.c.bf16 %v268_v59, %v264_v58  ;;  %v265_v3 = vld [vmem:[#allocation6 + $0x3d0] sm:$0xff]  ;;  %v272_v7 = vld [vmem:[#allocation6 + $0x408] sm:$0xff] }
  0xbc   :  { %3062 = vmatprep.subr.bf16.mxu1 %v3061_v1  ;;  %v270_v61 = vld [vmem:[#allocation6 + $0x3f8] sm:$0xff]  ;;  %v263_v1 = vld [vmem:[#allocation6 + $0x3c0] sm:$0xff]  ;;  %v269_v6 = vld [vmem:[#allocation6 + $0x3f0] sm:$0xff] }
  0xbd   :  { %v3081_v4 = vpack.c.bf16 %v270_v61, %v266_v60  ;;  %v274_v9 = vld [vmem:[#allocation6 + $0x418] sm:$0xff]  ;;  %v2827_v12 = vpack.c.bf16 %v267_v2, %v263_v1  ;;  %v3083_v13 = vpack.c.bf16 %v269_v6, %v265_v3  ;;  %v275_v16 = vld [vmem:[#allocation6 + $0x420] sm:$0xff]  ;;  %v273_v17 = vld [vmem:[#allocation6 + $0x410] sm:$0xff] }
  0xbe   :  { %2808 = vmatpush1.bf16.msra.mxu0 %v2807_v8  ;;  %v276_v8 = vld [vmem:[#allocation6 + $0x428] sm:$0xff]  ;;  %v277_v20 = vld [vmem:[#allocation6 + $0x430] sm:$0xff]  ;;  %v286_v27 = vld [vmem:[#allocation6 + $0x478] sm:$0xff] }
  0xbf   :  { %3064 = vmatpush1.bf16.msra.mxu1 %v3063_v10  ;;  %2810 = vmatprep.subr.bf16.mxu0 %v2809_v11  ;;  %v278_v10 = vld [vmem:[#allocation6 + $0x438] sm:$0xff]  ;;  %v3971_v11 = vsub.s32 0, %v3961_v5  ;;  %v2829_v14 = vpack.c.bf16 %v276_v8, %v272_v7  ;;  %v280_v21 = vld [vmem:[#allocation6 + $0x448] sm:$0xff]  ;;  %v3087_v29 = vpack.c.bf16 %v277_v20, %v273_v17  ;;  %v279_v31 = vld [vmem:[#allocation6 + $0x440] sm:$0xff] }
  0xc0   :  { %3066 = vmatprep.subr.bf16.mxu1 %v3065_v15  ;;  %v271_v15 = vld [vmem:[#allocation6 + $0x400] sm:$0xff]  ;;  %v3085_v18 = vpack.c.bf16 %v278_v10, %v274_v9  ;;  %v284_v22 = vld [vmem:[#allocation6 + $0x468] sm:$0xff]  ;;  %v281_v33 = vld [vmem:[#allocation6 + $0x450] sm:$0xff] }
  0xc1   :  { %v2831_v28 = vpack.c.bf16 %v275_v16, %v271_v15  ;;  %v283_v32 = vld [vmem:[#allocation6 + $0x460] sm:$0xff]  ;;  %v285_v35 = vld [vmem:[#allocation6 + $0x470] sm:$0xff]  ;;  %v288_v36 = vld [vmem:[#allocation6 + $0x488] sm:$0xff] }
  0xc2   :  { %2812 = vmatpush1.bf16.msra.mxu0 %v2811_v23  ;;  %v671_v23 = vsub.s32 3, %v3961_v5  ;;  %v294_v40 = vld [vmem:[#allocation6 + $0x4b8] sm:$0xff]  ;;  %v2835_v41 = vpack.c.bf16 %v283_v32, %v279_v31  ;;  %v3091_v42 = vpack.c.bf16 %v285_v35, %v281_v33  ;;  %v287_v44 = vld [vmem:[#allocation6 + $0x480] sm:$0xff]  ;;  %v289_v46 = vld [vmem:[#allocation6 + $0x490] sm:$0xff] }
  0xc3   :  { %3068 = vmatpush1.bf16.msra.mxu1 %v3067_v25  ;;  %2814 = vmatprep.subr.bf16.mxu0 %v2813_v26  ;;  %v660_v25 = vrot.slane %v3966_v24, %v3971_v11  ;;  %v282_v26 = vld [vmem:[#allocation6 + $0x458] sm:$0xff]  ;;  %v291_v45 = vld [vmem:[#allocation6 + $0x4a0] sm:$0xff]  ;;  %v293_v48 = vld [vmem:[#allocation6 + $0x4b0] sm:$0xff] }
  0xc4   :  { %3070 = vmatprep.subr.bf16.mxu1 %v3069_v30  ;;  %v2833_v30 = vpack.c.bf16 %v284_v22, %v280_v21  ;;  %v3089_v34 = vpack.c.bf16 %v286_v27, %v282_v26  ;;  %v302_v52 = vld [vmem:[#allocation6 + $0x4f8] sm:$0xff]  ;;  %v2839_v53 = vpack.c.bf16 %v291_v45, %v287_v44  ;;  %v3095_v54 = vpack.c.bf16 %v293_v48, %v289_v46  ;;  %v295_v57 = vld [vmem:[#allocation6 + $0x4c0] sm:$0xff]  ;;  %v297_v59 = vld [vmem:[#allocation6 + $0x4d0] sm:$0xff] }
  0xc5   :  { %v299_v58 = vld [vmem:[#allocation6 + $0x4e0] sm:$0xff]  ;;  %v301_v61 = vld [vmem:[#allocation6 + $0x4f0] sm:$0xff]  ;;  %v310_v1 = vld [vmem:[#allocation6 + $0x538] sm:$0xff] }
  0xc6   :  { %2816 = vmatpush1.bf16.msra.mxu0 %v2815_v37  ;;  %v292_v37 = vld [vmem:[#allocation6 + $0x4a8] sm:$0xff]  ;;  %v2843_v2 = vpack.c.bf16 %v299_v58, %v295_v57  ;;  %v3099_v3 = vpack.c.bf16 %v301_v61, %v297_v59  ;;  %v303_v6 = vld [vmem:[#allocation6 + $0x500] sm:$0xff]  ;;  %v305_v8 = vld [vmem:[#allocation6 + $0x510] sm:$0xff] }
  0xc7   :  { %3072 = vmatpush1.bf16.msra.mxu1 %v3071_v38  ;;  %2818 = vmatprep.subr.bf16.mxu0 %v2817_v39  ;;  %v672_v38 = vrot.slane %v3966_v24, %v671_v23  ;;  %v290_v39 = vld [vmem:[#allocation6 + $0x498] sm:$0xff]  ;;  %v307_v7 = vld [vmem:[#allocation6 + $0x520] sm:$0xff]  ;;  %v309_v10 = vld [vmem:[#allocation6 + $0x530] sm:$0xff] }
  0xc8   :  { %3074 = vmatprep.subr.bf16.mxu1 %v3073_v43  ;;  %v2837_v43 = vpack.c.bf16 %v292_v37, %v288_v36  ;;  %v3093_v47 = vpack.c.bf16 %v294_v40, %v290_v39  ;;  %v318_v15 = vld [vmem:[#allocation6 + $0x578] sm:$0xff]  ;;  %v2847_v16 = vpack.c.bf16 %v307_v7, %v303_v6  ;;  %v3103_v17 = vpack.c.bf16 %v309_v10, %v305_v8  ;;  %v311_v20 = vld [vmem:[#allocation6 + $0x540] sm:$0xff]  ;;  %v313_v22 = vld [vmem:[#allocation6 + $0x550] sm:$0xff] }
  0xc9   :  { %v315_v21 = vld [vmem:[#allocation6 + $0x560] sm:$0xff]  ;;  %v317_v26 = vld [vmem:[#allocation6 + $0x570] sm:$0xff]  ;;  %v320_v27 = vld [vmem:[#allocation6 + $0x588] sm:$0xff] }
  0xca   :  { %2820 = vmatpush1.bf16.msra.mxu0 %v2819_v49  ;;  %v296_v49 = vld [vmem:[#allocation6 + $0x4c8] sm:$0xff]  ;;  %v2851_v31 = vpack.c.bf16 %v315_v21, %v311_v20  ;;  %v3107_v32 = vpack.c.bf16 %v317_v26, %v313_v22  ;;  %v323_v35 = vld [vmem:[#allocation6 + $0x5a0] sm:$0xff]  ;;  %v321_v36 = vld [vmem:[#allocation6 + $0x590] sm:$0xff] }
  0xcb   :  { %3076 = vmatpush1.bf16.msra.mxu1 %v3075_v50  ;;  %2822 = vmatprep.subr.bf16.mxu0 %v2821_v51  ;;  %v300_v50 = vld [vmem:[#allocation6 + $0x4e8] sm:$0xff]  ;;  %v298_v51 = vld [vmem:[#allocation6 + $0x4d8] sm:$0xff]  ;;  %v327_v46 = vld [vmem:[#allocation6 + $0x5c0] sm:$0xff] }
  0xcc   :  { %3078 = vmatprep.subr.bf16.mxu1 %v3077_v55  ;;  %v2841_v55 = vpack.c.bf16 %v300_v50, %v296_v49  ;;  %v3097_v60 = vpack.c.bf16 %v302_v52, %v298_v51  ;;  %v328_v39 = vld [vmem:[#allocation6 + $0x5c8] sm:$0xff]  ;;  %v329_v48 = vld [vmem:[#allocation6 + $0x5d0] sm:$0xff]  ;;  %v335_v59 = vld [vmem:[#allocation6 + $0x600] sm:$0xff] }
  0xcd   :  { %v332_v40 = vld [vmem:[#allocation6 + $0x5e8] sm:$0xff]  ;;  %v333_v50 = vld [vmem:[#allocation6 + $0x5f0] sm:$0xff]  ;;  %v343_v8 = vld [vmem:[#allocation6 + $0x640] sm:$0xff] }
  0xce   :  { %2824 = vmatpush1.bf16.msra.mxu0 %v2823_v62  ;;  %v304_v62 = vld [vmem:[#allocation6 + $0x508] sm:$0xff]  ;;  %v2857_v45 = vpack.c.bf16 %v332_v40, %v328_v39  ;;  %v3115_v57 = vpack.c.bf16 %v333_v50, %v329_v48  ;;  %v337_v61 = vld [vmem:[#allocation6 + $0x610] sm:$0xff]  ;;  %v351_v22 = vld [vmem:[#allocation6 + $0x680] sm:$0xff] }
  0xcf   :  { %3080 = vmatpush1.bf16.msra.mxu1 %v3079_v63  ;;  %2826 = vmatprep.subr.bf16.mxu0 %v2825_v0  ;;  %v308_v63 = vld [vmem:[#allocation6 + $0x528] sm:$0xff]  ;;  %v306_v0 = vld [vmem:[#allocation6 + $0x518] sm:$0xff]  ;;  %v345_v10 = vld [vmem:[#allocation6 + $0x650] sm:$0xff] }
  0xd0   :  { %3082 = vmatprep.subr.bf16.mxu1 %v3081_v4  ;;  %v2845_v4 = vpack.c.bf16 %v308_v63, %v304_v62  ;;  %v3101_v9 = vpack.c.bf16 %v310_v1, %v306_v0  ;;  %v336_v51 = vld [vmem:[#allocation6 + $0x608] sm:$0xff]  ;;  %v341_v63 = vld [vmem:[#allocation6 + $0x630] sm:$0xff]  ;;  %v367_v48 = vld [vmem:[#allocation6 + $0x700] sm:$0xff] }
  0xd1   :  { %v340_v52 = vld [vmem:[#allocation6 + $0x628] sm:$0xff]  ;;  %v3119_v6 = vpack.c.bf16 %v341_v63, %v337_v61  ;;  %v353_v26 = vld [vmem:[#allocation6 + $0x690] sm:$0xff]  ;;  %v375_v61 = vld [vmem:[#allocation6 + $0x740] sm:$0xff] }
  0xd2   :  { %2828 = vmatpush1.bf16.msra.mxu0 %v2827_v12  ;;  %v312_v12 = vld [vmem:[#allocation6 + $0x548] sm:$0xff]  ;;  %v2861_v58 = vpack.c.bf16 %v340_v52, %v336_v51  ;;  %v365_v40 = vld [vmem:[#allocation6 + $0x6f0] sm:$0xff] }
  0xd3   :  { %3084 = vmatpush1.bf16.msra.mxu1 %v3083_v13  ;;  %2830 = vmatprep.subr.bf16.mxu0 %v2829_v14  ;;  %v316_v13 = vld [vmem:[#allocation6 + $0x568] sm:$0xff]  ;;  %v314_v14 = vld [vmem:[#allocation6 + $0x558] sm:$0xff]  ;;  %v369_v50 = vld [vmem:[#allocation6 + $0x710] sm:$0xff] }
  0xd4   :  { %3086 = vmatprep.subr.bf16.mxu1 %v3085_v18  ;;  %v2849_v18 = vpack.c.bf16 %v316_v13, %v312_v12  ;;  %v344_v0 = vld [vmem:[#allocation6 + $0x648] sm:$0xff]  ;;  %v349_v13 = vld [vmem:[#allocation6 + $0x670] sm:$0xff] }
  0xd5   :  { %783 = vmatmul.mubr.f32.vlgmr.msra.gmra.mrb[0].mxu0 %v660_v25  ;;  %v348_v1 = vld [vmem:[#allocation6 + $0x668] sm:$0xff]  ;;  %v3123_v20 = vpack.c.bf16 %v349_v13, %v345_v10  ;;  %v373_v52 = vld [vmem:[#allocation6 + $0x730] sm:$0xff]  ;;  %v383_v10 = vld [vmem:[#allocation6 + $0x780] sm:$0xff] }
  0xd6   :  { %2832 = vmatpush1.bf16.msra.mxu0 %v2831_v28  ;;  %1067 = vmatmul.mubr.f32.vlgmr.msra.gmra.mrb[0].mxu1 %v660_v25  ;;  %v3105_v25 = vpack.c.bf16 %v318_v15, %v314_v14  ;;  %v324_v28 = vld [vmem:[#allocation6 + $0x5a8] sm:$0xff]  ;;  %v2865_v7 = vpack.c.bf16 %v348_v1, %v344_v0  ;;  %v377_v63 = vld [vmem:[#allocation6 + $0x750] sm:$0xff] }
  0xd7   :  { %3088 = vmatpush1.bf16.msra.mxu1 %v3087_v29  ;;  %2834 = vmatprep.subr.bf16.mxu0 %v2833_v30  ;;  %v322_v29 = vld [vmem:[#allocation6 + $0x598] sm:$0xff]  ;;  %v2853_v33 = vpack.c.bf16 %v324_v28, %v320_v27  ;;  %v352_v14 = vld [vmem:[#allocation6 + $0x688] sm:$0xff]  ;;  %v357_v28 = vld [vmem:[#allocation6 + $0x6b0] sm:$0xff] }
  0xd8   :  { %3090 = vmatprep.subr.bf16.mxu1 %v3089_v34  ;;  %853 = vmatprep.mubr.f32.mxu0 %v672_v38  ;;  %v326_v30 = vld [vmem:[#allocation6 + $0x5b8] sm:$0xff]  ;;  %v319_v34 = vld [vmem:[#allocation6 + $0x580] sm:$0xff]  ;;  %v356_v15 = vld [vmem:[#allocation6 + $0x6a8] sm:$0xff] }
  0xd9   :  { %1137 = vmatprep.mubr.f32.mxu1 %v672_v38  ;;  %v3109_v37 = vpack.c.bf16 %v326_v30, %v322_v29  ;;  %v325_v38 = vld [vmem:[#allocation6 + $0x5b0] sm:$0xff]  ;;  %v2869_v21 = vpack.c.bf16 %v356_v15, %v352_v14  ;;  %v360_v29 = vld [vmem:[#allocation6 + $0x6c8] sm:$0xff] }
  0xda   :  { %2836 = vmatpush1.bf16.msra.mxu0 %v2835_v41  ;;  %v330_v41 = vld [vmem:[#allocation6 + $0x5d8] sm:$0xff]  ;;  %v3111_v44 = vpack.c.bf16 %v325_v38, %v321_v36  ;;  %v364_v30 = vld [vmem:[#allocation6 + $0x6e8] sm:$0xff]  ;;  %v359_v36 = vld [vmem:[#allocation6 + $0x6c0] sm:$0xff] }
  0xdb   :  { %3092 = vmatpush1.bf16.msra.mxu1 %v3091_v42  ;;  %2838 = vmatprep.subr.bf16.mxu0 %v2837_v43  ;;  %v334_v42 = vld [vmem:[#allocation6 + $0x5f8] sm:$0xff]  ;;  %v2855_v43 = vpack.c.bf16 %v323_v35, %v319_v34  ;;  %v3127_v34 = vpack.c.bf16 %v357_v28, %v353_v26  ;;  %v2873_v35 = vpack.c.bf16 %v364_v30, %v360_v29  ;;  %v361_v38 = vld [vmem:[#allocation6 + $0x6d0] sm:$0xff]  ;;  %v391_v26 = vld [vmem:[#allocation6 + $0x7c0] sm:$0xff] }
  0xdc   :  { %3094 = vmatprep.subr.bf16.mxu1 %v3093_v47  ;;  %v331_v47 = vld [vmem:[#allocation6 + $0x5e0] sm:$0xff]  ;;  %v3113_v49 = vpack.c.bf16 %v334_v42, %v330_v41  ;;  %v368_v41 = vld [vmem:[#allocation6 + $0x708] sm:$0xff]  ;;  %v381_v1 = vld [vmem:[#allocation6 + $0x770] sm:$0xff] }
  0xdd   :  { %v372_v42 = vld [vmem:[#allocation6 + $0x728] sm:$0xff]  ;;  %v385_v13 = vld [vmem:[#allocation6 + $0x790] sm:$0xff] }
  0xde   :  { %2840 = vmatpush1.bf16.msra.mxu0 %v2839_v53  ;;  %v338_v53 = vld [vmem:[#allocation6 + $0x618] sm:$0xff]  ;;  %v389_v15 = vld [vmem:[#allocation6 + $0x7b0] sm:$0xff] }
  0xdf   :  { %3096 = vmatpush1.bf16.msra.mxu1 %v3095_v54  ;;  %2842 = vmatprep.subr.bf16.mxu0 %v2841_v55  ;;  %v342_v54 = vld [vmem:[#allocation6 + $0x638] sm:$0xff]  ;;  %v2859_v55 = vpack.c.bf16 %v331_v47, %v327_v46  ;;  %v3131_v46 = vpack.c.bf16 %v365_v40, %v361_v38  ;;  %v2877_v47 = vpack.c.bf16 %v372_v42, %v368_v41  ;;  %v393_v28 = vld [vmem:[#allocation6 + $0x7d0] sm:$0xff]  ;;  %v403_v40 = vld [vmem:[#allocation6 + $0x820] sm:$0xff] }
  0xe0   :  { %3098 = vmatprep.subr.bf16.mxu1 %v3097_v60  ;;  %v339_v60 = vld [vmem:[#allocation6 + $0x620] sm:$0xff]  ;;  %v3117_v62 = vpack.c.bf16 %v342_v54, %v338_v53  ;;  %v376_v53 = vld [vmem:[#allocation6 + $0x748] sm:$0xff]  ;;  %v397_v30 = vld [vmem:[#allocation6 + $0x7f0] sm:$0xff] }
  0xe1   :  { %v380_v54 = vld [vmem:[#allocation6 + $0x768] sm:$0xff]  ;;  %v401_v41 = vld [vmem:[#allocation6 + $0x810] sm:$0xff] }
  0xe2   :  { %2844 = vmatpush1.bf16.msra.mxu0 %v2843_v2  ;;  %v346_v2 = vld [vmem:[#allocation6 + $0x658] sm:$0xff] }
  0xe3   :  { %3100 = vmatpush1.bf16.msra.mxu1 %v3099_v3  ;;  %2846 = vmatprep.subr.bf16.mxu0 %v2845_v4  ;;  %v350_v3 = vld [vmem:[#allocation6 + $0x678] sm:$0xff]  ;;  %v2863_v4 = vpack.c.bf16 %v339_v60, %v335_v59  ;;  %v3135_v59 = vpack.c.bf16 %v373_v52, %v369_v50  ;;  %v2881_v60 = vpack.c.bf16 %v380_v54, %v376_v53  ;;  %v407_v53 = vld [vmem:[#allocation6 + $0x840] sm:$0xff] }
  0xe4   :  { %3102 = vmatprep.subr.bf16.mxu1 %v3101_v9  ;;  %v347_v9 = vld [vmem:[#allocation6 + $0x660] sm:$0xff]  ;;  %v3121_v12 = vpack.c.bf16 %v350_v3, %v346_v2  ;;  %v384_v2 = vld [vmem:[#allocation6 + $0x788] sm:$0xff] }
  0xe5   :  { %v388_v3 = vld [vmem:[#allocation6 + $0x7a8] sm:$0xff]  ;;  %v411_v54 = vld [vmem:[#allocation6 + $0x860] sm:$0xff] }
  0xe6   :  { %2848 = vmatpush1.bf16.msra.mxu0 %v2847_v16  ;;  %v354_v16 = vld [vmem:[#allocation6 + $0x698] sm:$0xff] }
  0xe7   :  { %3104 = vmatpush1.bf16.msra.mxu1 %v3103_v17  ;;  %2850 = vmatprep.subr.bf16.mxu0 %v2849_v18  ;;  %v358_v17 = vld [vmem:[#allocation6 + $0x6b8] sm:$0xff]  ;;  %v2867_v18 = vpack.c.bf16 %v347_v9, %v343_v8  ;;  %v3139_v8 = vpack.c.bf16 %v381_v1, %v377_v63  ;;  %v2885_v9 = vpack.c.bf16 %v388_v3, %v384_v2  ;;  %v415_v3 = vld [vmem:[#allocation6 + $0x880] sm:$0xff] }
  0xe8   :  { %3106 = vmatprep.subr.bf16.mxu1 %v3105_v25  ;;  %v355_v25 = vld [vmem:[#allocation6 + $0x6a0] sm:$0xff]  ;;  %v3125_v27 = vpack.c.bf16 %v358_v17, %v354_v16  ;;  %v392_v16 = vld [vmem:[#allocation6 + $0x7c8] sm:$0xff]  ;;  %v422_v63 = vld [vmem:[#allocation6 + $0x8b8] sm:$0xff] }
  0xe9   :  { %v396_v17 = vld [vmem:[#allocation6 + $0x7e8] sm:$0xff] }
  0xea   :  { %2852 = vmatpush1.bf16.msra.mxu0 %v2851_v31  ;;  %v362_v31 = vld [vmem:[#allocation6 + $0x6d8] sm:$0xff] }
  0xeb   :  { %3108 = vmatpush1.bf16.msra.mxu1 %v3107_v32  ;;  %2854 = vmatprep.subr.bf16.mxu0 %v2853_v33  ;;  %v366_v32 = vld [vmem:[#allocation6 + $0x6f8] sm:$0xff]  ;;  %v2871_v33 = vpack.c.bf16 %v355_v25, %v351_v22  ;;  %v3143_v22 = vpack.c.bf16 %v389_v15, %v385_v13  ;;  %v2889_v25 = vpack.c.bf16 %v396_v17, %v392_v16  ;;  %v423_v17 = vld [vmem:[#allocation6 + $0x8c0] sm:$0xff] }
  0xec   :  { %3110 = vmatprep.subr.bf16.mxu1 %v3109_v37  ;;  %v363_v37 = vld [vmem:[#allocation6 + $0x6e0] sm:$0xff]  ;;  %v3129_v39 = vpack.c.bf16 %v366_v32, %v362_v31  ;;  %v400_v31 = vld [vmem:[#allocation6 + $0x808] sm:$0xff]  ;;  %v430_v13 = vld [vmem:[#allocation6 + $0x8f8] sm:$0xff] }
  0xed   :  { %v404_v32 = vld [vmem:[#allocation6 + $0x828] sm:$0xff] }
  0xee   :  { %2856 = vmatpush1.bf16.msra.mxu0 %v2855_v43  ;;  %v370_v43 = vld [vmem:[#allocation6 + $0x718] sm:$0xff]  ;;  %v2893_v38 = vpack.c.bf16 %v404_v32, %v400_v31  ;;  %v431_v32 = vld [vmem:[#allocation6 + $0x900] sm:$0xff] }
  0xef   :  { %3112 = vmatpush1.bf16.msra.mxu1 %v3111_v44  ;;  %2858 = vmatprep.subr.bf16.mxu0 %v2857_v45  ;;  %v374_v44 = vld [vmem:[#allocation6 + $0x738] sm:$0xff]  ;;  %v2875_v45 = vpack.c.bf16 %v363_v37, %v359_v36  ;;  %v3147_v37 = vpack.c.bf16 %v397_v30, %v393_v28 }
  0xf0   :  { %3114 = vmatprep.subr.bf16.mxu1 %v3113_v49  ;;  %v371_v49 = vld [vmem:[#allocation6 + $0x720] sm:$0xff]  ;;  %v3133_v51 = vpack.c.bf16 %v374_v44, %v370_v43  ;;  %v405_v43 = vld [vmem:[#allocation6 + $0x830] sm:$0xff]  ;;  %v408_v44 = vld [vmem:[#allocation6 + $0x848] sm:$0xff] }
  0xf1   :  { %v438_v28 = vld [vmem:[#allocation6 + $0x938] sm:$0xff] }
  0xf2   :  { %2860 = vmatpush1.bf16.msra.mxu0 %v2859_v55  ;;  %v378_v55 = vld [vmem:[#allocation6 + $0x758] sm:$0xff] }
  0xf3   :  { %3116 = vmatpush1.bf16.msra.mxu1 %v3115_v57  ;;  %2862 = vmatprep.subr.bf16.mxu0 %v2861_v58  ;;  %v382_v57 = vld [vmem:[#allocation6 + $0x778] sm:$0xff]  ;;  %v2879_v58 = vpack.c.bf16 %v371_v49, %v367_v48 }
  0xf4   :  { %3118 = vmatprep.subr.bf16.mxu1 %v3117_v62  ;;  %v379_v62 = vld [vmem:[#allocation6 + $0x760] sm:$0xff]  ;;  %v3137_v0 = vpack.c.bf16 %v382_v57, %v378_v55  ;;  %v410_v48 = vld [vmem:[#allocation6 + $0x858] sm:$0xff]  ;;  %v409_v55 = vld [vmem:[#allocation6 + $0x850] sm:$0xff] }
  0xf5   :  { %v414_v49 = vld [vmem:[#allocation6 + $0x878] sm:$0xff] }
  0xf6   :  { %2864 = vmatpush1.bf16.msra.mxu0 %v2863_v4  ;;  %v386_v4 = vld [vmem:[#allocation6 + $0x798] sm:$0xff]  ;;  %v3153_v57 = vpack.c.bf16 %v414_v49, %v410_v48  ;;  %v445_v49 = vld [vmem:[#allocation6 + $0x970] sm:$0xff] }
  0xf7   :  { %3120 = vmatpush1.bf16.msra.mxu1 %v3119_v6  ;;  %2866 = vmatprep.subr.bf16.mxu0 %v2865_v7  ;;  %v390_v6 = vld [vmem:[#allocation6 + $0x7b8] sm:$0xff]  ;;  %v2883_v7 = vpack.c.bf16 %v379_v62, %v375_v61 }
  0xf8   :  { %3122 = vmatprep.subr.bf16.mxu1 %v3121_v12  ;;  %v387_v12 = vld [vmem:[#allocation6 + $0x7a0] sm:$0xff]  ;;  %v3141_v14 = vpack.c.bf16 %v390_v6, %v386_v4  ;;  %v418_v62 = vld [vmem:[#allocation6 + $0x898] sm:$0xff]  ;;  %v417_v6 = vld [vmem:[#allocation6 + $0x890] sm:$0xff] }
  0xf9   :  { %v419_v4 = vld [vmem:[#allocation6 + $0x8a0] sm:$0xff] }
  0xfa   :  { %2868 = vmatpush1.bf16.msra.mxu0 %v2867_v18  ;;  %v394_v18 = vld [vmem:[#allocation6 + $0x7d8] sm:$0xff] }
  0xfb   :  { %3124 = vmatpush1.bf16.msra.mxu1 %v3123_v20  ;;  %2870 = vmatprep.subr.bf16.mxu0 %v2869_v21  ;;  %v398_v20 = vld [vmem:[#allocation6 + $0x7f8] sm:$0xff]  ;;  %v2887_v21 = vpack.c.bf16 %v387_v12, %v383_v10  ;;  %v428_v10 = vld [vmem:[#allocation6 + $0x8e8] sm:$0xff] }
  0xfc   :  { %3126 = vmatprep.subr.bf16.mxu1 %v3125_v27  ;;  %v395_v27 = vld [vmem:[#allocation6 + $0x7e0] sm:$0xff]  ;;  %v3145_v29 = vpack.c.bf16 %v398_v20, %v394_v18  ;;  %v426_v12 = vld [vmem:[#allocation6 + $0x8d8] sm:$0xff]  ;;  %v425_v20 = vld [vmem:[#allocation6 + $0x8d0] sm:$0xff] }
  0xfd   :  { %v2891_v36 = vpack.c.bf16 %v395_v27, %v391_v26  ;;  %v427_v18 = vld [vmem:[#allocation6 + $0x8e0] sm:$0xff]  ;;  %v436_v26 = vld [vmem:[#allocation6 + $0x928] sm:$0xff]  ;;  %v434_v27 = vld [vmem:[#allocation6 + $0x918] sm:$0xff] }
  0xfe   :  { %2872 = vmatpush1.bf16.msra.mxu0 %v2871_v33  ;;  %v402_v33 = vld [vmem:[#allocation6 + $0x818] sm:$0xff] }
  0xff   :  { %3128 = vmatpush1.bf16.msra.mxu1 %v3127_v34  ;;  %2874 = vmatprep.subr.bf16.mxu0 %v2873_v35  ;;  %v406_v34 = vld [vmem:[#allocation6 + $0x838] sm:$0xff]  ;;  %v667_v35 = vsub.s32 2, %v3961_v5 }
 0x100   :  { %3130 = vmatprep.subr.bf16.mxu1 %v3129_v39  ;;  %v399_v39 = vld [vmem:[#allocation6 + $0x800] sm:$0xff]  ;;  %v3149_v42 = vpack.c.bf16 %v406_v34, %v402_v33  ;;  %v433_v34 = vld [vmem:[#allocation6 + $0x910] sm:$0xff] }
 0x101   :  { %v2895_v50 = vpack.c.bf16 %v403_v40, %v399_v39  ;;  %v435_v33 = vld [vmem:[#allocation6 + $0x920] sm:$0xff]  ;;  %v444_v39 = vld [vmem:[#allocation6 + $0x968] sm:$0xff]  ;;  %v442_v40 = vld [vmem:[#allocation6 + $0x958] sm:$0xff] }
 0x102   :  { %2876 = vmatpush1.bf16.msra.mxu0 %v2875_v45  ;;  %v412_v45 = vld [vmem:[#allocation6 + $0x868] sm:$0xff] }
 0x103   :  { %3132 = vmatpush1.bf16.msra.mxu1 %v3131_v46  ;;  %2878 = vmatprep.subr.bf16.mxu0 %v2877_v47  ;;  %v679_v46 = vsub.s32 5, %v3961_v5  ;;  %v668_v47 = vrot.slane %v3966_v24, %v667_v35  ;;  %v2897_v52 = vpack.c.bf16 %v412_v45, %v408_v44  ;;  %v439_v45 = vld [vmem:[#allocation6 + $0x940] sm:$0xff] }
 0x104   :  { %3134 = vmatprep.subr.bf16.mxu1 %v3133_v51  ;;  %v3151_v51 = vpack.c.bf16 %v405_v43, %v401_v41  ;;  %v446_v41 = vld [vmem:[#allocation6 + $0x978] sm:$0xff] }
 0x105   :  { %v680_v61 = vrot.slane %v3966_v24, %v679_v46  ;;  %v443_v46 = vld [vmem:[#allocation6 + $0x960] sm:$0xff]  ;;  %v3169_v48 = vpack.c.bf16 %v446_v41, %v442_v40  ;;  %v477_v40 = vld [vmem:[#allocation6 + $0xa70] sm:$0xff]  ;;  %v480_v41 = vld [vmem:[#allocation6 + $0xa88] sm:$0xff] }
 0x106   :  { %2880 = vmatpush1.bf16.msra.mxu0 %v2879_v58  ;;  %v413_v58 = vld [vmem:[#allocation6 + $0x870] sm:$0xff] }
 0x107   :  { %3136 = vmatpush1.bf16.msra.mxu1 %v3135_v59  ;;  %2882 = vmatprep.subr.bf16.mxu0 %v2881_v60  ;;  %v416_v59 = vld [vmem:[#allocation6 + $0x888] sm:$0xff]  ;;  %v3155_v1 = vpack.c.bf16 %v413_v58, %v409_v55  ;;  %v447_v58 = vld [vmem:[#allocation6 + $0x980] sm:$0xff] }
 0x108   :  { %3138 = vmatprep.subr.bf16.mxu1 %v3137_v0  ;;  %v420_v60 = vld [vmem:[#allocation6 + $0x8a8] sm:$0xff]  ;;  %v2899_v0 = vpack.c.bf16 %v411_v54, %v407_v53  ;;  %v454_v53 = vld [vmem:[#allocation6 + $0x9b8] sm:$0xff]  ;;  %v2915_v54 = vpack.c.bf16 %v443_v46, %v439_v45 }
 0x109   :  { %v2901_v2 = vpack.c.bf16 %v420_v60, %v416_v59  ;;  %v451_v59 = vld [vmem:[#allocation6 + $0x9a0] sm:$0xff]  ;;  %v449_v60 = vld [vmem:[#allocation6 + $0x990] sm:$0xff] }
 0x10a   :  { %2884 = vmatpush1.bf16.msra.mxu0 %v2883_v7  ;;  %v3157_v7 = vpack.c.bf16 %v422_v63, %v418_v62  ;;  %v453_v62 = vld [vmem:[#allocation6 + $0x9b0] sm:$0xff]  ;;  %v456_v63 = vld [vmem:[#allocation6 + $0x9c8] sm:$0xff] }
 0x10b   :  { %3140 = vmatpush1.bf16.msra.mxu1 %v3139_v8  ;;  %2886 = vmatprep.subr.bf16.mxu0 %v2885_v9  ;;  %v421_v8 = vld [vmem:[#allocation6 + $0x8b0] sm:$0xff]  ;;  %v424_v9 = vld [vmem:[#allocation6 + $0x8c8] sm:$0xff] }
 0x10c   :  { %3142 = vmatprep.subr.bf16.mxu1 %v3141_v14  ;;  %v2903_v14 = vpack.c.bf16 %v419_v4, %v415_v3  ;;  %v3159_v15 = vpack.c.bf16 %v421_v8, %v417_v6  ;;  %v2905_v16 = vpack.c.bf16 %v428_v10, %v424_v9  ;;  %v2919_v3 = vpack.c.bf16 %v451_v59, %v447_v58  ;;  %v459_v8 = vld [vmem:[#allocation6 + $0x9e0] sm:$0xff]  ;;  %v457_v9 = vld [vmem:[#allocation6 + $0x9d0] sm:$0xff] }
 0x10d   :  { %v3175_v4 = vpack.c.bf16 %v453_v62, %v449_v60  ;;  %v491_v62 = vld [vmem:[#allocation6 + $0xae0] sm:$0xff] }
 0x10e   :  { %2888 = vmatpush1.bf16.msra.mxu0 %v2887_v21  ;;  %v3161_v21 = vpack.c.bf16 %v430_v13, %v426_v12  ;;  %v461_v12 = vld [vmem:[#allocation6 + $0x9f0] sm:$0xff]  ;;  %v464_v13 = vld [vmem:[#allocation6 + $0xa08] sm:$0xff] }
 0x10f   :  { %3144 = vmatpush1.bf16.msra.mxu1 %v3143_v22  ;;  %2890 = vmatprep.subr.bf16.mxu0 %v2889_v25  ;;  %v429_v22 = vld [vmem:[#allocation6 + $0x8f0] sm:$0xff]  ;;  %v432_v25 = vld [vmem:[#allocation6 + $0x908] sm:$0xff] }
 0x110   :  { %3146 = vmatprep.subr.bf16.mxu1 %v3145_v29  ;;  %v2907_v29 = vpack.c.bf16 %v427_v18, %v423_v17  ;;  %v3163_v30 = vpack.c.bf16 %v429_v22, %v425_v20  ;;  %v2909_v31 = vpack.c.bf16 %v436_v26, %v432_v25  ;;  %v3179_v18 = vpack.c.bf16 %v461_v12, %v457_v9  ;;  %v467_v22 = vld [vmem:[#allocation6 + $0xa20] sm:$0xff]  ;;  %v465_v25 = vld [vmem:[#allocation6 + $0xa10] sm:$0xff] }
 0x111   :  { %v499_v12 = vld [vmem:[#allocation6 + $0xb20] sm:$0xff] }
 0x112   :  { %2892 = vmatpush1.bf16.msra.mxu0 %v2891_v36  ;;  %v3165_v36 = vpack.c.bf16 %v438_v28, %v434_v27  ;;  %v469_v27 = vld [vmem:[#allocation6 + $0xa30] sm:$0xff]  ;;  %v472_v28 = vld [vmem:[#allocation6 + $0xa48] sm:$0xff] }
 0x113   :  { %3148 = vmatpush1.bf16.msra.mxu1 %v3147_v37  ;;  %2894 = vmatprep.subr.bf16.mxu0 %v2893_v38  ;;  %v437_v37 = vld [vmem:[#allocation6 + $0x930] sm:$0xff]  ;;  %v440_v38 = vld [vmem:[#allocation6 + $0x948] sm:$0xff] }
 0x114   :  { %3150 = vmatprep.subr.bf16.mxu1 %v3149_v42  ;;  %v2911_v42 = vpack.c.bf16 %v435_v33, %v431_v32  ;;  %v3167_v43 = vpack.c.bf16 %v437_v37, %v433_v34  ;;  %v2913_v44 = vpack.c.bf16 %v444_v39, %v440_v38  ;;  %v3183_v33 = vpack.c.bf16 %v469_v27, %v465_v25  ;;  %v475_v37 = vld [vmem:[#allocation6 + $0xa60] sm:$0xff]  ;;  %v473_v38 = vld [vmem:[#allocation6 + $0xa50] sm:$0xff] }
 0x115   :  { %854 = vmatmul.mubr.f32.vlgmr.msra.gmra.mrb[0].mxu0 %v668_v47  ;;  %v3187_v46 = vpack.c.bf16 %v477_v40, %v473_v38  ;;  %v507_v27 = vld [vmem:[#allocation6 + $0xb60] sm:$0xff] }
 0x116   :  { %2896 = vmatpush1.bf16.msra.mxu0 %v2895_v50  ;;  %1138 = vmatmul.mubr.f32.vlgmr.msra.gmra.mrb[0].mxu1 %v668_v47  ;;  %v441_v47 = vld [vmem:[#allocation6 + $0x950] sm:$0xff]  ;;  %v448_v50 = vld [vmem:[#allocation6 + $0x988] sm:$0xff]  ;;  %v515_v40 = vld [vmem:[#allocation6 + $0xba0] sm:$0xff] }
 0x117   :  { %3152 = vmatpush1.bf16.msra.mxu1 %v3151_v51  ;;  %2898 = vmatprep.subr.bf16.mxu0 %v2897_v52  ;;  %v452_v51 = vld [vmem:[#allocation6 + $0x9a8] sm:$0xff]  ;;  %v450_v52 = vld [vmem:[#allocation6 + $0x998] sm:$0xff]  ;;  %v3171_v55 = vpack.c.bf16 %v445_v49, %v441_v47  ;;  %v483_v49 = vld [vmem:[#allocation6 + $0xaa0] sm:$0xff] }
 0x118   :  { %3154 = vmatprep.subr.bf16.mxu1 %v3153_v57  ;;  %924 = vmatprep.mubr.f32.mxu0 %v680_v61  ;;  %v2917_v57 = vpack.c.bf16 %v452_v51, %v448_v50  ;;  %v481_v50 = vld [vmem:[#allocation6 + $0xa90] sm:$0xff] }
 0x119   :  { %1208 = vmatprep.mubr.f32.mxu1 %v680_v61  ;;  %v3173_v61 = vpack.c.bf16 %v454_v53, %v450_v52  ;;  %v485_v52 = vld [vmem:[#allocation6 + $0xab0] sm:$0xff]  ;;  %v488_v53 = vld [vmem:[#allocation6 + $0xac8] sm:$0xff] }
 0x11a   :  { %2900 = vmatpush1.bf16.msra.mxu0 %v2899_v0  ;;  %v460_v0 = vld [vmem:[#allocation6 + $0x9e8] sm:$0xff]  ;;  %v3191_v59 = vpack.c.bf16 %v485_v52, %v481_v50  ;;  %v523_v52 = vld [vmem:[#allocation6 + $0xbe0] sm:$0xff] }
 0x11b   :  { %3156 = vmatpush1.bf16.msra.mxu1 %v3155_v1  ;;  %2902 = vmatprep.subr.bf16.mxu0 %v2901_v2  ;;  %v458_v1 = vld [vmem:[#allocation6 + $0x9d8] sm:$0xff]  ;;  %v2921_v6 = vpack.c.bf16 %v460_v0, %v456_v63  ;;  %v489_v63 = vld [vmem:[#allocation6 + $0xad0] sm:$0xff] }
 0x11c   :  { %3158 = vmatprep.subr.bf16.mxu1 %v3157_v7  ;;  %v462_v2 = vld [vmem:[#allocation6 + $0x9f8] sm:$0xff]  ;;  %v455_v7 = vld [vmem:[#allocation6 + $0x9c0] sm:$0xff] }
 0x11d   :  { %v3177_v10 = vpack.c.bf16 %v462_v2, %v458_v1  ;;  %v2923_v17 = vpack.c.bf16 %v459_v8, %v455_v7  ;;  %v493_v1 = vld [vmem:[#allocation6 + $0xaf0] sm:$0xff]  ;;  %v496_v2 = vld [vmem:[#allocation6 + $0xb08] sm:$0xff] }
 0x11e   :  { %2904 = vmatpush1.bf16.msra.mxu0 %v2903_v14  ;;  %v468_v14 = vld [vmem:[#allocation6 + $0xa28] sm:$0xff]  ;;  %v3195_v8 = vpack.c.bf16 %v493_v1, %v489_v63  ;;  %v527_v1 = vld [vmem:[#allocation6 + $0xc00] sm:$0xff] }
 0x11f   :  { %3160 = vmatpush1.bf16.msra.mxu1 %v3159_v15  ;;  %2906 = vmatprep.subr.bf16.mxu0 %v2905_v16  ;;  %v466_v15 = vld [vmem:[#allocation6 + $0xa18] sm:$0xff]  ;;  %v2925_v20 = vpack.c.bf16 %v468_v14, %v464_v13  ;;  %v497_v13 = vld [vmem:[#allocation6 + $0xb10] sm:$0xff] }
 0x120   :  { %3162 = vmatprep.subr.bf16.mxu1 %v3161_v21  ;;  %v470_v16 = vld [vmem:[#allocation6 + $0xa38] sm:$0xff]  ;;  %v463_v21 = vld [vmem:[#allocation6 + $0xa00] sm:$0xff] }
 0x121   :  { %v3181_v26 = vpack.c.bf16 %v470_v16, %v466_v15  ;;  %v2927_v32 = vpack.c.bf16 %v467_v22, %v463_v21  ;;  %v501_v15 = vld [vmem:[#allocation6 + $0xb30] sm:$0xff]  ;;  %v504_v16 = vld [vmem:[#allocation6 + $0xb48] sm:$0xff] }
 0x122   :  { %2908 = vmatpush1.bf16.msra.mxu0 %v2907_v29  ;;  %v476_v29 = vld [vmem:[#allocation6 + $0xa68] sm:$0xff]  ;;  %v3199_v22 = vpack.c.bf16 %v501_v15, %v497_v13  ;;  %v542_v13 = vld [vmem:[#allocation6 + $0xc78] sm:$0xff] }
 0x123   :  { %3164 = vmatpush1.bf16.msra.mxu1 %v3163_v30  ;;  %2910 = vmatprep.subr.bf16.mxu0 %v2909_v31  ;;  %v474_v30 = vld [vmem:[#allocation6 + $0xa58] sm:$0xff]  ;;  %v2929_v34 = vpack.c.bf16 %v476_v29, %v472_v28  ;;  %v505_v28 = vld [vmem:[#allocation6 + $0xb50] sm:$0xff] }
 0x124   :  { %3166 = vmatprep.subr.bf16.mxu1 %v3165_v36  ;;  %v478_v31 = vld [vmem:[#allocation6 + $0xa78] sm:$0xff]  ;;  %v471_v36 = vld [vmem:[#allocation6 + $0xa40] sm:$0xff] }
 0x125   :  { %v3185_v39 = vpack.c.bf16 %v478_v31, %v474_v30  ;;  %v2931_v45 = vpack.c.bf16 %v475_v37, %v471_v36  ;;  %v509_v30 = vld [vmem:[#allocation6 + $0xb70] sm:$0xff]  ;;  %v512_v31 = vld [vmem:[#allocation6 + $0xb88] sm:$0xff] }
 0x126   :  { %2912 = vmatpush1.bf16.msra.mxu0 %v2911_v42  ;;  %v484_v42 = vld [vmem:[#allocation6 + $0xaa8] sm:$0xff]  ;;  %v3203_v37 = vpack.c.bf16 %v509_v30, %v505_v28  ;;  %v546_v28 = vld [vmem:[#allocation6 + $0xc98] sm:$0xff] }
 0x127   :  { %3168 = vmatpush1.bf16.msra.mxu1 %v3167_v43  ;;  %2914 = vmatprep.subr.bf16.mxu0 %v2913_v44  ;;  %v482_v43 = vld [vmem:[#allocation6 + $0xa98] sm:$0xff]  ;;  %v2933_v47 = vpack.c.bf16 %v484_v42, %v480_v41  ;;  %v513_v41 = vld [vmem:[#allocation6 + $0xb90] sm:$0xff] }
 0x128   :  { %3170 = vmatprep.subr.bf16.mxu1 %v3169_v48  ;;  %v486_v44 = vld [vmem:[#allocation6 + $0xab8] sm:$0xff]  ;;  %v479_v48 = vld [vmem:[#allocation6 + $0xa80] sm:$0xff] }
 0x129   :  { %v3189_v51 = vpack.c.bf16 %v486_v44, %v482_v43  ;;  %v2935_v58 = vpack.c.bf16 %v483_v49, %v479_v48  ;;  %v517_v43 = vld [vmem:[#allocation6 + $0xbb0] sm:$0xff]  ;;  %v520_v44 = vld [vmem:[#allocation6 + $0xbc8] sm:$0xff] }
 0x12a   :  { %2916 = vmatpush1.bf16.msra.mxu0 %v2915_v54  ;;  %v492_v54 = vld [vmem:[#allocation6 + $0xae8] sm:$0xff]  ;;  %v3207_v49 = vpack.c.bf16 %v517_v43, %v513_v41  ;;  %v554_v41 = vld [vmem:[#allocation6 + $0xcd8] sm:$0xff] }
 0x12b   :  { %3172 = vmatpush1.bf16.msra.mxu1 %v3171_v55  ;;  %2918 = vmatprep.subr.bf16.mxu0 %v2917_v57  ;;  %v490_v55 = vld [vmem:[#allocation6 + $0xad8] sm:$0xff]  ;;  %v2937_v60 = vpack.c.bf16 %v492_v54, %v488_v53  ;;  %v521_v53 = vld [vmem:[#allocation6 + $0xbd0] sm:$0xff] }
 0x12c   :  { %3174 = vmatprep.subr.bf16.mxu1 %v3173_v61  ;;  %v494_v57 = vld [vmem:[#allocation6 + $0xaf8] sm:$0xff]  ;;  %v487_v61 = vld [vmem:[#allocation6 + $0xac0] sm:$0xff] }
 0x12d   :  { %v3193_v0 = vpack.c.bf16 %v494_v57, %v490_v55  ;;  %v2939_v7 = vpack.c.bf16 %v491_v62, %v487_v61  ;;  %v525_v55 = vld [vmem:[#allocation6 + $0xbf0] sm:$0xff]  ;;  %v528_v57 = vld [vmem:[#allocation6 + $0xc08] sm:$0xff]  ;;  %v675_v61 = vsub.s32 4, %v3961_v5 }
 0x12e   :  { %2920 = vmatpush1.bf16.msra.mxu0 %v2919_v3  ;;  %v500_v3 = vld [vmem:[#allocation6 + $0xb28] sm:$0xff]  ;;  %v3211_v63 = vpack.c.bf16 %v525_v55, %v521_v53  ;;  %v562_v53 = vld [vmem:[#allocation6 + $0xd18] sm:$0xff] }
 0x12f   :  { %3176 = vmatpush1.bf16.msra.mxu1 %v3175_v4  ;;  %2922 = vmatprep.subr.bf16.mxu0 %v2921_v6  ;;  %v498_v4 = vld [vmem:[#allocation6 + $0xb18] sm:$0xff]  ;;  %v2941_v9 = vpack.c.bf16 %v500_v3, %v496_v2  ;;  %v531_v2 = vld [vmem:[#allocation6 + $0xc20] sm:$0xff]  ;;  %v529_v3 = vld [vmem:[#allocation6 + $0xc10] sm:$0xff] }
 0x130   :  { %3178 = vmatprep.subr.bf16.mxu1 %v3177_v10  ;;  %v502_v6 = vld [vmem:[#allocation6 + $0xb38] sm:$0xff]  ;;  %v495_v10 = vld [vmem:[#allocation6 + $0xb00] sm:$0xff] }
 0x131   :  { %v3197_v14 = vpack.c.bf16 %v502_v6, %v498_v4  ;;  %v2943_v21 = vpack.c.bf16 %v499_v12, %v495_v10  ;;  %v533_v6 = vld [vmem:[#allocation6 + $0xc30] sm:$0xff]  ;;  %v676_v10 = vrot.slane %v3966_v24, %v675_v61  ;;  %v538_v12 = vld [vmem:[#allocation6 + $0xc58] sm:$0xff] }
 0x132   :  { %2924 = vmatpush1.bf16.msra.mxu0 %v2923_v17  ;;  %v508_v17 = vld [vmem:[#allocation6 + $0xb68] sm:$0xff]  ;;  %v3215_v15 = vpack.c.bf16 %v533_v6, %v529_v3  ;;  %v561_v61 = vld [vmem:[#allocation6 + $0xd10] sm:$0xff]  ;;  %v574_v3 = vld [vmem:[#allocation6 + $0xd78] sm:$0xff] }
 0x133   :  { %3180 = vmatpush1.bf16.msra.mxu1 %v3179_v18  ;;  %2926 = vmatprep.subr.bf16.mxu0 %v2925_v20  ;;  %v506_v18 = vld [vmem:[#allocation6 + $0xb58] sm:$0xff]  ;;  %v2945_v25 = vpack.c.bf16 %v508_v17, %v504_v16  ;;  %v535_v17 = vld [vmem:[#allocation6 + $0xc40] sm:$0xff] }
 0x134   :  { %3182 = vmatprep.subr.bf16.mxu1 %v3181_v26  ;;  %v510_v20 = vld [vmem:[#allocation6 + $0xb78] sm:$0xff]  ;;  %v503_v26 = vld [vmem:[#allocation6 + $0xb40] sm:$0xff] }
 0x135   :  { %v3201_v29 = vpack.c.bf16 %v510_v20, %v506_v18  ;;  %v2947_v36 = vpack.c.bf16 %v507_v27, %v503_v26  ;;  %v539_v18 = vld [vmem:[#allocation6 + $0xc60] sm:$0xff]  ;;  %v537_v20 = vld [vmem:[#allocation6 + $0xc50] sm:$0xff]  ;;  %v548_v26 = vld [vmem:[#allocation6 + $0xca8] sm:$0xff] }
 0x136   :  { %2928 = vmatpush1.bf16.msra.mxu0 %v2927_v32  ;;  %v516_v32 = vld [vmem:[#allocation6 + $0xba8] sm:$0xff]  ;;  %v2963_v30 = vpack.c.bf16 %v539_v18, %v535_v17  ;;  %v582_v17 = vld [vmem:[#allocation6 + $0xdb8] sm:$0xff] }
 0x137   :  { %3184 = vmatpush1.bf16.msra.mxu1 %v3183_v33  ;;  %2930 = vmatprep.subr.bf16.mxu0 %v2929_v34  ;;  %v514_v33 = vld [vmem:[#allocation6 + $0xb98] sm:$0xff]  ;;  %v2949_v38 = vpack.c.bf16 %v516_v32, %v512_v31 }
 0x138   :  { %3186 = vmatprep.subr.bf16.mxu1 %v3185_v39  ;;  %v518_v34 = vld [vmem:[#allocation6 + $0xbb8] sm:$0xff]  ;;  %v511_v39 = vld [vmem:[#allocation6 + $0xb80] sm:$0xff] }
 0x139   :  { %v3205_v42 = vpack.c.bf16 %v518_v34, %v514_v33  ;;  %v2951_v48 = vpack.c.bf16 %v515_v40, %v511_v39  ;;  %v543_v33 = vld [vmem:[#allocation6 + $0xc80] sm:$0xff]  ;;  %v552_v39 = vld [vmem:[#allocation6 + $0xcc8] sm:$0xff] }
 0x13a   :  { %2932 = vmatpush1.bf16.msra.mxu0 %v2931_v45  ;;  %v524_v45 = vld [vmem:[#allocation6 + $0xbe8] sm:$0xff]  ;;  %v547_v34 = vld [vmem:[#allocation6 + $0xca0] sm:$0xff] }
 0x13b   :  { %3188 = vmatpush1.bf16.msra.mxu1 %v3187_v46  ;;  %2934 = vmatprep.subr.bf16.mxu0 %v2933_v47  ;;  %v522_v46 = vld [vmem:[#allocation6 + $0xbd8] sm:$0xff]  ;;  %v2953_v50 = vpack.c.bf16 %v524_v45, %v520_v44  ;;  %v556_v40 = vld [vmem:[#allocation6 + $0xce8] sm:$0xff]  ;;  %v2967_v43 = vpack.c.bf16 %v547_v34, %v543_v33 }
 0x13c   :  { %3190 = vmatprep.subr.bf16.mxu1 %v3189_v51  ;;  %v526_v47 = vld [vmem:[#allocation6 + $0xbf8] sm:$0xff]  ;;  %v519_v51 = vld [vmem:[#allocation6 + $0xbc0] sm:$0xff]  ;;  %v2969_v45 = vpack.c.bf16 %v556_v40, %v552_v39  ;;  %v585_v39 = vld [vmem:[#allocation6 + $0xdd0] sm:$0xff] }
 0x13d   :  { %v3209_v54 = vpack.c.bf16 %v526_v47, %v522_v46  ;;  %v2955_v62 = vpack.c.bf16 %v523_v52, %v519_v51  ;;  %v551_v46 = vld [vmem:[#allocation6 + $0xcc0] sm:$0xff]  ;;  %v560_v51 = vld [vmem:[#allocation6 + $0xd08] sm:$0xff] }
 0x13e   :  { %2936 = vmatpush1.bf16.msra.mxu0 %v2935_v58  ;;  %v532_v58 = vld [vmem:[#allocation6 + $0xc28] sm:$0xff]  ;;  %v555_v47 = vld [vmem:[#allocation6 + $0xce0] sm:$0xff] }
 0x13f   :  { %3192 = vmatpush1.bf16.msra.mxu1 %v3191_v59  ;;  %2938 = vmatprep.subr.bf16.mxu0 %v2937_v60  ;;  %v530_v59 = vld [vmem:[#allocation6 + $0xc18] sm:$0xff]  ;;  %v564_v52 = vld [vmem:[#allocation6 + $0xd28] sm:$0xff]  ;;  %v2971_v55 = vpack.c.bf16 %v555_v47, %v551_v46 }
 0x140   :  { %3194 = vmatprep.subr.bf16.mxu1 %v3193_v0  ;;  %v534_v60 = vld [vmem:[#allocation6 + $0xc38] sm:$0xff]  ;;  %v2957_v0 = vpack.c.bf16 %v532_v58, %v528_v57  ;;  %v2973_v58 = vpack.c.bf16 %v564_v52, %v560_v51  ;;  %v593_v51 = vld [vmem:[#allocation6 + $0xe10] sm:$0xff] }
 0x141   :  { %v3213_v4 = vpack.c.bf16 %v534_v60, %v530_v59  ;;  %v559_v59 = vld [vmem:[#allocation6 + $0xd00] sm:$0xff] }
 0x142   :  { %2940 = vmatpush1.bf16.msra.mxu0 %v2939_v7  ;;  %v536_v7 = vld [vmem:[#allocation6 + $0xc48] sm:$0xff]  ;;  %v563_v60 = vld [vmem:[#allocation6 + $0xd20] sm:$0xff] }
 0x143   :  { %3196 = vmatpush1.bf16.msra.mxu1 %v3195_v8  ;;  %2942 = vmatprep.subr.bf16.mxu0 %v2941_v9  ;;  %v540_v8 = vld [vmem:[#allocation6 + $0xc68] sm:$0xff]  ;;  %v687_v9 = vsub.s32 7, %v3961_v5 }
 0x144   :  { %3198 = vmatprep.subr.bf16.mxu1 %v3197_v14  ;;  %v2959_v14 = vpack.c.bf16 %v531_v2, %v527_v1  ;;  %v2961_v16 = vpack.c.bf16 %v540_v8, %v536_v7  ;;  %v572_v1 = vld [vmem:[#allocation6 + $0xd68] sm:$0xff]  ;;  %v570_v2 = vld [vmem:[#allocation6 + $0xd58] sm:$0xff]  ;;  %v567_v8 = vld [vmem:[#allocation6 + $0xd40] sm:$0xff] }
 0x145   :  { %v688_v27 = vrot.slane %v3966_v24, %v687_v9  ;;  %v571_v9 = vld [vmem:[#allocation6 + $0xd60] sm:$0xff] }
 0x146   :  { %2944 = vmatpush1.bf16.msra.mxu0 %v2943_v21  ;;  %v3217_v21 = vpack.c.bf16 %v542_v13, %v538_v12  ;;  %v3233_v12 = vpack.c.bf16 %v574_v3, %v570_v2  ;;  %v573_v13 = vld [vmem:[#allocation6 + $0xd70] sm:$0xff]  ;;  %v2979_v18 = vpack.c.bf16 %v571_v9, %v567_v8  ;;  %v608_v3 = vld [vmem:[#allocation6 + $0xe88] sm:$0xff] }
 0x147   :  { %3200 = vmatpush1.bf16.msra.mxu1 %v3199_v22  ;;  %2946 = vmatprep.subr.bf16.mxu0 %v2945_v25  ;;  %v541_v22 = vld [vmem:[#allocation6 + $0xc70] sm:$0xff]  ;;  %v544_v25 = vld [vmem:[#allocation6 + $0xc88] sm:$0xff] }
 0x148   :  { %3202 = vmatprep.subr.bf16.mxu1 %v3201_v29  ;;  %v550_v29 = vld [vmem:[#allocation6 + $0xcb8] sm:$0xff]  ;;  %v3219_v31 = vpack.c.bf16 %v541_v22, %v537_v20  ;;  %v2965_v32 = vpack.c.bf16 %v548_v26, %v544_v25  ;;  %v575_v22 = vld [vmem:[#allocation6 + $0xd80] sm:$0xff]  ;;  %v577_v26 = vld [vmem:[#allocation6 + $0xd90] sm:$0xff] }
 0x149   :  { %v579_v25 = vld [vmem:[#allocation6 + $0xda0] sm:$0xff]  ;;  %v605_v2 = vld [vmem:[#allocation6 + $0xe70] sm:$0xff] }
 0x14a   :  { %2948 = vmatpush1.bf16.msra.mxu0 %v2947_v36  ;;  %v545_v36 = vld [vmem:[#allocation6 + $0xc90] sm:$0xff]  ;;  %v2983_v33 = vpack.c.bf16 %v579_v25, %v575_v22 }
 0x14b   :  { %3204 = vmatpush1.bf16.msra.mxu1 %v3203_v37  ;;  %2950 = vmatprep.subr.bf16.mxu0 %v2949_v38  ;;  %v3221_v37 = vpack.c.bf16 %v550_v29, %v546_v28  ;;  %v549_v38 = vld [vmem:[#allocation6 + $0xcb0] sm:$0xff]  ;;  %v584_v29 = vld [vmem:[#allocation6 + $0xdc8] sm:$0xff] }
 0x14c   :  { %3206 = vmatprep.subr.bf16.mxu1 %v3205_v42  ;;  %v558_v42 = vld [vmem:[#allocation6 + $0xcf8] sm:$0xff]  ;;  %v3223_v44 = vpack.c.bf16 %v549_v38, %v545_v36  ;;  %v581_v28 = vld [vmem:[#allocation6 + $0xdb0] sm:$0xff]  ;;  %v587_v38 = vld [vmem:[#allocation6 + $0xde0] sm:$0xff] }
 0x14d   :  { %v3239_v34 = vpack.c.bf16 %v581_v28, %v577_v26  ;;  %v619_v28 = vld [vmem:[#allocation6 + $0xee0] sm:$0xff] }
 0x14e   :  { %2952 = vmatpush1.bf16.msra.mxu0 %v2951_v48  ;;  %v553_v48 = vld [vmem:[#allocation6 + $0xcd0] sm:$0xff] }
 0x14f   :  { %3208 = vmatpush1.bf16.msra.mxu1 %v3207_v49  ;;  %2954 = vmatprep.subr.bf16.mxu0 %v2953_v50  ;;  %v3225_v49 = vpack.c.bf16 %v558_v42, %v554_v41  ;;  %v557_v50 = vld [vmem:[#allocation6 + $0xcf0] sm:$0xff]  ;;  %v592_v42 = vld [vmem:[#allocation6 + $0xe08] sm:$0xff] }
 0x150   :  { %3210 = vmatprep.subr.bf16.mxu1 %v3209_v54  ;;  %v566_v54 = vld [vmem:[#allocation6 + $0xd38] sm:$0xff]  ;;  %v3227_v57 = vpack.c.bf16 %v557_v50, %v553_v48  ;;  %v589_v41 = vld [vmem:[#allocation6 + $0xdf0] sm:$0xff]  ;;  %v595_v50 = vld [vmem:[#allocation6 + $0xe20] sm:$0xff] }
 0x151   :  { %v3243_v47 = vpack.c.bf16 %v589_v41, %v585_v39  ;;  %v627_v41 = vld [vmem:[#allocation6 + $0xf20] sm:$0xff] }
 0x152   :  { %2956 = vmatpush1.bf16.msra.mxu0 %v2955_v62  ;;  %v3229_v62 = vpack.c.bf16 %v566_v54, %v562_v53  ;;  %v597_v53 = vld [vmem:[#allocation6 + $0xe30] sm:$0xff]  ;;  %v600_v54 = vld [vmem:[#allocation6 + $0xe48] sm:$0xff] }
 0x153   :  { %3212 = vmatpush1.bf16.msra.mxu1 %v3211_v63  ;;  %2958 = vmatprep.subr.bf16.mxu0 %v2957_v0  ;;  %v565_v63 = vld [vmem:[#allocation6 + $0xd30] sm:$0xff]  ;;  %v568_v0 = vld [vmem:[#allocation6 + $0xd48] sm:$0xff] }
 0x154   :  { %3214 = vmatprep.subr.bf16.mxu1 %v3213_v4  ;;  %v2975_v4 = vpack.c.bf16 %v563_v60, %v559_v59  ;;  %v3231_v6 = vpack.c.bf16 %v565_v63, %v561_v61  ;;  %v2977_v7 = vpack.c.bf16 %v572_v1, %v568_v0  ;;  %v3247_v60 = vpack.c.bf16 %v597_v53, %v593_v51  ;;  %v603_v63 = vld [vmem:[#allocation6 + $0xe60] sm:$0xff]  ;;  %v601_v0 = vld [vmem:[#allocation6 + $0xe50] sm:$0xff] }
 0x155   :  { %925 = vmatmul.mubr.f32.vlgmr.msra.gmra.mrb[0].mxu0 %v676_v10  ;;  %v3251_v9 = vpack.c.bf16 %v605_v2, %v601_v0  ;;  %v635_v53 = vld [vmem:[#allocation6 + $0xf60] sm:$0xff] }
 0x156   :  { %2960 = vmatpush1.bf16.msra.mxu0 %v2959_v14  ;;  %1209 = vmatmul.mubr.f32.vlgmr.msra.gmra.mrb[0].mxu1 %v676_v10  ;;  %v569_v10 = vld [vmem:[#allocation6 + $0xd50] sm:$0xff]  ;;  %v576_v14 = vld [vmem:[#allocation6 + $0xd88] sm:$0xff]  ;;  %v643_v2 = vld [vmem:[#allocation6 + $0xfa0] sm:$0xff] }
 0x157   :  { %3216 = vmatpush1.bf16.msra.mxu1 %v3215_v15  ;;  %2962 = vmatprep.subr.bf16.mxu0 %v2961_v16  ;;  %v580_v15 = vld [vmem:[#allocation6 + $0xda8] sm:$0xff]  ;;  %v578_v16 = vld [vmem:[#allocation6 + $0xd98] sm:$0xff]  ;;  %v3235_v20 = vpack.c.bf16 %v573_v13, %v569_v10  ;;  %v611_v13 = vld [vmem:[#allocation6 + $0xea0] sm:$0xff] }
 0x158   :  { %3218 = vmatprep.subr.bf16.mxu1 %v3217_v21  ;;  %995 = vmatprep.mubr.f32.mxu0 %v688_v27  ;;  %v2981_v21 = vpack.c.bf16 %v580_v15, %v576_v14  ;;  %v609_v14 = vld [vmem:[#allocation6 + $0xe90] sm:$0xff] }
 0x159   :  { %1279 = vmatprep.mubr.f32.mxu1 %v688_v27  ;;  %v3237_v27 = vpack.c.bf16 %v582_v17, %v578_v16  ;;  %v613_v16 = vld [vmem:[#allocation6 + $0xeb0] sm:$0xff]  ;;  %v616_v17 = vld [vmem:[#allocation6 + $0xec8] sm:$0xff] }
 0x15a   :  { %2964 = vmatpush1.bf16.msra.mxu0 %v2963_v30  ;;  %v588_v30 = vld [vmem:[#allocation6 + $0xde8] sm:$0xff]  ;;  %v3255_v25 = vpack.c.bf16 %v613_v16, %v609_v14  ;;  %v651_v16 = vld [vmem:[#allocation6 + $0xfe0] sm:$0xff] }
 0x15b   :  { %3220 = vmatpush1.bf16.msra.mxu1 %v3219_v31  ;;  %2966 = vmatprep.subr.bf16.mxu0 %v2965_v32  ;;  %v586_v31 = vld [vmem:[#allocation6 + $0xdd8] sm:$0xff]  ;;  %v2985_v36 = vpack.c.bf16 %v588_v30, %v584_v29  ;;  %v617_v29 = vld [vmem:[#allocation6 + $0xed0] sm:$0xff] }
 0x15c   :  { %3222 = vmatprep.subr.bf16.mxu1 %v3221_v37  ;;  %v590_v32 = vld [vmem:[#allocation6 + $0xdf8] sm:$0xff]  ;;  %v583_v37 = vld [vmem:[#allocation6 + $0xdc0] sm:$0xff] }
 0x15d   :  { %v3241_v40 = vpack.c.bf16 %v590_v32, %v586_v31  ;;  %v2987_v46 = vpack.c.bf16 %v587_v38, %v583_v37  ;;  %v621_v31 = vld [vmem:[#allocation6 + $0xef0] sm:$0xff]  ;;  %v624_v32 = vld [vmem:[#allocation6 + $0xf08] sm:$0xff] }
 0x15e   :  { %2968 = vmatpush1.bf16.msra.mxu0 %v2967_v43  ;;  %v596_v43 = vld [vmem:[#allocation6 + $0xe28] sm:$0xff]  ;;  %v3259_v38 = vpack.c.bf16 %v621_v31, %v617_v29  ;;  %v1704_v31 = vld [vmem:[#allocation9 + $0x10] sm:$0xff] }
 0x15f   :  { %3224 = vmatpush1.bf16.msra.mxu1 %v3223_v44  ;;  %2970 = vmatprep.subr.bf16.mxu0 %v2969_v45  ;;  %v594_v44 = vld [vmem:[#allocation6 + $0xe18] sm:$0xff]  ;;  %v2989_v48 = vpack.c.bf16 %v596_v43, %v592_v42  ;;  %v625_v42 = vld [vmem:[#allocation6 + $0xf10] sm:$0xff] }
 0x160   :  { %3226 = vmatprep.subr.bf16.mxu1 %v3225_v49  ;;  %v598_v45 = vld [vmem:[#allocation6 + $0xe38] sm:$0xff]  ;;  %v591_v49 = vld [vmem:[#allocation6 + $0xe00] sm:$0xff] }
 0x161   :  { %v3245_v52 = vpack.c.bf16 %v598_v45, %v594_v44  ;;  %v2991_v59 = vpack.c.bf16 %v595_v50, %v591_v49  ;;  %v629_v44 = vld [vmem:[#allocation6 + $0xf30] sm:$0xff]  ;;  %v632_v45 = vld [vmem:[#allocation6 + $0xf48] sm:$0xff] }
 0x162   :  { %2972 = vmatpush1.bf16.msra.mxu0 %v2971_v55  ;;  %v604_v55 = vld [vmem:[#allocation6 + $0xe68] sm:$0xff]  ;;  %v3263_v50 = vpack.c.bf16 %v629_v44, %v625_v42 }
 0x163   :  { %3228 = vmatpush1.bf16.msra.mxu1 %v3227_v57  ;;  %2974 = vmatprep.subr.bf16.mxu0 %v2973_v58  ;;  %v602_v57 = vld [vmem:[#allocation6 + $0xe58] sm:$0xff]  ;;  %v2993_v61 = vpack.c.bf16 %v604_v55, %v600_v54  ;;  %v633_v54 = vld [vmem:[#allocation6 + $0xf50] sm:$0xff]  ;;  %v1710_v42 = vld [vmem:[#allocation9 + $0x40] sm:$0xff] }
 0x164   :  { %3230 = vmatprep.subr.bf16.mxu1 %v3229_v62  ;;  %v606_v58 = vld [vmem:[#allocation6 + $0xe78] sm:$0xff]  ;;  %v599_v62 = vld [vmem:[#allocation6 + $0xe40] sm:$0xff] }
 0x165   :  { %v3249_v1 = vpack.c.bf16 %v606_v58, %v602_v57  ;;  %v2995_v8 = vpack.c.bf16 %v603_v63, %v599_v62  ;;  %v637_v57 = vld [vmem:[#allocation6 + $0xf70] sm:$0xff]  ;;  %v640_v58 = vld [vmem:[#allocation6 + $0xf88] sm:$0xff] }
 0x166   :  { %2976 = vmatpush1.bf16.msra.mxu0 %v2975_v4  ;;  %v612_v4 = vld [vmem:[#allocation6 + $0xea8] sm:$0xff]  ;;  %v3267_v63 = vpack.c.bf16 %v637_v57, %v633_v54 }
 0x167   :  { %3232 = vmatpush1.bf16.msra.mxu1 %v3231_v6  ;;  %2978 = vmatprep.subr.bf16.mxu0 %v2977_v7  ;;  %v610_v6 = vld [vmem:[#allocation6 + $0xe98] sm:$0xff]  ;;  %v2997_v10 = vpack.c.bf16 %v612_v4, %v608_v3  ;;  %v641_v3 = vld [vmem:[#allocation6 + $0xf90] sm:$0xff]  ;;  %v1718_v54 = vld [vmem:[#allocation9 + $0x80] sm:$0xff] }
 0x168   :  { %3234 = vmatprep.subr.bf16.mxu1 %v3233_v12  ;;  %v614_v7 = vld [vmem:[#allocation6 + $0xeb8] sm:$0xff]  ;;  %v607_v12 = vld [vmem:[#allocation6 + $0xe80] sm:$0xff] }
 0x169   :  { %v3253_v15 = vpack.c.bf16 %v614_v7, %v610_v6  ;;  %v2999_v22 = vpack.c.bf16 %v611_v13, %v607_v12  ;;  %v645_v6 = vld [vmem:[#allocation6 + $0xfb0] sm:$0xff]  ;;  %v648_v7 = vld [vmem:[#allocation6 + $0xfc8] sm:$0xff] }
 0x16a   :  { %2980 = vmatpush1.bf16.msra.mxu0 %v2979_v18  ;;  %v620_v18 = vld [vmem:[#allocation6 + $0xee8] sm:$0xff]  ;;  %v3271_v13 = vpack.c.bf16 %v645_v6, %v641_v3 }
 0x16b   :  { %3236 = vmatpush1.bf16.msra.mxu1 %v3235_v20  ;;  %2982 = vmatprep.subr.bf16.mxu0 %v2981_v21  ;;  %v618_v20 = vld [vmem:[#allocation6 + $0xed8] sm:$0xff]  ;;  %v3001_v26 = vpack.c.bf16 %v620_v18, %v616_v17  ;;  %v649_v18 = vld [vmem:[#allocation6 + $0xfd0] sm:$0xff]  ;;  %v1726_v3 = vld [vmem:[#allocation9 + $0xc0] sm:$0xff] }
 0x16c   :  { %3238 = vmatprep.subr.bf16.mxu1 %v3237_v27  ;;  %v622_v21 = vld [vmem:[#allocation6 + $0xef8] sm:$0xff]  ;;  %v615_v27 = vld [vmem:[#allocation6 + $0xec0] sm:$0xff] }
 0x16d   :  { %v3257_v30 = vpack.c.bf16 %v622_v21, %v618_v20  ;;  %v3003_v37 = vpack.c.bf16 %v619_v28, %v615_v27  ;;  %v653_v20 = vld [vmem:[#allocation6 + $0xff0] sm:$0xff]  ;;  %v683_v21 = vsub.s32 6, %v3961_v5  ;;  %v1705_v28 = vld [vmem:[#allocation9 + $0x18] sm:$0xff] }
 0x16e   :  { %2984 = vmatpush1.bf16.msra.mxu0 %v2983_v33  ;;  %v628_v33 = vld [vmem:[#allocation6 + $0xf28] sm:$0xff] }
 0x16f   :  { %3240 = vmatpush1.bf16.msra.mxu1 %v3239_v34  ;;  %2986 = vmatprep.subr.bf16.mxu0 %v2985_v36  ;;  %v626_v34 = vld [vmem:[#allocation6 + $0xf18] sm:$0xff]  ;;  %v3005_v39 = vpack.c.bf16 %v628_v33, %v624_v32  ;;  %v1703_v27 = vld [vmem:[#allocation9 + $0x8] sm:$0xff] }
 0x170   :  { %3242 = vmatprep.subr.bf16.mxu1 %v3241_v40  ;;  %v630_v36 = vld [vmem:[#allocation6 + $0xf38] sm:$0xff]  ;;  %v623_v40 = vld [vmem:[#allocation6 + $0xf00] sm:$0xff]  ;;  %v3277_v29 = vpack.c.bf16 %v1705_v28, %v1703_v27  ;;  %v1707_v33 = vld [vmem:[#allocation9 + $0x28] sm:$0xff] }
 0x171   :  { %v3261_v43 = vpack.c.bf16 %v630_v36, %v626_v34  ;;  %v3007_v49 = vpack.c.bf16 %v627_v41, %v623_v40  ;;  %v1709_v34 = vld [vmem:[#allocation9 + $0x38] sm:$0xff]  ;;  %v1740_v27 = vld [vmem:[#allocation9 + $0x130] sm:$0xff] }
 0x172   :  { %2988 = vmatpush1.bf16.msra.mxu0 %v2987_v46  ;;  %v636_v46 = vld [vmem:[#allocation6 + $0xf68] sm:$0xff]  ;;  %v3281_v36 = vpack.c.bf16 %v1709_v34, %v1707_v33  ;;  %v1713_v40 = vld [vmem:[#allocation9 + $0x58] sm:$0xff]  ;;  %v1744_v33 = vld [vmem:[#allocation9 + $0x150] sm:$0xff] }
 0x173   :  { %3244 = vmatpush1.bf16.msra.mxu1 %v3243_v47  ;;  %2990 = vmatprep.subr.bf16.mxu0 %v2989_v48  ;;  %v634_v47 = vld [vmem:[#allocation6 + $0xf58] sm:$0xff]  ;;  %v3009_v51 = vpack.c.bf16 %v636_v46, %v632_v45  ;;  %v1715_v45 = vld [vmem:[#allocation9 + $0x68] sm:$0xff] }
 0x174   :  { %3246 = vmatprep.subr.bf16.mxu1 %v3245_v52  ;;  %v638_v48 = vld [vmem:[#allocation6 + $0xf78] sm:$0xff]  ;;  %v631_v52 = vld [vmem:[#allocation6 + $0xf40] sm:$0xff] }
 0x175   :  { %v3265_v55 = vpack.c.bf16 %v638_v48, %v634_v47  ;;  %v3011_v62 = vpack.c.bf16 %v635_v53, %v631_v52  ;;  %v1717_v46 = vld [vmem:[#allocation9 + $0x78] sm:$0xff]  ;;  %v1714_v48 = vld [vmem:[#allocation9 + $0x60] sm:$0xff] }
 0x176   :  { %2992 = vmatpush1.bf16.msra.mxu0 %v2991_v59  ;;  %v644_v59 = vld [vmem:[#allocation6 + $0xfa8] sm:$0xff]  ;;  %v3289_v47 = vpack.c.bf16 %v1717_v46, %v1715_v45  ;;  %v1721_v52 = vld [vmem:[#allocation9 + $0x98] sm:$0xff]  ;;  %v1752_v45 = vld [vmem:[#allocation9 + $0x190] sm:$0xff] }
 0x177   :  { %3248 = vmatpush1.bf16.msra.mxu1 %v3247_v60  ;;  %2994 = vmatprep.subr.bf16.mxu0 %v2993_v61  ;;  %v642_v60 = vld [vmem:[#allocation6 + $0xf98] sm:$0xff]  ;;  %v3013_v0 = vpack.c.bf16 %v644_v59, %v640_v58  ;;  %v1723_v58 = vld [vmem:[#allocation9 + $0xa8] sm:$0xff] }
 0x178   :  { %3250 = vmatprep.subr.bf16.mxu1 %v3249_v1  ;;  %v646_v61 = vld [vmem:[#allocation6 + $0xfb8] sm:$0xff]  ;;  %v639_v1 = vld [vmem:[#allocation6 + $0xf80] sm:$0xff]  ;;  %v1755_v46 = vld [vmem:[#allocation9 + $0x1a8] sm:$0xff] }
 0x179   :  { %v3269_v4 = vpack.c.bf16 %v646_v61, %v642_v60  ;;  %v3015_v12 = vpack.c.bf16 %v643_v2, %v639_v1  ;;  %v1725_v59 = vld [vmem:[#allocation9 + $0xb8] sm:$0xff]  ;;  %v1722_v61 = vld [vmem:[#allocation9 + $0xa0] sm:$0xff] }
 0x17a   :  { %2996 = vmatpush1.bf16.msra.mxu0 %v2995_v8  ;;  %v652_v8 = vld [vmem:[#allocation6 + $0xfe8] sm:$0xff]  ;;  %v3297_v60 = vpack.c.bf16 %v1725_v59, %v1723_v58  ;;  %v1729_v1 = vld [vmem:[#allocation9 + $0xd8] sm:$0xff]  ;;  %v1760_v58 = vld [vmem:[#allocation9 + $0x1d0] sm:$0xff] }
 0x17b   :  { %3252 = vmatpush1.bf16.msra.mxu1 %v3251_v9  ;;  %2998 = vmatprep.subr.bf16.mxu0 %v2997_v10  ;;  %v650_v9 = vld [vmem:[#allocation6 + $0xfd8] sm:$0xff]  ;;  %v3017_v14 = vpack.c.bf16 %v652_v8, %v648_v7  ;;  %v1731_v7 = vld [vmem:[#allocation9 + $0xe8] sm:$0xff] }
 0x17c   :  { %3254 = vmatprep.subr.bf16.mxu1 %v3253_v15  ;;  %v654_v10 = vld [vmem:[#allocation6 + $0xff8] sm:$0xff]  ;;  %v647_v15 = vld [vmem:[#allocation6 + $0xfc0] sm:$0xff]  ;;  %v1763_v59 = vld [vmem:[#allocation9 + $0x1e8] sm:$0xff] }
 0x17d   :  { %v3273_v17 = vpack.c.bf16 %v654_v10, %v650_v9  ;;  %v1733_v8 = vld [vmem:[#allocation9 + $0xf8] sm:$0xff]  ;;  %v1730_v10 = vld [vmem:[#allocation9 + $0xe0] sm:$0xff] }
 0x17e   :  { %3000 = vmatpush1.bf16.msra.mxu0 %v2999_v22  ;;  %v3019_v22 = vpack.c.bf16 %v651_v16, %v647_v15  ;;  %v3305_v9 = vpack.c.bf16 %v1733_v8, %v1731_v7  ;;  %v1737_v15 = vld [vmem:[#allocation9 + $0x118] sm:$0xff] }
 0x17f   :  { %3256 = vmatpush1.bf16.msra.mxu1 %v3255_v25  ;;  %3002 = vmatprep.subr.bf16.mxu0 %v3001_v26  ;;  %v3275_v25 = vpack.c.bf16 %v653_v20, %v649_v18  ;;  %v684_v26 = vrot.slane %v3966_v24, %v683_v21  ;;  %v1711_v24 = vld [vmem:[#allocation9 + $0x48] sm:$0xff]  ;;  %v1736_v18 = vld [vmem:[#allocation9 + $0x110] sm:$0xff] }
 0x180   :  { %3258 = vmatprep.subr.bf16.mxu1 %v3257_v30  ;;  %v1702_v30 = vld [vmem:[#allocation9] sm:$0xff]  ;;  %v3285_v41 = vpack.c.bf16 %v1713_v40, %v1711_v24  ;;  %v1739_v21 = vld [vmem:[#allocation9 + $0x128] sm:$0xff]  ;;  %v1748_v24 = vld [vmem:[#allocation9 + $0x170] sm:$0xff] }
 0x181   :  { %v3279_v32 = vpack.c.bf16 %v1704_v31, %v1702_v30  ;;  %v1745_v30 = vld [vmem:[#allocation9 + $0x158] sm:$0xff] }
 0x182   :  { %3004 = vmatpush1.bf16.msra.mxu0 %v3003_v37  ;;  %v1706_v37 = vld [vmem:[#allocation9 + $0x20] sm:$0xff] }
 0x183   :  { %3260 = vmatpush1.bf16.msra.mxu1 %v3259_v38  ;;  %3006 = vmatprep.subr.bf16.mxu0 %v3005_v39  ;;  %v1708_v38 = vld [vmem:[#allocation9 + $0x30] sm:$0xff] }
 0x184   :  { %3262 = vmatprep.subr.bf16.mxu1 %v3261_v43  ;;  %v3283_v39 = vpack.c.bf16 %v1708_v38, %v1706_v37  ;;  %v1712_v43 = vld [vmem:[#allocation9 + $0x50] sm:$0xff]  ;;  %v1749_v37 = vld [vmem:[#allocation9 + $0x178] sm:$0xff] }
 0x185   :  { %v3287_v44 = vpack.c.bf16 %v1712_v43, %v1710_v42  ;;  %v1753_v42 = vld [vmem:[#allocation9 + $0x198] sm:$0xff]  ;;  %v1750_v43 = vld [vmem:[#allocation9 + $0x180] sm:$0xff] }
 0x186   :  { %3008 = vmatpush1.bf16.msra.mxu0 %v3007_v49  ;;  %v1716_v49 = vld [vmem:[#allocation9 + $0x70] sm:$0xff] }
 0x187   :  { %3264 = vmatpush1.bf16.msra.mxu1 %v3263_v50  ;;  %3010 = vmatprep.subr.bf16.mxu0 %v3009_v51  ;;  %v3291_v50 = vpack.c.bf16 %v1716_v49, %v1714_v48  ;;  %v1719_v51 = vld [vmem:[#allocation9 + $0x88] sm:$0xff]  ;;  %v3327_v48 = vpack.c.bf16 %v1752_v45, %v1750_v43 }
 0x188   :  { %3266 = vmatprep.subr.bf16.mxu1 %v3265_v55  ;;  %v3293_v53 = vpack.c.bf16 %v1721_v52, %v1719_v51  ;;  %v1720_v55 = vld [vmem:[#allocation9 + $0x90] sm:$0xff]  ;;  %v1759_v52 = vld [vmem:[#allocation9 + $0x1c8] sm:$0xff] }
 0x189   :  { %v3295_v57 = vpack.c.bf16 %v1720_v55, %v1718_v54  ;;  %v1756_v51 = vld [vmem:[#allocation9 + $0x1b0] sm:$0xff] }
 0x18a   :  { %3012 = vmatpush1.bf16.msra.mxu0 %v3011_v62  ;;  %v1724_v62 = vld [vmem:[#allocation9 + $0xb0] sm:$0xff] }
 0x18b   :  { %3268 = vmatpush1.bf16.msra.mxu1 %v3267_v63  ;;  %3014 = vmatprep.subr.bf16.mxu0 %v3013_v0  ;;  %v3299_v63 = vpack.c.bf16 %v1724_v62, %v1722_v61  ;;  %v1727_v0 = vld [vmem:[#allocation9 + $0xc8] sm:$0xff]  ;;  %v655_v61 = vld [vmem:[#allocation7] sm:$0xf] }
 0x18c   :  { %3270 = vmatprep.subr.bf16.mxu1 %v3269_v4  ;;  %v3301_v2 = vpack.c.bf16 %v1729_v1, %v1727_v0  ;;  %v1728_v4 = vld [vmem:[#allocation9 + $0xd0] sm:$0xff]  ;;  %v1762_v0 = vld [vmem:[#allocation9 + $0x1e0] sm:$0xff]  ;;  %v705_v7 = vrot.slane %v655_v61, %v3964_v19 }
 0x18d   :  { %v3303_v6 = vpack.c.bf16 %v1728_v4, %v1726_v3  ;;  %v1764_v1 = vld [vmem:[#allocation9 + $0x1f0] sm:$0xff]  ;;  %v1769_v3 = vld [vmem:[#allocation9 + $0x218] sm:$0xff]  ;;  %v701_v4 = vrot.slane %v655_v61, %v3971_v11 }
 0x18e   :  { %3016 = vmatpush1.bf16.msra.mxu0 %v3015_v12  ;;  %v1732_v12 = vld [vmem:[#allocation9 + $0xf0] sm:$0xff]  ;;  %v3339_v8 = vpack.c.bf16 %v1764_v1, %v1762_v0 }
 0x18f   :  { %3272 = vmatpush1.bf16.msra.mxu1 %v3271_v13  ;;  %3018 = vmatprep.subr.bf16.mxu0 %v3017_v14  ;;  %v3307_v13 = vpack.c.bf16 %v1732_v12, %v1730_v10  ;;  %v1735_v14 = vld [vmem:[#allocation9 + $0x108] sm:$0xff] }
 0x190   :  { %3274 = vmatprep.subr.bf16.mxu1 %v3273_v17  ;;  %v3309_v16 = vpack.c.bf16 %v1737_v15, %v1735_v14  ;;  %v1734_v17 = vld [vmem:[#allocation9 + $0x100] sm:$0xff] }
 0x191   :  { %v3311_v20 = vpack.c.bf16 %v1736_v18, %v1734_v17 }
 0x192   :  { %3020 = vmatpush1.bf16.msra.mxu0 %v3019_v22  ;;  %v1741_v22 = vld [vmem:[#allocation9 + $0x138] sm:$0xff] }
 0x193   :  { %3276 = vmatpush1.bf16.msra.mxu1 %v3275_v25  ;;  %3278 = vmatprep.subr.bf16.mxu0 %v3277_v29  ;;  %v3313_v25 = vpack.c.bf16 %v1741_v22, %v1739_v21  ;;  %v1743_v29 = vld [vmem:[#allocation9 + $0x148] sm:$0xff] }
 0x194   :  { %v3317_v31 = vpack.c.bf16 %v1745_v30, %v1743_v29 }
 0x195   :  { %996 = vmatmul.mubr.f32.vlgmr.msra.gmra.mrb[0].mxu0 %v684_v26 }
 0x196   :  { %1280 = vmatmul.mubr.f32.vlgmr.msra.gmra.mrb[0].mxu1 %v684_v26  ;;  %3280 = vmatpush1.bf16.msra.mxu0 %v3279_v32  ;;  %v1738_v26 = vld [vmem:[#allocation9 + $0x120] sm:$0xff] }
 0x197   :  { %3282 = vmatprep.subr.bf16.mxu0 %v3281_v36  ;;  %v3315_v28 = vpack.c.bf16 %v1740_v27, %v1738_v26  ;;  %v1742_v32 = vld [vmem:[#allocation9 + $0x140] sm:$0xff]  ;;  %v1747_v36 = vld [vmem:[#allocation9 + $0x168] sm:$0xff] }
 0x198   :  { %v3319_v34 = vpack.c.bf16 %v1744_v33, %v1742_v32  ;;  %v3321_v38 = vpack.c.bf16 %v1749_v37, %v1747_v36 }
 0x19a   :  { %3284 = vmatpush1.bf16.msra.mxu0 %v3283_v39  ;;  %v1746_v39 = vld [vmem:[#allocation9 + $0x160] sm:$0xff] }
 0x19b   :  { %3286 = vmatprep.subr.bf16.mxu0 %v3285_v41  ;;  %v3323_v40 = vpack.c.bf16 %v1748_v24, %v1746_v39  ;;  %v1751_v41 = vld [vmem:[#allocation9 + $0x188] sm:$0xff] }
 0x19e   :  { %3288 = vmatpush1.bf16.msra.mxu0 %v3287_v44  ;;  %v3325_v44 = vpack.c.bf16 %v1753_v42, %v1751_v41 }
 0x19f   :  { %3290 = vmatprep.subr.bf16.mxu0 %v3289_v47  ;;  %v1757_v47 = vld [vmem:[#allocation9 + $0x1b8] sm:$0xff] }
 0x1a0   :  { %v3329_v49 = vpack.c.bf16 %v1757_v47, %v1755_v46  ;;  %v3791_v46 = vmov 2475754826  }
 0x1a2   :  { %3292 = vmatpush1.bf16.msra.mxu0 %v3291_v50  ;;  %v1754_v50 = vld [vmem:[#allocation9 + $0x1a0] sm:$0xff] }
 0x1a3   :  { %3294 = vmatprep.subr.bf16.mxu0 %v3293_v53  ;;  %v1761_v53 = vld [vmem:[#allocation9 + $0x1d8] sm:$0xff]  ;;  %v3331_v54 = vpack.c.bf16 %v1756_v51, %v1754_v50  ;;  %v3792_v51 = vmov 2131351028  }
 0x1a4   :  { %v3333_v55 = vpack.c.bf16 %v1761_v53, %v1759_v52 }
 0x1a6   :  { %3296 = vmatpush1.bf16.msra.mxu0 %v3295_v57  ;;  %v1758_v57 = vld [vmem:[#allocation9 + $0x1c0] sm:$0xff] }
 0x1a7   :  { %3298 = vmatprep.subr.bf16.mxu0 %v3297_v60  ;;  %v1765_v60 = vld [vmem:[#allocation9 + $0x1f8] sm:$0xff]  ;;  %v3335_v62 = vpack.c.bf16 %v1760_v58, %v1758_v57  ;;  %v3794_v58 = vmov 920167782  }
 0x1aa   :  { %3300 = vmatpush1.bf16.msra.mxu0 %v3299_v63  ;;  %v3337_v63 = vpack.c.bf16 %v1765_v60, %v1763_v59 }
 0x1ab   :  { %3302 = vmatprep.subr.bf16.mxu0 %v3301_v2  ;;  %v1767_v2 = vld [vmem:[#allocation9 + $0x208] sm:$0xff] }
 0x1ae   :  { %3304 = vmatpush1.bf16.msra.mxu0 %v3303_v6  ;;  %v709_v6 = vrot.slane %v655_v61, %v667_v35 }
 0x1af   :  { %3306 = vmatprep.subr.bf16.mxu0 %v3305_v9  ;;  %v3341_v9 = vpack.c.bf16 %v1769_v3, %v1767_v2 }
 0x1b2   :  { %3308 = vmatpush1.bf16.msra.mxu0 %v3307_v13 }
 0x1b3   :  { %3310 = vmatprep.subr.bf16.mxu0 %v3309_v16 }
 0x1b6   :  { %3312 = vmatpush1.bf16.msra.mxu0 %v3311_v20 }
 0x1b7   :  { %3314 = vmatprep.subr.bf16.mxu0 %v3313_v25 }
 0x1ba   :  { %3316 = vmatpush1.bf16.msra.mxu0 %v3315_v28  ;;  %v713_v28 = vrot.slane %v655_v61, %v671_v23  ;;  %v3795_v61 = vmov 1326507024  }
 0x1bb   :  { %3318 = vmatprep.subr.bf16.mxu0 %v3317_v31 }
 0x1be   :  { %3320 = vmatpush1.bf16.msra.mxu0 %v3319_v34 }
 0x1bf   :  { %3322 = vmatprep.subr.bf16.mxu0 %v3321_v38 }
 0x1c2   :  { %3324 = vmatpush1.bf16.msra.mxu0 %v3323_v40 }
 0x1c3   :  { %3326 = vmatprep.subr.bf16.mxu0 %v3325_v44  ;;  %v3790_v44 = vmov 683565275  }
 0x1c6   :  { %3328 = vmatpush1.bf16.msra.mxu0 %v3327_v48 }
 0x1c7   :  { %3330 = vmatprep.subr.bf16.mxu0 %v3329_v49 }
 0x1ca   :  { %3332 = vmatpush1.bf16.msra.mxu0 %v3331_v54  ;;  %v3793_v54 = vmov 2102212464  }
 0x1cb   :  { %3334 = vmatprep.subr.bf16.mxu0 %v3333_v55 }
 0x1ce   :  { %3336 = vmatpush1.bf16.msra.mxu0 %v3335_v62 }
 0x1cf   :  { %3338 = vmatprep.subr.bf16.mxu0 %v3337_v63 }
 0x1d2   :  { %3340 = vmatpush1.bf16.msra.mxu0 %v3339_v8 }
 0x1d3   :  { %3342 = vmatprep.subr.bf16.mxu0 %v3341_v9 }
 0x268   :  { %v997_v10 = vpop.f32.mrb[0].mxu0 }
 0x269   :  { %v3995_v12 = vadd.f32 %v997_v10, %v701_v4  ;;  %v1281_v13 = vpop.f32.mrb[0].mxu1  ;;  %v999_v14 = vpop.f32.mrb[1].mxu0 }
 0x26a   :  { %v3997_v15 = vadd.f32 %v1281_v13, %v709_v6  ;;  %v3999_v16 = vadd.f32 %v999_v14, %v705_v7  ;;  %v1283_v17 = vpop.f32.mrb[1].mxu1 }
 0x26b   :  { %v1286_v18 = vand.u32 2147483647, %v3995_v12  ;;  %v1289_v35 = vand.u32 2139095040, %v3995_v12  ;;  %v4009_v36 = vadd.f32 %v1283_v17, %v713_v28 }
 0x26c   :  { %v1497_v20 = vand.u32 2139095040, %v3997_v15  ;;  %v1393_v26 = vand.u32 2139095040, %v3999_v16  ;;  %v1494_v40 = vand.u32 2147483647, %v3997_v15  ;;  %v1390_v5 = vand.u32 2147483647, %v3999_v16 }
 0x26d   :  { %v1290_v21 = vshrl.u32 %v1289_v35, 23  ;;  %v1293_v22 = vand.u32 8388607, %v1286_v18  ;;  %v1601_v43 = vand.u32 2139095040, %v4009_v36 }
 0x26e   :  { %v1498_v25 = vshrl.u32 %v1497_v20, 23  ;;  %v1394_v30 = vshrl.u32 %v1393_v26, 23 }
 0x26f   :  { %v2598_v27 = vadd.s32 4294967169, %v1290_v21  ;;  %v1294_v32 = vor.u32 8388608, %v1293_v22 }
 0x270   :  { %v2606_v29 = vadd.s32 4294967169, %v1498_v25  ;;  %v2602_v34 = vadd.s32 4294967169, %v1394_v30 }
 0x271   :  { %v1296_v31 = vadd.s32 1, %v2598_v27  ;;  %v4011_v24 = vshll.u32 %v1294_v32, 8 }
 0x272   :  { %v1504_v33 = vadd.s32 1, %v2606_v29  ;;  %v4015_v42 = vadd.s32 1, %v2602_v34 }
 0x273   :  { %vm1297_vm0 = vcmp.gt.s32.totalorder %v1296_v31, 0 }
 0x274   :  { %v1298_v37 = vsel %vm1297_vm0, %v1296_v31, 0  ;;  %vm1505_vm1 = vcmp.gt.s32.totalorder %v1504_v33, 0  ;;  %vm1401_vm8 = vcmp.gt.s32.totalorder %v4015_v42, 0 }
 0x275   :  { %v1300_v38 = vand.u32 31, %v1298_v37  ;;  %v1506_v39 = vsel %vm1505_vm1, %v1504_v33, 0  ;;  %v1299_v23 = vshrl.u32 %v1298_v37, 5 }
 0x276   :  { %v4020_v48 = vshrl.u32 %v1506_v39, 5  ;;  %v1508_v49 = vand.u32 31, %v1506_v39 }
 0x277   :  { %v1301_v41 = vsub.s32 32, %v1300_v38  ;;  %v1303_v45 = vshll.u32 %v3790_v44, %v1300_v38  ;;  %v1306_v47 = vshll.u32 %v3791_v46, %v1300_v38  ;;  %v1309_v53 = vshll.u32 %v3792_v51, %v1300_v38 }
 0x278   :  { %v1312_v57 = vshll.u32 %v3793_v54, %v1300_v38  ;;  %v1315_v60 = vshll.u32 %v3794_v58, %v1300_v38  ;;  %vm1318_vm2 = vcmp.lt.s32.totalorder %v1299_v23, 1  ;;  %vm1321_vm3 = vcmp.lt.s32.totalorder %v1299_v23, 4 }
 0x279   :  { %v1304_v50 = vshrl.u32 %v3791_v46, %v1301_v41  ;;  %v1307_v52 = vshrl.u32 %v3792_v51, %v1301_v41  ;;  %v1310_v55 = vshrl.u32 %v3793_v54, %v1301_v41  ;;  %v1313_v59 = vshrl.u32 %v3794_v58, %v1301_v41 }
 0x27a   :  { %v1316_v62 = vshrl.u32 %v3795_v61, %v1301_v41  ;;  %v4030_v4 = vsub.s32 32, %v1508_v49  ;;  %v1302_v6 = vshrl.u32 %v3790_v44, %v1301_v41  ;;  %vm1319_vm4 = vcmp.lt.s32.totalorder %v1299_v23, 2 }
 0x27b   :  { %v1305_v63 = vor.u32 %v1304_v50, %v1303_v45  ;;  %v1308_v0 = vor.u32 %v1307_v52, %v1306_v47  ;;  %v1311_v1 = vor.u32 %v1310_v55, %v1309_v53  ;;  %v1314_v2 = vor.u32 %v1313_v59, %v1312_v57 }
 0x27c   :  { %v1317_v3 = vor.u32 %v1316_v62, %v1315_v60  ;;  %vm1320_vm5 = vcmp.lt.s32.totalorder %v1299_v23, 3  ;;  %v1512_v25 = vshrl.u32 %v3791_v46, %v4030_v4  ;;  %v1515_v26 = vshrl.u32 %v3792_v51, %v4030_v4 }
 0x27d   :  { %v1323_v7 = vsel %vm1321_vm3, %v1311_v1, 2102212464  ;;  %v1326_v8 = vsel %vm1318_vm2, %v1305_v63, %v1308_v0  ;;  %v1330_v9 = vsel %vm1318_vm2, %v1308_v0, %v1311_v1  ;;  %v1327_v10 = vsel %vm1321_vm3, %v1314_v2, 920167782 }
 0x27e   :  { %v1331_v13 = vsel %vm1321_vm3, %v1317_v3, 1326507024  ;;  %v1322_v14 = vsel %vm1318_vm2, %v1302_v6, %v1305_v63  ;;  %v1324_v17 = vsel %vm1320_vm5, %v1308_v0, %v1323_v7  ;;  %v1328_v35 = vsel %vm1320_vm5, %v1311_v1, %v1327_v10 }
 0x27f   :  { %v1332_v20 = vsel %vm1320_vm5, %v1314_v2, %v1331_v13  ;;  %v1329_v21 = vsel %vm1319_vm4, %v1326_v8, %v1328_v35  ;;  %v1325_v31 = vsel %vm1319_vm4, %v1322_v14, %v1324_v17  ;;  %v1511_v32 = vshll.u32 %v3790_v44, %v1508_v49 }
 0x280   :  { %v1333_v22 = vsel %vm1319_vm4, %v1330_v9, %v1332_v20  ;;  %v4042_v29 = vmul.u32.u64.low %v4011_v24, %v1329_v21  ;;  %v4043_v30 = vmul.u32.u64.high %v4011_v24, %v1329_v21, %v4042_v29  ;;  %v1514_v33 = vshll.u32 %v3791_v46, %v1508_v49 }
 0x281   :  { %v4038_v27 = vmul.u32.u64.low %v4011_v24, %v1333_v22  ;;  %v4039_v28 = vmul.u32.u64.high %v4011_v24, %v1333_v22, %v4038_v27  ;;  %v1518_v34 = vshrl.u32 %v3793_v54, %v4030_v4  ;;  %v1517_v37 = vshll.u32 %v3792_v51, %v1508_v49 }
 0x282   :  { %v1520_v38 = vshll.u32 %v3793_v54, %v1508_v49  ;;  %v1521_v39 = vshrl.u32 %v3794_v58, %v4030_v4  ;;  %v1524_v23 = vshrl.u32 %v3795_v61, %v4030_v4  ;;  %v1501_v41 = vand.u32 8388607, %v1494_v40 }
 0x283   :  { %v4058_v45 = vor.u32 %v1512_v25, %v1511_v32  ;;  %v4060_v47 = vor.u32 %v1515_v26, %v1514_v33  ;;  %v1523_v50 = vshll.u32 %v3794_v58, %v1508_v49  ;;  %vm1343_vm6 = vc.u32 %v4039_v28, %v4042_v29 }
 0x284   :  { %v1344_v52 = vadd.s32 1, %v4043_v30  ;;  %v4066_v53 = vor.u32 %v1518_v34, %v1517_v37  ;;  %v1522_v55 = vor.u32 %v1521_v39, %v1520_v38  ;;  %v1341_v57 = vmul.u32 %v4011_v24, %v1325_v31 }
 0x285   :  { %vm1529_vm7 = vcmp.lt.s32.totalorder %v4020_v48, 4  ;;  %v1397_v59 = vand.u32 8388607, %v1390_v5  ;;  %v1525_v49 = vor.u32 %v1524_v23, %v1523_v50  ;;  %v1602_v63 = vshrl.u32 %v1601_v43, 23 }
 0x286   :  { %v1345_v60 = vsel %vm1343_vm6, %v1344_v52, %v4043_v30  ;;  %v1535_v62 = vsel %vm1529_vm7, %v1522_v55, 920167782  ;;  %vm1526_vm9 = vcmp.lt.s32.totalorder %v4020_v48, 1  ;;  %vm1528_vm10 = vcmp.lt.s32.totalorder %v4020_v48, 3 }
 0x287   :  { %v1346_v0 = vadd.s32 %v1345_v60, %v1341_v57  ;;  %v1502_v24 = vor.u32 8388608, %v1501_v41  ;;  %v1534_v1 = vsel %vm1526_vm9, %v4058_v45, %v4060_v47  ;;  %v1536_v2 = vsel %vm1528_vm10, %v4066_v53, %v1535_v62 }
 0x288   :  { %v1402_v3 = vsel %vm1401_vm8, %v4015_v42, 0  ;;  %v1398_v7 = vor.u32 8388608, %v1397_v59  ;;  %vm1527_vm11 = vcmp.lt.s32.totalorder %v4020_v48, 2  ;;  %v1539_v43 = vsel %vm1529_vm7, %v1525_v49, 1326507024 }
 0x289   :  { %v1347_v6 = vadd.s32 536870912, %v1346_v0  ;;  %v2610_v8 = vadd.s32 4294967169, %v1602_v63  ;;  %v4095_v10 = vsel %vm1527_vm11, %v1534_v1, %v1536_v2  ;;  %v1403_v13 = vshrl.u32 %v1402_v3, 5 }
 0x28a   :  { %v1404_v14 = vand.u32 31, %v1402_v3  ;;  %v4097_v17 = vshll.u32 %v1502_v24, 8  ;;  %v1598_v42 = vand.u32 2147483647, %v4009_v36  ;;  %v1538_v20 = vsel %vm1526_vm9, %v4060_v47, %v4066_v53 }
 0x28b   :  { %v4091_v9 = vshrl.u32 %v1347_v6, 30  ;;  %v4105_v22 = vshll.u32 %v1398_v7, 8  ;;  %v1540_v25 = vsel %vm1528_vm10, %v1522_v55, %v1539_v43  ;;  %v1608_v30 = vadd.s32 1, %v2610_v8 }
 0x28c   :  { %v1405_v21 = vsub.s32 32, %v1404_v14  ;;  %v4111_v26 = vmul.u32.u64.low %v4097_v17, %v4095_v10  ;;  %v4112_v27 = vmul.u32.u64.high %v4097_v17, %v4095_v10, %v4111_v26  ;;  %v1407_v32 = vshll.u32 %v3790_v44, %v1404_v14 }
 0x28d   :  { %v1349_v35 = vshll.u32 %v4091_v9, 30  ;;  %vm1422_vm12 = vcmp.lt.s32.totalorder %v1403_v13, 1  ;;  %v1410_v34 = vshll.u32 %v3791_v46, %v1404_v14  ;;  %v1413_v38 = vshll.u32 %v3792_v51, %v1404_v14 }
 0x28e   :  { %v1408_v33 = vshrl.u32 %v3791_v46, %v1405_v21  ;;  %v1411_v37 = vshrl.u32 %v3792_v51, %v1405_v21  ;;  %v1414_v39 = vshrl.u32 %v3793_v54, %v1405_v21  ;;  %v1416_v50 = vshll.u32 %v3793_v54, %v1404_v14 }
 0x28f   :  { %v4115_v31 = vsub.s32 %v1346_v0, %v1349_v35  ;;  %v1417_v52 = vshrl.u32 %v3794_v58, %v1405_v21  ;;  %v1419_v59 = vshll.u32 %v3794_v58, %v1404_v14  ;;  %v1420_v60 = vshrl.u32 %v3795_v61, %v1405_v21 }
 0x290   :  { %v1409_v41 = vor.u32 %v1408_v33, %v1407_v32  ;;  %v1412_v55 = vor.u32 %v1411_v37, %v1410_v34  ;;  %v1415_v57 = vor.u32 %v1414_v39, %v1413_v38  ;;  %vm1423_vm13 = vcmp.lt.s32.totalorder %v1403_v13, 2 }
 0x291   :  { %v1352_v23 = vsub.s32 0, %v4115_v31  ;;  %v1418_v62 = vor.u32 %v1417_v52, %v1416_v50  ;;  %vm1425_vm14 = vcmp.lt.s32.totalorder %v1403_v13, 4  ;;  %v1406_v63 = vshrl.u32 %v3790_v44, %v1405_v21 }
 0x292   :  { %v1421_v0 = vor.u32 %v1420_v60, %v1419_v59  ;;  %v1427_v24 = vsel %vm1425_vm14, %v1415_v57, 2102212464  ;;  %v1430_v1 = vsel %vm1422_vm12, %v1409_v41, %v1412_v55  ;;  %vm1424_vm15 = vcmp.lt.s32.totalorder %v1403_v13, 3 }
 0x293   :  { %v2599_v49 = vmin.u32 %v1352_v23, %v4115_v31  ;;  %v1431_v3 = vsel %vm1425_vm14, %v1418_v62, 920167782  ;;  %v1434_v6 = vsel %vm1422_vm12, %v1412_v55, %v1415_v57  ;;  %v1426_v7 = vsel %vm1422_vm12, %v1406_v63, %v1409_v41 }
 0x294   :  { %v1432_v43 = vsel %vm1424_vm15, %v1415_v57, %v1431_v3  ;;  %v1435_v8 = vsel %vm1425_vm14, %v1421_v0, 1326507024  ;;  %vm1609_vm0 = vcmp.gt.s32.totalorder %v1608_v30, 0  ;;  %v1428_v14 = vsel %vm1424_vm15, %v1412_v55, %v1427_v24 }
 0x295   :  { %v1354_v2 = vclz %v2599_v49  ;;  %v1433_v35 = vsel %vm1423_vm13, %v1430_v1, %v1432_v43  ;;  %v1436_v32 = vsel %vm1424_vm15, %v1418_v62, %v1435_v8  ;;  %v1541_v21 = vsel %vm1527_vm11, %v1538_v20, %v1540_v25 }
 0x296   :  { %v1437_v33 = vsel %vm1423_vm13, %v1434_v6, %v1436_v32  ;;  %v4138_v34 = vmul.u32.u64.low %v4105_v22, %v1433_v35  ;;  %v4139_v37 = vmul.u32.u64.high %v4105_v22, %v1433_v35, %v4138_v34  ;;  %v1610_v23 = vsel %vm1609_vm0, %v1608_v30, 0 }
 0x297   :  { %v2600_v10 = vadd.s32 4294967294, %v1354_v2  ;;  %v4143_v38 = vmul.u32.u64.low %v4105_v22, %v1437_v33  ;;  %v4144_v39 = vmul.u32.u64.high %v4105_v22, %v1437_v33, %v4143_v38  ;;  %v1429_v50 = vsel %vm1423_vm13, %v1426_v7, %v1428_v14 }
 0x298   :  { %v1612_v52 = vand.u32 31, %v1610_v23  ;;  %v1510_v20 = vshrl.u32 %v3790_v44, %v4030_v4  ;;  %v1531_v25 = vsel %vm1529_vm7, %v4066_v53, 2102212464  ;;  %v1448_v60 = vadd.s32 1, %v4139_v37 }
 0x299   :  { %vm2601_vm1 = vcmp.lt.s32.totalorder %v2600_v10, 0  ;;  %v4153_v57 = vmul.u32.u64.low %v4097_v17, %v1541_v21  ;;  %v4154_v59 = vmul.u32.u64.high %v4097_v17, %v1541_v21, %v4153_v57  ;;  %v1605_v30 = vand.u32 8388607, %v1598_v42 }
 0x29a   :  { %v1357_v41 = vsel %vm2601_vm1, 0, %v2600_v10  ;;  %v1530_v49 = vsel %vm1526_vm9, %v1510_v20, %v4058_v45  ;;  %v1445_v4 = vmul.u32 %v4105_v22, %v1429_v50  ;;  %vm1447_vm2 = vc.u32 %v4144_v39, %v4138_v34 }
 0x29b   :  { %v1362_v55 = vsub.s32 4294967266, %v1357_v41  ;;  %v1358_v53 = vsub.s32 32, %v1357_v41  ;;  %v1532_v62 = vsel %vm1528_vm10, %v4060_v47, %v1531_v25  ;;  %v1449_v63 = vsel %vm1447_vm2, %v1448_v60, %v4139_v37 }
 0x29c   :  { %v1613_v0 = vsub.s32 32, %v1612_v52  ;;  %v1450_v24 = vadd.s32 %v1449_v63, %v1445_v4  ;;  %v1342_v1 = vadd.s32 %v4042_v29, %v4039_v28  ;;  %v1533_v45 = vsel %vm1527_vm11, %v1530_v49, %v1532_v62 }
 0x29d   :  { %v1363_v13 = vadd.s32 127, %v1362_v55  ;;  %v1606_v3 = vor.u32 8388608, %v1605_v30  ;;  %v1552_v7 = vadd.s32 1, %v4112_v27  ;;  %v1611_v10 = vshrl.u32 %v1610_v23, 5 }
 0x29e   :  { %v1451_v22 = vadd.s32 536870912, %v1450_v24  ;;  %v1360_v6 = vshrl.u32 %v1342_v1, %v1358_v53  ;;  %v1616_v43 = vshrl.u32 %v3791_v46, %v1613_v0  ;;  %v1619_v47 = vshrl.u32 %v3792_v51, %v1613_v0 }
 0x29f   :  { %v1364_v2 = vshll.u32 %v1363_v13, 23  ;;  %v1622_v14 = vshrl.u32 %v3793_v54, %v1613_v0  ;;  %v1625_v28 = vshrl.u32 %v3794_v58, %v1613_v0  ;;  %v1359_v29 = vshll.u32 %v4115_v31, %v1357_v41 }
 0x2a0   :  { %v4176_v8 = vshrl.u32 %v1451_v22, 30  ;;  %v1615_v35 = vshll.u32 %v3790_v44, %v1612_v52  ;;  %v1618_v32 = vshll.u32 %v3791_v46, %v1612_v52  ;;  %v1621_v33 = vshll.u32 %v3792_v51, %v1612_v52 }
 0x2a1   :  { %v1365_v48 = vor.u32 4788187, %v1364_v2  ;;  %v1624_v37 = vshll.u32 %v3793_v54, %v1612_v52  ;;  %v1628_v38 = vshrl.u32 %v3795_v61, %v1613_v0  ;;  %v1361_v23 = vor.u32 %v1360_v6, %v1359_v29 }
 0x2a2   :  { %v1453_v21 = vshll.u32 %v4176_v8, 30  ;;  %vm1551_vm3 = vc.u32 %v4154_v59, %v4111_v26  ;;  %v1617_v50 = vor.u32 %v1616_v43, %v1615_v35  ;;  %v1620_v55 = vor.u32 %v1619_v47, %v1618_v32 }
 0x2a3   :  { %v1623_v41 = vor.u32 %v1622_v14, %v1621_v33  ;;  %v1626_v20 = vor.u32 %v1625_v28, %v1624_v37  ;;  %v1627_v25 = vshll.u32 %v3794_v58, %v1612_v52  ;;  %v1366_v57 = vand.u32 2147483647, %v1365_v48 }
 0x2a4   :  { %v1454_v31 = vsub.s32 %v1450_v24, %v1453_v21  ;;  %v1549_v60 = vmul.u32 %v4097_v17, %v1533_v45  ;;  %v1646_v30 = vshll.u32 %v1606_v3, 8  ;;  %v1553_v13 = vsel %vm1551_vm3, %v1552_v7, %v4112_v27 }
 0x2a5   :  { %v1629_v4 = vor.u32 %v1628_v38, %v1627_v25  ;;  %vm1630_vm4 = vcmp.lt.s32.totalorder %v1611_v10, 1  ;;  %v1368_v53 = vcvt.s32.f32 %v1361_v23  ;;  %v1614_v62 = vshrl.u32 %v3790_v44, %v1613_v0 }
 0x2a6   :  { %v1456_v49 = vsub.s32 0, %v1454_v31  ;;  %vm1633_vm5 = vcmp.lt.s32.totalorder %v1611_v10, 4  ;;  %v1638_v63 = vsel %vm1630_vm4, %v1617_v50, %v1620_v55  ;;  %vm1632_vm6 = vcmp.lt.s32.totalorder %v1611_v10, 3 }
 0x2a7   :  { %v1635_v24 = vsel %vm1633_vm5, %v1623_v41, 2102212464  ;;  %v1639_v2 = vsel %vm1633_vm5, %v1626_v20, 920167782  ;;  %v1369_v22 = vmul.f32 %v1368_v53, %v1366_v57  ;;  %vm1631_vm7 = vcmp.lt.s32.totalorder %v1611_v10, 2 }
 0x2a8   :  { %v2603_v1 = vmin.u32 %v1456_v49, %v1454_v31  ;;  %v1640_v52 = vsel %vm1632_vm6, %v1623_v41, %v1639_v2  ;;  %v1642_v6 = vsel %vm1630_vm4, %v1620_v55, %v1623_v41  ;;  %v1634_v45 = vsel %vm1630_vm4, %v1614_v62, %v1617_v50 }
 0x2a9   :  { %v1641_v27 = vsel %vm1631_vm7, %v1638_v63, %v1640_v52  ;;  %v1643_v3 = vsel %vm1633_vm5, %v1629_v4, 1326507024  ;;  %v1636_v7 = vsel %vm1632_vm6, %v1620_v55, %v1635_v24  ;;  %v1554_v0 = vadd.s32 %v1553_v13, %v1549_v60 }
 0x2aa   :  { %v1458_v17 = vclz %v2603_v1  ;;  %v1644_v43 = vsel %vm1632_vm6, %v1626_v20, %v1643_v3  ;;  %v4194_v47 = vmul.u32.u64.low %v1646_v30, %v1641_v27  ;;  %v4195_v14 = vmul.u32.u64.high %v1646_v30, %v1641_v27, %v4194_v47 }
 0x2ab   :  { %v1645_v29 = vsel %vm1631_vm7, %v1642_v6, %v1644_v43  ;;  %v1637_v32 = vsel %vm1631_vm7, %v1634_v45, %v1636_v7  ;;  %v1370_v21 = vxor.u32 2147483648, %v1369_v22  ;;  %v1555_v38 = vadd.s32 536870912, %v1554_v0 }
 0x2ac   :  { %v2604_v28 = vadd.s32 4294967294, %v1458_v17  ;;  %v4199_v48 = vmul.u32.u64.low %v1646_v30, %v1645_v29  ;;  %v4200_v35 = vmul.u32.u64.high %v1646_v30, %v1645_v29, %v4199_v48  ;;  %v1656_v37 = vadd.s32 1, %v4195_v14 }
 0x2ad   :  { %v1446_v23 = vadd.s32 %v4138_v34, %v4144_v39  ;;  %vm1288_vm9 = vcmp.lt.s32.totalorder %v3995_v12, 0  ;;  %v1653_v41 = vmul.u32 %v1646_v30, %v1637_v32  ;;  %v4212_v49 = vshrl.u32 %v1555_v38, 30 }
 0x2ae   :  { %vm2605_vm8 = vcmp.lt.s32.totalorder %v2604_v28, 0  ;;  %vm1655_vm10 = vc.u32 %v4200_v35, %v4194_v47  ;;  %v1371_v60 = vsel %vm1288_vm9, %v1370_v21, %v1369_v22  ;;  %vm4216_vm11 = vcmp.le.f32.partialorder %v1286_v18, 0.7853982 }
 0x2af   :  { %v1461_v33 = vsel %vm2605_vm8, 0, %v2604_v28  ;;  %v1657_v57 = vsel %vm1655_vm10, %v1656_v37, %v4195_v14  ;;  %v1372_v63 = vsub.s32 4, %v4091_v9  ;;  %v1557_v1 = vshll.u32 %v4212_v49, 30 }
 0x2b0   :  { %v1462_v50 = vsub.s32 32, %v1461_v33  ;;  %v1466_v55 = vsub.s32 4294967266, %v1461_v33  ;;  %v1463_v20 = vshll.u32 %v1454_v31, %v1461_v33  ;;  %v1658_v13 = vadd.s32 %v1657_v57, %v1653_v41 }
 0x2b1   :  { %v1374_v31 = vsel %vm4216_vm11, %v3995_v12, %v1371_v60  ;;  %v1476_v52 = vsub.s32 4, %v4176_v8  ;;  %v1373_v17 = vsel %vm1288_vm9, %v1372_v63, %v4091_v9  ;;  %v4232_v45 = vsub.s32 %v1554_v0, %v1557_v1 }
 0x2b2   :  { %v1464_v25 = vshrl.u32 %v1446_v23, %v1462_v50  ;;  %v1467_v10 = vadd.s32 127, %v1466_v55  ;;  %v1659_v4 = vadd.s32 536870912, %v1658_v13  ;;  %3556 = vsinq.f32 %v1374_v31 }
 0x2b3   :  { %3558 = vcosq.f32 %v1374_v31  ;;  %vm1392_vm12 = vcmp.lt.s32.totalorder %v3999_v16, 0  ;;  %vm1391_vm13 = vcmp.le.f32.partialorder %v1390_v5, 0.7853982  ;;  %v1375_v14 = vsel %vm4216_vm11, 0, %v1373_v17 }
 0x2b4   :  { %v1465_v34 = vor.u32 %v1464_v25, %v1463_v20  ;;  %v1468_v39 = vshll.u32 %v1467_v10, 23  ;;  %v4223_v62 = vshrl.u32 %v1659_v4, 30  ;;  %v1477_v43 = vsel %vm1392_vm12, %v1476_v52, %v4176_v8  ;;  %v1771_v52 = vld [vmem:[#allocation9 + $0x228] sm:$0xff] }
 0x2b5   :  { %v1560_v9 = vsub.s32 0, %v4232_v45  ;;  %v1479_v48 = vsel %vm1391_vm13, 0, %v1477_v43  ;;  %v1379_v32 = vadd.s32 3, %v1375_v14  ;;  %v1654_v55 = vadd.s32 %v4194_v47, %v4200_v35 }
 0x2b6   :  { %v1469_v53 = vor.u32 4788187, %v1468_v39  ;;  %v1472_v2 = vcvt.s32.f32 %v1465_v34  ;;  %v1661_v18 = vshll.u32 %v4223_v62, 30  ;;  %v1483_v38 = vadd.s32 3, %v1479_v48 }
 0x2b7   :  { %v2607_v5 = vmin.u32 %v1560_v9, %v4232_v45  ;;  %v1380_v8 = vand.u32 3, %v1379_v32  ;;  %vm1482_vm5 = vweird.f32 %v3999_v16  ;;  %vm1378_vm6 = vweird.f32 %v3995_v12  ;;  %v1770_v9 = vld [vmem:[#allocation9 + $0x220] sm:$0xff] }
 0x2b8   :  { %v1470_v24 = vand.u32 2147483647, %v1469_v53  ;;  %v1662_v6 = vsub.s32 %v1658_v13, %v1661_v18  ;;  %v1484_v57 = vand.u32 3, %v1483_v38  ;;  %vm1600_vm8 = vcmp.lt.s32.totalorder %v4009_v36, 0 }
 0x2b9   :  { %v1562_v10 = vclz %v2607_v5  ;;  %vm1382_vm15 = vcmp.eq.s32.totalorder %v1380_v8, 0  ;;  %vm1385_vm0 = vcmp.eq.s32.totalorder %v1380_v8, 2  ;;  %vm1381_vm3 = vcmp.lt.s32.totalorder %v1380_v8, 2  ;;  %v1774_v8 = vld [vmem:[#allocation9 + $0x240] sm:$0xff] }
 0x2ba   :  { %v1473_v22 = vmul.f32 %v1472_v2, %v1470_v24  ;;  %v1664_v3 = vsub.s32 0, %v1662_v6  ;;  %v1766_v24 = vld [vmem:[#allocation9 + $0x200] sm:$0xff]  ;;  %v1768_v2 = vld [vmem:[#allocation9 + $0x210] sm:$0xff]  ;;  %vm1489_vm1 = vcmp.eq.s32.totalorder %v1484_v57, 2  ;;  %vm1486_vm2 = vcmp.eq.s32.totalorder %v1484_v57, 0 }
 0x2bb   :  { %v2608_v47 = vadd.s32 4294967294, %v1562_v10  ;;  %vm1485_vm4 = vcmp.lt.s32.totalorder %v1484_v57, 2  ;;  %vm4253_vm9 = vcmp.le.f32.partialorder %v1598_v42, 0.7853982 }
 0x2bc   :  { %v1474_v27 = vxor.u32 2147483648, %v1473_v22  ;;  %v2611_v28 = vmin.u32 %v1664_v3, %v1662_v6  ;;  %v3557_v21 = vpop.eup %3556  ;;  %v3343_v3 = vpack.c.bf16 %v1768_v2, %v1766_v24  ;;  %v1784_v24 = vld [vmem:[#allocation9 + $0x290] sm:$0xff] }
 0x2bd   :  { %v3559_v37 = vpop.eup %3558  ;;  %v1383_v50 = vxor.u32 2147483648, %v3557_v21  ;;  %vm2609_vm7 = vcmp.lt.s32.totalorder %v2608_v47, 0 }
 0x2be   :  { %v1475_v7 = vsel %vm1392_vm12, %v1474_v27, %v1473_v22  ;;  %v1666_v0 = vclz %v2611_v28  ;;  %v1386_v25 = vxor.u32 2147483648, %v3559_v37 }
 0x2bf   :  { %v1478_v29 = vsel %vm1391_vm13, %v3999_v16, %v1475_v7  ;;  %v1384_v30 = vsel %vm1382_vm15, %v3559_v37, %v1383_v50  ;;  %v1777_v37 = vld [vmem:[#allocation9 + $0x258] sm:$0xff]  ;;  %v4248_v16 = vsel %vm2609_vm7, 0, %v2608_v47  ;;  %v1787_v47 = vld [vmem:[#allocation9 + $0x2a8] sm:$0xff]  ;;  %vm1690_vm13 = vweird.f32 %v4009_v36 }
 0x2c0   :  { %3560 = vcosq.f32 %v1478_v29  ;;  %v2612_v33 = vadd.s32 4294967294, %v1666_v0  ;;  %v1387_v1 = vsel %vm1385_vm0, %v1386_v25, %v3557_v21  ;;  %v1772_v0 = vld [vmem:[#allocation9 + $0x230] sm:$0xff]  ;;  %v1684_v21 = vsub.s32 4, %v4223_v62  ;;  %v1781_v25 = vld [vmem:[#allocation9 + $0x278] sm:$0xff] }
 0x2c1   :  { %3562 = vsinq.f32 %v1478_v29  ;;  %v1388_v27 = vsel %vm1381_vm3, %v1384_v30, %v1387_v1  ;;  %v3347_v38 = vpack.c.bf16 %v1772_v0, %v1770_v9  ;;  %v1570_v57 = vsub.s32 4294967266, %v4248_v16  ;;  %v1785_v30 = vld [vmem:[#allocation9 + $0x298] sm:$0xff]  ;;  %v1782_v1 = vld [vmem:[#allocation9 + $0x280] sm:$0xff] }
 0x2c2   :  { %vm2613_vm14 = vcmp.lt.s32.totalorder %v2612_v33, 0  ;;  %v1389_v32 = vsel %vm1378_vm6, nan, %v1388_v27  ;;  %v1566_v2 = vsub.s32 32, %v4248_v16  ;;  %v1786_v27 = vld [vmem:[#allocation9 + $0x2a0] sm:$0xff]  ;;  %v1567_v9 = vshll.u32 %v4232_v45, %v4248_v16 }
 0x2c3   :  { %v1669_v23 = vsel %vm2613_vm14, 0, %v2612_v33  ;;  %v1775_v33 = vld [vmem:[#allocation9 + $0x248] sm:$0xff]  ;;  %vm1496_vm14 = vcmp.lt.s32.totalorder %v3997_v15, 0  ;;  %vm4275_vm15 = vcmp.le.f32.partialorder %v1494_v40, 0.7853982  ;;  %v1817_v40 = vld [vmem:[#allocation9 + $0x398] sm:$0xff]  ;;  %vm1586_vm3 = vweird.f32 %v3997_v15 }
 0x2c4   :  { %v1670_v41 = vsub.s32 32, %v1669_v23  ;;  %v1674_v20 = vsub.s32 4294967266, %v1669_v23  ;;  %v1671_v60 = vshll.u32 %v1662_v6, %v1669_v23  ;;  %v1773_v6 = vld [vmem:[#allocation9 + $0x238] sm:$0xff]  ;;  %v3349_v12 = vpack.c.bf16 %v1777_v37, %v1775_v33  ;;  %v1776_v23 = vld [vmem:[#allocation9 + $0x250] sm:$0xff]  ;;  %v1790_v33 = vld [vmem:[#allocation9 + $0x2c0] sm:$0xff] }
 0x2c5   :  { %v3345_v29 = vpack.c.bf16 %v1773_v6, %v1771_v52  ;;  %v3359_v6 = vpack.c.bf16 %v1784_v24, %v1782_v1  ;;  %v1792_v37 = vld [vmem:[#allocation9 + $0x2d0] sm:$0xff]  ;;  %v1807_v1 = vld [vmem:[#allocation9 + $0x348] sm:$0xff]  ;;  %v1809_v24 = vld [vmem:[#allocation9 + $0x358] sm:$0xff] }
 0x2c6   :  { %v1672_v13 = vshrl.u32 %v1654_v55, %v1670_v41  ;;  %v1675_v34 = vadd.s32 127, %v1674_v20  ;;  %v1685_v41 = vsel %vm1600_vm8, %v1684_v21, %v4223_v62  ;;  %v1779_v20 = vld [vmem:[#allocation9 + $0x268] sm:$0xff] }
 0x2c7   :  { %v3353_v42 = vpack.c.bf16 %v1781_v25, %v1779_v20  ;;  %v1783_v62 = vld [vmem:[#allocation9 + $0x288] sm:$0xff]  ;;  %v1796_v20 = vld [vmem:[#allocation9 + $0x2f0] sm:$0xff] }
 0x2c8   :  { %v1673_v31 = vor.u32 %v1672_v13, %v1671_v60  ;;  %v1676_v53 = vshll.u32 %v1675_v34, 23  ;;  %v3351_v60 = vpack.c.bf16 %v1776_v23, %v1774_v8  ;;  %v1687_v13 = vsel %vm4253_vm9, 0, %v1685_v41  ;;  %v1778_v34 = vld [vmem:[#allocation9 + $0x260] sm:$0xff]  ;;  %v1797_v8 = vld [vmem:[#allocation9 + $0x2f8] sm:$0xff] }
 0x2c9   :  { %v1794_v41 = vld [vmem:[#allocation9 + $0x2e0] sm:$0xff] }
 0x2ca   :  { %v3561_v39 = vpop.eup %3560  ;;  %v1677_v18 = vor.u32 4788187, %v1676_v53  ;;  %v1680_v43 = vcvt.s32.f32 %v1673_v31  ;;  %v1691_v31 = vadd.s32 3, %v1687_v13  ;;  %v3371_v13 = vpack.c.bf16 %v1796_v20, %v1794_v41  ;;  %v1822_v41 = vld [vmem:[#allocation9 + $0x3c0] sm:$0xff]  ;;  %v1824_v20 = vld [vmem:[#allocation9 + $0x3d0] sm:$0xff] }
 0x2cb   :  { %v3563_v4 = vpop.eup %3562  ;;  %v1490_v63 = vxor.u32 2147483648, %v3561_v39 }
 0x2cc   :  { %v1487_v35 = vxor.u32 2147483648, %v3563_v4  ;;  %v1678_v7 = vand.u32 2147483647, %v1677_v18  ;;  %v1550_v18 = vadd.s32 %v4111_v26, %v4154_v59  ;;  %v1692_v52 = vand.u32 3, %v1691_v31 }
 0x2cd   :  { %v1491_v22 = vsel %vm1489_vm1, %v1490_v63, %v3563_v4  ;;  %v1571_v4 = vadd.s32 127, %v1570_v57  ;;  %v3357_v63 = vpack.c.bf16 %v1785_v30, %v1783_v62  ;;  %v1801_v57 = vld [vmem:[#allocation9 + $0x318] sm:$0xff] }
 0x2ce   :  { %v1488_v17 = vsel %vm1486_vm2, %v3561_v39, %v1487_v35  ;;  %v1681_v48 = vmul.f32 %v1680_v43, %v1678_v7  ;;  %v1780_v39 = vld [vmem:[#allocation9 + $0x270] sm:$0xff]  ;;  %v1789_v35 = vld [vmem:[#allocation9 + $0x2b8] sm:$0xff]  ;;  %v1568_v43 = vshrl.u32 %v1550_v18, %v1566_v2  ;;  %vm1697_vm10 = vcmp.eq.s32.totalorder %v1692_v52, 2  ;;  %v1806_v18 = vld [vmem:[#allocation9 + $0x340] sm:$0xff] }
 0x2cf   :  { %v1492_v14 = vsel %vm1485_vm4, %v1488_v17, %v1491_v22  ;;  %v3355_v53 = vpack.c.bf16 %v1780_v39, %v1778_v34  ;;  %v1572_v22 = vshll.u32 %v1571_v4, 23  ;;  %v3361_v17 = vpack.c.bf16 %v1789_v35, %v1787_v47  ;;  %v1798_v34 = vld [vmem:[#allocation9 + $0x300] sm:$0xff]  ;;  %v1803_v39 = vld [vmem:[#allocation9 + $0x328] sm:$0xff]  ;;  %v1805_v62 = vld [vmem:[#allocation9 + $0x338] sm:$0xff] }
 0x2d0   :  { %v1493_v28 = vsel %vm1482_vm5, nan, %v1492_v14  ;;  %v1682_v5 = vxor.u32 2147483648, %v1681_v48  ;;  %v1791_v14 = vld [vmem:[#allocation9 + $0x2c8] sm:$0xff]  ;;  %vm1694_vm11 = vcmp.eq.s32.totalorder %v1692_v52, 0  ;;  %vm1693_vm12 = vcmp.lt.s32.totalorder %v1692_v52, 2 }
 0x2d1   :  { %1906 = vmatprep.mubr.f32.mxu0 %v1493_v28  ;;  %v1793_v28 = vld [vmem:[#allocation9 + $0x2d8] sm:$0xff]  ;;  %v3377_v31 = vpack.c.bf16 %v1805_v62, %v1803_v39  ;;  %v3381_v35 = vpack.c.bf16 %v1809_v24, %v1807_v1  ;;  %v1828_v39 = vld [vmem:[#allocation9 + $0x3f0] sm:$0xff]  ;;  %v2192_v24 = vld [vmem:[#allocation12] sm:$0xff] }
 0x2d2   :  { %1907 = vmatmul.mubr.f32.vlgmr.msra.gmra.mrb[2].mxu0 %v1389_v32  ;;  %v1683_v50 = vsel %vm1600_vm8, %v1682_v5, %v1681_v48  ;;  %v1573_v48 = vor.u32 4788187, %v1572_v22  ;;  %v3365_v21 = vpack.c.bf16 %v1793_v28, %v1791_v14  ;;  %v1569_v5 = vor.u32 %v1568_v43, %v1567_v9  ;;  %v1808_v22 = vld [vmem:[#allocation9 + $0x350] sm:$0xff]  ;;  %v1810_v43 = vld [vmem:[#allocation9 + $0x360] sm:$0xff] }
 0x2d3   :  { %3344 = vmatpush1.bf16.msra.mxu0 %v3343_v3  ;;  %v1686_v10 = vsel %vm4253_vm9, %v4009_v36, %v1683_v50  ;;  %v1788_v3 = vld [vmem:[#allocation9 + $0x2b0] sm:$0xff]  ;;  %v3367_v50 = vpack.c.bf16 %v1792_v37, %v1790_v33  ;;  %v1580_v28 = vsub.s32 4, %v4212_v49 }
 0x2d4   :  { %3346 = vmatprep.subr.bf16.mxu0 %v3345_v29  ;;  %3564 = vcosq.f32 %v1686_v10  ;;  %v3363_v26 = vpack.c.bf16 %v1788_v3, %v1786_v27  ;;  %v1574_v16 = vand.u32 2147483647, %v1573_v48  ;;  %v1576_v25 = vcvt.s32.f32 %v1569_v5  ;;  %v1800_v36 = vld [vmem:[#allocation9 + $0x310] sm:$0xff]  ;;  %v1814_v48 = vld [vmem:[#allocation9 + $0x380] sm:$0xff] }
 0x2d5   :  { %3566 = vsinq.f32 %v1686_v10  ;;  %v1799_v10 = vld [vmem:[#allocation9 + $0x308] sm:$0xff]  ;;  %v3375_v4 = vpack.c.bf16 %v1800_v36, %v1798_v34  ;;  %v3383_v3 = vpack.c.bf16 %v1808_v22, %v1806_v18  ;;  %v1812_v14 = vld [vmem:[#allocation9 + $0x370] sm:$0xff]  ;;  %v1826_v36 = vld [vmem:[#allocation9 + $0x3e0] sm:$0xff] }
 0x2d6   :  { %v3387_v9 = vpack.c.bf16 %v1812_v14, %v1810_v43  ;;  %v3403_v62 = vpack.c.bf16 %v1828_v39, %v1826_v36  ;;  %v2209_v1 = vld [vmem:[#allocation12 + $0x88] sm:$0xff]  ;;  %v2211_v18 = vld [vmem:[#allocation12 + $0x98] sm:$0xff]  ;;  %v2196_v43 = vld [vmem:[#allocation12 + $0x20] sm:$0xff] }
 0x2d7   :  { %3348 = vmatpush1.bf16.msra.mxu0 %v3347_v38  ;;  %v2197_v14 = vld [vmem:[#allocation12 + $0x28] sm:$0xff]  ;;  %v1830_v36 = vld [vmem:[#allocation10] sm:$0x3] }
 0x2d8   :  { %3350 = vmatprep.subr.bf16.mxu0 %v3349_v12  ;;  %v1795_v12 = vld [vmem:[#allocation9 + $0x2e8] sm:$0xff]  ;;  %v1835_v39 = vrot.slane %v1830_v36, %v3971_v11 }
 0x2d9   :  { %v3369_v55 = vpack.c.bf16 %v1797_v8, %v1795_v12  ;;  %v1820_v12 = vld [vmem:[#allocation9 + $0x3b0] sm:$0xff]  ;;  %v1823_v8 = vld [vmem:[#allocation9 + $0x3c8] sm:$0xff] }
 0x2db   :  { %3352 = vmatpush1.bf16.msra.mxu0 %v3351_v60  ;;  %v1577_v60 = vmul.f32 %v1576_v25, %v1574_v16  ;;  %v1827_v25 = vld [vmem:[#allocation9 + $0x3e8] sm:$0xff] }
 0x2dc   :  { %3354 = vmatprep.subr.bf16.mxu0 %v3353_v42  ;;  %v3373_v42 = vpack.c.bf16 %v1801_v57, %v1799_v10  ;;  %v1829_v10 = vld [vmem:[#allocation9 + $0x3f8] sm:$0xff] }
 0x2dd   :  { %v1578_v30 = vxor.u32 2147483648, %v1577_v60  ;;  %v3401_v34 = vpack.c.bf16 %v1829_v10, %v1827_v25  ;;  %v2222_v25 = vld [vmem:[#allocation12 + $0xf0] sm:$0xff]  ;;  %v2223_v10 = vld [vmem:[#allocation12 + $0xf8] sm:$0xff] }
 0x2de   :  { %v3565_v7 = vpop.eup %3564 }
 0x2df   :  { %3356 = vmatpush1.bf16.msra.mxu0 %v3355_v53  ;;  %v3567_v29 = vpop.eup %3566  ;;  %v1698_v0 = vxor.u32 2147483648, %v3565_v7  ;;  %v1802_v53 = vld [vmem:[#allocation9 + $0x320] sm:$0xff]  ;;  %v1579_v2 = vsel %vm1496_vm14, %v1578_v30, %v1577_v60  ;;  %v3399_v60 = vpack.c.bf16 %v1824_v20, %v1822_v41  ;;  %v2205_v20 = vld [vmem:[#allocation12 + $0x68] sm:$0xff] }
 0x2e0   :  { %3358 = vmatprep.subr.bf16.mxu0 %v3357_v63  ;;  %v1695_v32 = vxor.u32 2147483648, %v3567_v29  ;;  %v1804_v63 = vld [vmem:[#allocation9 + $0x330] sm:$0xff]  ;;  %v1582_v27 = vsel %vm4275_vm15, %v3997_v15, %v1579_v2  ;;  %v2204_v41 = vld [vmem:[#allocation12 + $0x60] sm:$0xff] }
 0x2e1   :  { %v1699_v59 = vsel %vm1697_vm10, %v1698_v0, %v3567_v29  ;;  %v3379_v47 = vpack.c.bf16 %v1804_v63, %v1802_v53  ;;  %3568 = vcosq.f32 %v1582_v27  ;;  %v1815_v29 = vld [vmem:[#allocation9 + $0x388] sm:$0xff] }
 0x2e2   :  { %v1696_v38 = vsel %vm1694_vm11, %v3565_v7, %v1695_v32  ;;  %3570 = vsinq.f32 %v1582_v27  ;;  %v3389_v0 = vpack.c.bf16 %v1817_v40, %v1815_v29  ;;  %v1816_v32 = vld [vmem:[#allocation9 + $0x390] sm:$0xff]  ;;  %v2208_v63 = vld [vmem:[#allocation12 + $0x80] sm:$0xff]  ;;  %v2215_v29 = vld [vmem:[#allocation12 + $0xb8] sm:$0xff]  ;;  %v3415_v40 = vpack.c.bf16 %v2197_v14, %v2196_v43 }
 0x2e3   :  { %3360 = vmatpush1.bf16.msra.mxu0 %v3359_v6  ;;  %v1700_v45 = vsel %vm1693_vm12, %v1696_v38, %v1699_v59  ;;  %v1811_v6 = vld [vmem:[#allocation9 + $0x368] sm:$0xff]  ;;  %v3391_v33 = vpack.c.bf16 %v1816_v32, %v1814_v48  ;;  %v1818_v38 = vld [vmem:[#allocation9 + $0x3a0] sm:$0xff]  ;;  %v3405_v2 = vpack.c.bf16 %v2209_v1, %v2208_v63 }
 0x2e4   :  { %3362 = vmatprep.subr.bf16.mxu0 %v3361_v17  ;;  %v1701_v23 = vsel %vm1690_vm13, nan, %v1700_v45  ;;  %v1813_v17 = vld [vmem:[#allocation9 + $0x378] sm:$0xff]  ;;  %v1819_v59 = vld [vmem:[#allocation9 + $0x3a8] sm:$0xff] }
 0x2e5   :  { %1977 = vmatprep.mubr.f32.mxu0 %v1701_v23  ;;  %v3385_v7 = vpack.c.bf16 %v1813_v17, %v1811_v6  ;;  %v1825_v45 = vld [vmem:[#allocation9 + $0x3d8] sm:$0xff]  ;;  %v2212_v27 = vld [vmem:[#allocation12 + $0xa0] sm:$0xff]  ;;  %3406 = vmatprep.subr.bf16.mxu1 %v3405_v2 }
 0x2e6   :  { %v2194_v6 = vld [vmem:[#allocation12 + $0x10] sm:$0xff]  ;;  %v2195_v17 = vld [vmem:[#allocation12 + $0x18] sm:$0xff]  ;;  %v2216_v32 = vld [vmem:[#allocation12 + $0xc0] sm:$0xff] }
 0x2e7   :  { %3364 = vmatpush1.bf16.msra.mxu0 %v3363_v26  ;;  %v1581_v26 = vsel %vm1496_vm14, %v1580_v28, %v4212_v49  ;;  %v3397_v49 = vpack.c.bf16 %v1825_v45, %v1823_v8  ;;  %v2214_v28 = vld [vmem:[#allocation12 + $0xb0] sm:$0xff]  ;;  %v2199_v48 = vld [vmem:[#allocation12 + $0x38] sm:$0xff] }
 0x2e8   :  { %3366 = vmatprep.subr.bf16.mxu0 %v3365_v21  ;;  %v1821_v21 = vld [vmem:[#allocation9 + $0x3b8] sm:$0xff]  ;;  %v1583_v37 = vsel %vm4275_vm15, 0, %v1581_v26  ;;  %v2217_v26 = vld [vmem:[#allocation12 + $0xc8] sm:$0xff] }
 0x2e9   :  { %v3393_v5 = vpack.c.bf16 %v1821_v21, %v1819_v59  ;;  %v1587_v16 = vadd.s32 3, %v1583_v37  ;;  %v3421_v21 = vpack.c.bf16 %v2217_v26, %v2216_v32  ;;  %v2201_v37 = vld [vmem:[#allocation12 + $0x48] sm:$0xff]  ;;  %v2202_v45 = vld [vmem:[#allocation12 + $0x50] sm:$0xff] }
 0x2eb   :  { %3368 = vmatpush1.bf16.msra.mxu0 %v3367_v50  ;;  %v3569_v23 = vpop.eup %3568  ;;  %v3395_v50 = vpack.c.bf16 %v1820_v12, %v1818_v38  ;;  %v1588_v57 = vand.u32 3, %v1587_v16  ;;  %v2219_v38 = vld [vmem:[#allocation12 + $0xd8] sm:$0xff] }
 0x2ec   :  { %3370 = vmatprep.subr.bf16.mxu0 %v3369_v55  ;;  %v3571_v55 = vpop.eup %3570  ;;  %v2203_v16 = vld [vmem:[#allocation12 + $0x58] sm:$0xff] }
 0x2ed   :  { %vm1590_vm0 = vcmp.eq.s32.totalorder %v1588_v57, 0  ;;  %vm1593_vm1 = vcmp.eq.s32.totalorder %v1588_v57, 2  ;;  %vm1589_vm2 = vcmp.lt.s32.totalorder %v1588_v57, 2  ;;  %v3431_v57 = vpack.c.bf16 %v2205_v20, %v2204_v41 }
 0x2ef   :  { %3372 = vmatpush1.bf16.msra.mxu0 %v3371_v13  ;;  %v1591_v13 = vxor.u32 2147483648, %v3571_v55 }
 0x2f0   :  { %3374 = vmatprep.subr.bf16.mxu0 %v3373_v42  ;;  %v1594_v42 = vxor.u32 2147483648, %v3569_v23 }
 0x2f1   :  { %v1592_v30 = vsel %vm1590_vm0, %v3569_v23, %v1591_v13  ;;  %v2220_v23 = vld [vmem:[#allocation12 + $0xe0] sm:$0xff]  ;;  %v2206_v13 = vld [vmem:[#allocation12 + $0x70] sm:$0xff] }
 0x2f3   :  { %3376 = vmatpush1.bf16.msra.mxu0 %v3375_v4  ;;  %v1595_v4 = vsel %vm1593_vm1, %v1594_v42, %v3571_v55  ;;  %v3427_v55 = vpack.c.bf16 %v2203_v16, %v2202_v45  ;;  %v2207_v42 = vld [vmem:[#allocation12 + $0x78] sm:$0xff] }
 0x2f4   :  { %3378 = vmatprep.subr.bf16.mxu0 %v3377_v31  ;;  %v1596_v31 = vsel %vm1589_vm2, %v1592_v30, %v1595_v4 }
 0x2f5   :  { %v1597_v53 = vsel %vm1586_vm3, nan, %v1596_v31 }
 0x2f7   :  { %3380 = vmatpush1.bf16.msra.mxu0 %v3379_v47  ;;  %v2193_v47 = vld [vmem:[#allocation12 + $0x8] sm:$0xff] }
 0x2f8   :  { %3382 = vmatprep.subr.bf16.mxu0 %v3381_v35  ;;  %v2210_v35 = vld [vmem:[#allocation12 + $0x90] sm:$0xff]  ;;  %v3407_v22 = vpack.c.bf16 %v2193_v47, %v2192_v24 }
 0x2f9   :  { %v3409_v52 = vpack.c.bf16 %v2211_v18, %v2210_v35 }
 0x2fa   :  { %3408 = vmatpush3.bf16.msra.mxu1 %v3407_v22 }
 0x2fb   :  { %3384 = vmatpush1.bf16.msra.mxu0 %v3383_v3  ;;  %v2213_v3 = vld [vmem:[#allocation12 + $0xa8] sm:$0xff]  ;;  %3410 = vmatprep.subr.bf16.mxu1 %v3409_v52 }
 0x2fc   :  { %3386 = vmatprep.subr.bf16.mxu0 %v3385_v7  ;;  %v3411_v7 = vpack.c.bf16 %v2195_v17, %v2194_v6  ;;  %v3413_v15 = vpack.c.bf16 %v2213_v3, %v2212_v27 }
 0x2fe   :  { %3412 = vmatpush3.bf16.msra.mxu1 %v3411_v7 }
 0x2ff   :  { %3388 = vmatpush1.bf16.msra.mxu0 %v3387_v9  ;;  %3414 = vmatprep.subr.bf16.mxu1 %v3413_v15  ;;  %v3417_v9 = vpack.c.bf16 %v2215_v29, %v2214_v28 }
 0x300   :  { %3390 = vmatprep.subr.bf16.mxu0 %v3389_v0  ;;  %v2198_v0 = vld [vmem:[#allocation12 + $0x30] sm:$0xff] }
 0x301   :  { %v3419_v59 = vpack.c.bf16 %v2199_v48, %v2198_v0 }
 0x302   :  { %3416 = vmatpush3.bf16.msra.mxu1 %v3415_v40 }
 0x303   :  { %3392 = vmatpush1.bf16.msra.mxu0 %v3391_v33  ;;  %3418 = vmatprep.subr.bf16.mxu1 %v3417_v9  ;;  %v2200_v33 = vld [vmem:[#allocation12 + $0x40] sm:$0xff] }
 0x304   :  { %3394 = vmatprep.subr.bf16.mxu0 %v3393_v5  ;;  %v2218_v5 = vld [vmem:[#allocation12 + $0xd0] sm:$0xff]  ;;  %v3423_v12 = vpack.c.bf16 %v2201_v37, %v2200_v33 }
 0x305   :  { %v3425_v8 = vpack.c.bf16 %v2219_v38, %v2218_v5 }
 0x306   :  { %3420 = vmatpush3.bf16.msra.mxu1 %v3419_v59 }
 0x307   :  { %3396 = vmatpush1.bf16.msra.mxu0 %v3395_v50  ;;  %3422 = vmatprep.subr.bf16.mxu1 %v3421_v21  ;;  %v2221_v50 = vld [vmem:[#allocation12 + $0xe8] sm:$0xff] }
 0x308   :  { %3398 = vmatprep.subr.bf16.mxu0 %v3397_v49  ;;  %v3429_v49 = vpack.c.bf16 %v2221_v50, %v2220_v23 }
 0x30a   :  { %3424 = vmatpush3.bf16.msra.mxu1 %v3423_v12 }
 0x30b   :  { %3400 = vmatpush1.bf16.msra.mxu0 %v3399_v60  ;;  %3426 = vmatprep.subr.bf16.mxu1 %v3425_v8  ;;  %v3433_v60 = vpack.c.bf16 %v2223_v10, %v2222_v25 }
 0x30c   :  { %3402 = vmatprep.subr.bf16.mxu0 %v3401_v34  ;;  %v3435_v34 = vpack.c.bf16 %v2207_v42, %v2206_v13 }
 0x30e   :  { %3428 = vmatpush3.bf16.msra.mxu1 %v3427_v55 }
 0x30f   :  { %3404 = vmatpush1.bf16.msra.mxu0 %v3403_v62  ;;  %3430 = vmatprep.subr.bf16.mxu1 %v3429_v49  ;;  %v1839_v62 = vrot.slane %v1830_v36, %v3964_v19 }
 0x312   :  { %1978 = vmatmul.mubr.f32.vlgmr.msra.gmra.mrb[2].mxu0 %v1597_v53  ;;  %3432 = vmatpush3.bf16.msra.mxu1 %v3431_v57 }
 0x313   :  { %3434 = vmatprep.subr.bf16.mxu1 %v3433_v60 }
 0x316   :  { %3436 = vmatpush3.bf16.msra.mxu1 %v3435_v34 }
 0x3e5   :  { %v1979_v30 = vpop.f32.mrb[2].mxu0 }
 0x3e6   :  { %v4291_v4 = vadd.f32 %v1979_v30, %v1835_v39  ;;  %v1981_v31 = vpop.f32.mrb[3].mxu0 }
 0x3e7   :  { %v4293_v53 = vadd.f32 %v1981_v31, %v1839_v62 }
 0x3e8   :  { %v1984_v63 = vand.u32 2147483647, %v4291_v4  ;;  %v1987_v1 = vand.u32 2139095040, %v4291_v4  ;;  %vm1986_vm2 = vcmp.lt.s32.totalorder %v4291_v4, 0 }
 0x3e9   :  { %v2091_v24 = vand.u32 2139095040, %v4293_v53  ;;  %v2088_v11 = vand.u32 2147483647, %v4293_v53 }
 0x3ea   :  { %v1988_v2 = vshrl.u32 %v1987_v1, 23  ;;  %v1991_v47 = vand.u32 8388607, %v1984_v63  ;;  %vm1985_vm3 = vcmp.le.f32.partialorder %v1984_v63, 0.7853982 }
 0x3eb   :  { %v2092_v35 = vshrl.u32 %v2091_v24, 23  ;;  %v2095_v6 = vand.u32 8388607, %v2088_v11 }
 0x3ec   :  { %v2614_v19 = vadd.s32 4294967169, %v1988_v2  ;;  %v1992_v52 = vor.u32 8388608, %v1991_v47 }
 0x3ed   :  { %v2618_v18 = vadd.s32 4294967169, %v2092_v35  ;;  %v2096_v14 = vor.u32 8388608, %v2095_v6 }
 0x3ee   :  { %v1994_v22 = vadd.s32 1, %v2614_v19  ;;  %v4303_v43 = vshll.u32 %v1992_v52, 8 }
 0x3ef   :  { %v2098_v17 = vadd.s32 1, %v2618_v18 }
 0x3f0   :  { %vm1995_vm4 = vcmp.gt.s32.totalorder %v1994_v22, 0 }
 0x3f1   :  { %v1996_v27 = vsel %vm1995_vm4, %v1994_v22, 0  ;;  %vm2099_vm5 = vcmp.gt.s32.totalorder %v2098_v17, 0  ;;  %vm2090_vm4 = vcmp.lt.s32.totalorder %v4293_v53, 0 }
 0x3f2   :  { %v1997_v3 = vshrl.u32 %v1996_v27, 5  ;;  %v1998_v7 = vand.u32 31, %v1996_v27  ;;  %v2100_v15 = vsel %vm2099_vm5, %v2098_v17, 0  ;;  %v2136_v27 = vshll.u32 %v2096_v14, 8 }
 0x3f3   :  { %v4306_v40 = vshrl.u32 %v2100_v15, 5  ;;  %v2102_v9 = vand.u32 31, %v2100_v15  ;;  %vm2089_vm5 = vcmp.le.f32.partialorder %v2088_v11, 0.7853982 }
 0x3f4   :  { %v1999_v28 = vsub.s32 32, %v1998_v7  ;;  %v2001_v29 = vshll.u32 %v3790_v44, %v1998_v7  ;;  %v2004_v0 = vshll.u32 %v3791_v46, %v1998_v7  ;;  %v2007_v48 = vshll.u32 %v3792_v51, %v1998_v7 }
 0x3f5   :  { %v2010_v32 = vshll.u32 %v3793_v54, %v1998_v7  ;;  %v2013_v26 = vshll.u32 %v3794_v58, %v1998_v7  ;;  %vm2016_vm6 = vcmp.lt.s32.totalorder %v1997_v3, 1  ;;  %vm2017_vm7 = vcmp.lt.s32.totalorder %v1997_v3, 2 }
 0x3f6   :  { %v2002_v59 = vshrl.u32 %v3791_v46, %v1999_v28  ;;  %v2005_v21 = vshrl.u32 %v3792_v51, %v1999_v28  ;;  %v2008_v33 = vshrl.u32 %v3793_v54, %v1999_v28  ;;  %v2000_v37 = vshrl.u32 %v3790_v44, %v1999_v28 }
 0x3f7   :  { %v2011_v5 = vshrl.u32 %v3794_v58, %v1999_v28  ;;  %v2014_v38 = vshrl.u32 %v3795_v61, %v1999_v28  ;;  %v2103_v16 = vsub.s32 32, %v2102_v9  ;;  %vm2018_vm8 = vcmp.lt.s32.totalorder %v1997_v3, 3 }
 0x3f8   :  { %v2003_v12 = vor.u32 %v2002_v59, %v2001_v29  ;;  %v2006_v8 = vor.u32 %v2005_v21, %v2004_v0  ;;  %v2009_v45 = vor.u32 %v2008_v33, %v2007_v48  ;;  %vm2019_vm9 = vcmp.lt.s32.totalorder %v1997_v3, 4 }
 0x3f9   :  { %v2012_v23 = vor.u32 %v2011_v5, %v2010_v32  ;;  %v2015_v50 = vor.u32 %v2014_v38, %v2013_v26  ;;  %v2105_v60 = vshll.u32 %v3790_v44, %v2102_v9  ;;  %v2106_v34 = vshrl.u32 %v3791_v46, %v2103_v16 }
 0x3fa   :  { %v2020_v55 = vsel %vm2016_vm6, %v2000_v37, %v2003_v12  ;;  %v2021_v49 = vsel %vm2019_vm9, %v2009_v45, 2102212464  ;;  %v2024_v41 = vsel %vm2016_vm6, %v2003_v12, %v2006_v8  ;;  %v2028_v20 = vsel %vm2016_vm6, %v2006_v8, %v2009_v45 }
 0x3fb   :  { %v2022_v25 = vsel %vm2018_vm8, %v2006_v8, %v2021_v49  ;;  %v2025_v10 = vsel %vm2019_vm9, %v2012_v23, 920167782  ;;  %v2029_v57 = vsel %vm2019_vm9, %v2015_v50, 1326507024  ;;  %v2108_v36 = vshll.u32 %v3791_v46, %v2102_v9 }
 0x3fc   :  { %v2026_v13 = vsel %vm2018_vm8, %v2009_v45, %v2025_v10  ;;  %v2030_v42 = vsel %vm2018_vm8, %v2012_v23, %v2029_v57  ;;  %v2023_v39 = vsel %vm2017_vm7, %v2020_v55, %v2022_v25  ;;  %v2109_v31 = vshrl.u32 %v3792_v51, %v2103_v16 }
 0x3fd   :  { %v2027_v62 = vsel %vm2017_vm7, %v2024_v41, %v2026_v13  ;;  %v2031_v30 = vsel %vm2017_vm7, %v2028_v20, %v2030_v42  ;;  %v2107_v35 = vor.u32 %v2106_v34, %v2105_v60  ;;  %v2111_v18 = vshll.u32 %v3792_v51, %v2102_v9 }
 0x3fe   :  { %v4329_v1 = vmul.u32.u64.low %v4303_v43, %v2031_v30  ;;  %v4330_v24 = vmul.u32.u64.high %v4303_v43, %v2031_v30, %v4329_v1  ;;  %v4333_v2 = vmul.u32.u64.low %v4303_v43, %v2027_v62  ;;  %v4334_v47 = vmul.u32.u64.high %v4303_v43, %v2027_v62, %v4333_v2 }
 0x3ff   :  { %v2110_v19 = vor.u32 %v2109_v31, %v2108_v36  ;;  %v2112_v22 = vshrl.u32 %v3793_v54, %v2103_v16  ;;  %v2114_v52 = vshll.u32 %v3793_v54, %v2102_v9  ;;  %v2115_v6 = vshrl.u32 %v3794_v58, %v2103_v16 }
 0x400   :  { %v2118_v17 = vshrl.u32 %v3795_v61, %v2103_v16  ;;  %v2039_v3 = vmul.u32 %v4303_v43, %v2023_v39  ;;  %v2104_v7 = vshrl.u32 %v3790_v44, %v2103_v16  ;;  %v2117_v28 = vshll.u32 %v3794_v58, %v2102_v9 }
 0x401   :  { %v2113_v15 = vor.u32 %v2112_v22, %v2111_v18  ;;  %vm2041_vm10 = vc.u32 %v4330_v24, %v4333_v2  ;;  %v2042_v29 = vadd.s32 1, %v4334_v47  ;;  %v2116_v0 = vor.u32 %v2115_v6, %v2114_v52 }
 0x402   :  { %vm2120_vm11 = vcmp.lt.s32.totalorder %v4306_v40, 1  ;;  %v2119_v48 = vor.u32 %v2118_v17, %v2117_v28  ;;  %vm2122_vm12 = vcmp.lt.s32.totalorder %v4306_v40, 3  ;;  %vm2123_vm13 = vcmp.lt.s32.totalorder %v4306_v40, 4 }
 0x403   :  { %v2128_v14 = vsel %vm2120_vm11, %v2107_v35, %v2110_v19  ;;  %v2043_v43 = vsel %vm2041_vm10, %v2042_v29, %v4334_v47  ;;  %v2125_v32 = vsel %vm2123_vm13, %v2113_v15, 2102212464  ;;  %v2129_v26 = vsel %vm2123_vm13, %v2116_v0, 920167782 }
 0x404   :  { %v2132_v59 = vsel %vm2120_vm11, %v2110_v19, %v2113_v15  ;;  %v2044_v21 = vadd.s32 %v2043_v43, %v2039_v3  ;;  %vm2121_vm14 = vcmp.lt.s32.totalorder %v4306_v40, 2  ;;  %v2130_v9 = vsel %vm2122_vm12, %v2113_v15, %v2129_v26 }
 0x405   :  { %v2133_v33 = vsel %vm2123_vm13, %v2119_v48, 1326507024  ;;  %v2124_v37 = vsel %vm2120_vm11, %v2104_v7, %v2107_v35  ;;  %v2126_v5 = vsel %vm2122_vm12, %v2110_v19, %v2125_v32  ;;  %v2131_v38 = vsel %vm2121_vm14, %v2128_v14, %v2130_v9 }
 0x406   :  { %v2134_v12 = vsel %vm2122_vm12, %v2116_v0, %v2133_v33  ;;  %v2045_v8 = vadd.s32 536870912, %v2044_v21  ;;  %v4351_v16 = vmul.u32.u64.low %v2136_v27, %v2131_v38  ;;  %v4352_v23 = vmul.u32.u64.high %v2136_v27, %v2131_v38, %v4351_v16 }
 0x407   :  { %v2135_v45 = vsel %vm2121_vm14, %v2132_v59, %v2134_v12  ;;  %v2127_v41 = vsel %vm2121_vm14, %v2124_v37, %v2126_v5  ;;  %v2040_v35 = vadd.s32 %v4333_v2, %v4330_v24  ;;  %vm2076_vm9 = vweird.f32 %v4291_v4 }
 0x408   :  { %v4354_v50 = vmul.u32.u64.low %v2136_v27, %v2135_v45  ;;  %v4355_v55 = vmul.u32.u64.high %v2136_v27, %v2135_v45, %v4354_v50  ;;  %v2046_v49 = vshrl.u32 %v2045_v8, 30  ;;  %v2146_v25 = vadd.s32 1, %v4352_v23 }
 0x409   :  { %v2143_v40 = vmul.u32 %v2136_v27, %v2127_v41  ;;  %vm2180_vm13 = vweird.f32 %v4293_v53  ;;  %vm3797_vm14 = vmmov 0  }
 0x40a   :  { %v2047_v20 = vshll.u32 %v2046_v49, 30  ;;  %vm2145_vm15 = vc.u32 %v4355_v55, %v4351_v16  ;;  %v2144_v14 = vadd.s32 %v4351_v16, %v4355_v55  ;;  %v2070_v2 = vsub.s32 4, %v2046_v49 }
 0x40b   :  { %v2147_v57 = vsel %vm2145_vm15, %v2146_v25, %v4352_v23 }
 0x40c   :  { %v2048_v10 = vsub.s32 %v2044_v21, %v2047_v20  ;;  %v2148_v60 = vadd.s32 %v2147_v57, %v2143_v40  ;;  %v2071_v38 = vsel %vm1986_vm2, %v2070_v2, %v2046_v49 }
 0x40d   :  { %v2073_v23 = vsel %vm1985_vm3, 0, %v2071_v38  ;;  %v2414_v38 = vld [vmem:[%s4538_s8 + $0x78] sm:$0xff] }
 0x40e   :  { %v2050_v13 = vsub.s32 0, %v2048_v10  ;;  %v2149_v42 = vadd.s32 536870912, %v2148_v60  ;;  %v2077_v41 = vadd.s32 3, %v2073_v23 }
 0x410   :  { %v2615_v34 = vmin.u32 %v2050_v13, %v2048_v10  ;;  %v2150_v36 = vshrl.u32 %v2149_v42, 30  ;;  %v2078_v40 = vand.u32 3, %v2077_v41 }
 0x412   :  { %v2052_v39 = vclz %v2615_v34  ;;  %v2151_v62 = vshll.u32 %v2150_v36, 30  ;;  %v2174_v55 = vsub.s32 4, %v2150_v36  ;;  %vm2083_vm6 = vcmp.eq.s32.totalorder %v2078_v40, 2 }
 0x413   :  { %vm2080_vm7 = vcmp.eq.s32.totalorder %v2078_v40, 0  ;;  %vm2079_vm8 = vcmp.lt.s32.totalorder %v2078_v40, 2 }
 0x414   :  { %v2616_v30 = vadd.s32 4294967294, %v2052_v39  ;;  %v2152_v31 = vsub.s32 %v2148_v60, %v2151_v62  ;;  %v2175_v63 = vsel %vm2090_vm4, %v2174_v55, %v2150_v36 }
 0x415   :  { %v2177_v57 = vsel %vm2089_vm5, 0, %v2175_v63 }
 0x416   :  { %vm2617_vm0 = vcmp.lt.s32.totalorder %v2616_v30, 0  ;;  %v2154_v47 = vsub.s32 0, %v2152_v31  ;;  %v2181_v34 = vadd.s32 3, %v2177_v57 }
 0x417   :  { %v2055_v1 = vsel %vm2617_vm0, 0, %v2616_v30 }
 0x418   :  { %v2056_v19 = vsub.s32 32, %v2055_v1  ;;  %v2060_v18 = vsub.s32 4294967266, %v2055_v1  ;;  %v2619_v22 = vmin.u32 %v2154_v47, %v2152_v31  ;;  %v2057_v52 = vshll.u32 %v2048_v10, %v2055_v1 }
 0x419   :  { %v2182_v30 = vand.u32 3, %v2181_v34 }
 0x41a   :  { %v2058_v6 = vshrl.u32 %v2040_v35, %v2056_v19  ;;  %v2061_v17 = vadd.s32 127, %v2060_v18  ;;  %v2156_v27 = vclz %v2619_v22 }
 0x41b   :  { %vm2187_vm10 = vcmp.eq.s32.totalorder %v2182_v30, 2  ;;  %vm2184_vm11 = vcmp.eq.s32.totalorder %v2182_v30, 0  ;;  %vm2183_vm12 = vcmp.lt.s32.totalorder %v2182_v30, 2 }
 0x41c   :  { %v2059_v3 = vor.u32 %v2058_v6, %v2057_v52  ;;  %v2062_v7 = vshll.u32 %v2061_v17, 23  ;;  %v2620_v15 = vadd.s32 4294967294, %v2156_v27  ;;  %v2400_v6 = vld [vmem:[%s4538_s8 + $0x8] sm:$0xff]  ;;  %v2401_v17 = vld [vmem:[%s4538_s8 + $0x10] sm:$0xff]  ;;  %v3796_v27 = vmov 0.0|0.0  }
 0x41d   :  { %3437 = vmatprep.subr.bf16.mxu1 %v3796_v27 }
 0x41e   :  { %v2063_v28 = vor.u32 4788187, %v2062_v7  ;;  %vm2621_vm1 = vcmp.lt.s32.totalorder %v2620_v15, 0  ;;  %v2066_v0 = vcvt.s32.f32 %v2059_v3  ;;  %v2402_v3 = vld [vmem:[%s4538_s8 + $0x18] sm:$0xff]  ;;  %v3798_v7 = vmov 0.0  }
 0x41f   :  { %v2159_v48 = vsel %vm2621_vm1, 0, %v2620_v15  ;;  %v3441_v15 = vpack.c.bf16 %v2402_v3, %v2401_v17 }
 0x420   :  { %v2064_v29 = vand.u32 2147483647, %v2063_v28  ;;  %v2160_v43 = vsub.s32 32, %v2159_v48  ;;  %v2164_v32 = vsub.s32 4294967266, %v2159_v48  ;;  %v2161_v26 = vshll.u32 %v2152_v31, %v2159_v48  ;;  %v2403_v28 = vld [vmem:[%s4538_s8 + $0x20] sm:$0xff]  ;;  %v2405_v48 = vld [vmem:[%s4538_s8 + $0x30] sm:$0xff] }
 0x422   :  { %v2067_v24 = vmul.f32 %v2066_v0, %v2064_v29  ;;  %v2162_v59 = vshrl.u32 %v2144_v14, %v2160_v43  ;;  %v2165_v21 = vadd.s32 127, %v2164_v32  ;;  %v2404_v29 = vld [vmem:[%s4538_s8 + $0x28] sm:$0xff]  ;;  %v2406_v14 = vld [vmem:[%s4538_s8 + $0x38] sm:$0xff]  ;;  %v2407_v32 = vld [vmem:[%s4538_s8 + $0x40] sm:$0xff] }
 0x423   :  { %v3444_v0 = vpack.c.bf16 %v2404_v29, %v2403_v28  ;;  %v3447_v43 = vpack.c.bf16 %v2406_v14, %v2405_v48 }
 0x424   :  { %v2068_v9 = vxor.u32 2147483648, %v2067_v24  ;;  %v2163_v33 = vor.u32 %v2162_v59, %v2161_v26  ;;  %v2166_v37 = vshll.u32 %v2165_v21, 23  ;;  %v2409_v26 = vld [vmem:[%s4538_s8 + $0x50] sm:$0xff]  ;;  %v2410_v59 = vld [vmem:[%s4538_s8 + $0x58] sm:$0xff] }
 0x425   :  { %v3453_v21 = vpack.c.bf16 %v2410_v59, %v2409_v26 }
 0x426   :  { %v2069_v5 = vsel %vm1986_vm2, %v2068_v9, %v2067_v24  ;;  %v2167_v8 = vor.u32 4788187, %v2166_v37  ;;  %v2170_v16 = vcvt.s32.f32 %v2163_v33  ;;  %v2408_v24 = vld [vmem:[%s4538_s8 + $0x48] sm:$0xff]  ;;  %v2411_v9 = vld [vmem:[%s4538_s8 + $0x60] sm:$0xff] }
 0x427   :  { %v2072_v12 = vsel %vm1985_vm3, %v4291_v4, %v2069_v5  ;;  %v2399_v4 = vld [vmem:[%s4538_s8] sm:$0xff]  ;;  %v3450_v2 = vpack.c.bf16 %v2408_v24, %v2407_v32  ;;  %v2412_v33 = vld [vmem:[%s4538_s8 + $0x68] sm:$0xff]  ;;  %v2413_v5 = vld [vmem:[%s4538_s8 + $0x70] sm:$0xff] }
 0x428   :  { %3572 = vcosq.f32 %v2072_v12  ;;  %v2168_v45 = vand.u32 2147483647, %v2167_v8  ;;  %v3456_v37 = vpack.c.bf16 %v2412_v33, %v2411_v9 }
 0x429   :  { %3574 = vsinq.f32 %v2072_v12  ;;  %v3459_v12 = vpack.c.bf16 %v2414_v38, %v2413_v5 }
 0x42a   :  { %v2171_v50 = vmul.f32 %v2170_v16, %v2168_v45  ;;  %v2224_v45 = vld [vmem:[#allocation13] sm:$0x1] }
 0x42c   :  { %v2172_v20 = vxor.u32 2147483648, %v2171_v50 }
 0x42e   :  { %v2173_v25 = vsel %vm2090_vm4, %v2172_v20, %v2171_v50 }
 0x42f   :  { %v2176_v49 = vsel %vm2089_vm5, %v4293_v53, %v2173_v25  ;;  %v3438_v53 = vpack.c.bf16 %v2400_v6, %v2399_v4 }
 0x430   :  { %3576 = vcosq.f32 %v2176_v49 }
 0x431   :  { %3578 = vsinq.f32 %v2176_v49 }
 0x432   :  { %v3573_v10 = vpop.eup %3572 }
 0x433   :  { %v3575_v60 = vpop.eup %3574  ;;  %v2084_v13 = vxor.u32 2147483648, %v3573_v10 }
 0x434   :  { %v2081_v42 = vxor.u32 2147483648, %v3575_v60 }
 0x435   :  { %v2085_v39 = vsel %vm2083_vm6, %v2084_v13, %v3575_v60 }
 0x436   :  { %v2082_v62 = vsel %vm2080_vm7, %v3573_v10, %v2081_v42 }
 0x437   :  { %v2086_v11 = vsel %vm2079_vm8, %v2082_v62, %v2085_v39 }
 0x438   :  { %v2087_v36 = vsel %vm2076_vm9, nan, %v2086_v11 }
 0x43a   :  { %v3577_v31 = vpop.eup %3576 }
 0x43b   :  { %v3579_v1 = vpop.eup %3578  ;;  %v2188_v47 = vxor.u32 2147483648, %v3577_v31 }
 0x43c   :  { %v2185_v35 = vxor.u32 2147483648, %v3579_v1 }
 0x43d   :  { %v2189_v19 = vsel %vm2187_vm10, %v2188_v47, %v3579_v1 }
 0x43e   :  { %v2186_v18 = vsel %vm2184_vm11, %v3577_v31, %v2185_v35 }
 0x43f   :  { %v2190_v22 = vsel %vm2183_vm12, %v2186_v18, %v2189_v19 }
 0x440   :  { %v2191_v52 = vsel %vm2180_vm13, nan, %v2190_v22 }
 0x441   :  { %2289 = vmatprep.mubr.f32.mxu1 %v2191_v52 }
 0x442   :  { %2290 = vmatmul.mubr.f32.vlgmr.msra.gmra.mrb[2].mxu1 %v2087_v36 }
 0x443   :  { %2727 = vmatprep.mubr.msk.f32.mxu1 %vm3797_vm14, %v3798_v7  ;;  %3439 = vmatpush3.bf16.msra.mxu1 %v3438_v53 }
 0x444   :  { %3440 = vmatprep.subr.bf16.mxu1 %v3796_v27 }
 0x447   :  { %3442 = vmatpush3.bf16.msra.mxu1 %v3441_v15 }
 0x448   :  { %3443 = vmatprep.subr.bf16.mxu1 %v3796_v27 }
 0x44b   :  { %3445 = vmatpush3.bf16.msra.mxu1 %v3444_v0 }
 0x44c   :  { %3446 = vmatprep.subr.bf16.mxu1 %v3796_v27 }
 0x44f   :  { %3448 = vmatpush3.bf16.msra.mxu1 %v3447_v43 }
 0x450   :  { %3449 = vmatprep.subr.bf16.mxu1 %v3796_v27 }
 0x453   :  { %3451 = vmatpush3.bf16.msra.mxu1 %v3450_v2 }
 0x454   :  { %3452 = vmatprep.subr.bf16.mxu1 %v3796_v27 }
 0x457   :  { %3454 = vmatpush3.bf16.msra.mxu1 %v3453_v21 }
 0x458   :  { %3455 = vmatprep.subr.bf16.mxu1 %v3796_v27 }
 0x45b   :  { %3457 = vmatpush3.bf16.msra.mxu1 %v3456_v37 }
 0x45c   :  { %3458 = vmatprep.subr.bf16.mxu1 %v3796_v27 }
 0x45f   :  { %3460 = vmatpush3.bf16.msra.mxu1 %v3459_v12 }
 0x460   :  { %3461 = vmatprep.subr.bf16.mxu1 %v3796_v27 }
 0x515   :  { %v2658_v8 = vpop.f32.mrb[2].mxu1 }
 0x516   :  { %v2659_v16 = vpop.f32.mrb[3].mxu1 }
 0x517   :  { %v2660_v23 = vadd.f32 %v2659_v16, %v2658_v8 }
 0x519   :  { %v4431_v50 = vadd.f32 %v2660_v23, %v2224_v45 }
 0x51b   :  { %v2298_v55 = vand.u32 2139095040, %v4431_v50  ;;  %v2295_v41 = vand.u32 2147483647, %v4431_v50  ;;  %vm2297_vm6 = vcmp.lt.s32.totalorder %v4431_v50, 0  ;;  %vm2387_vm11 = vweird.f32 %v4431_v50 }
 0x51d   :  { %v2299_v20 = vshrl.u32 %v2298_v55, 23  ;;  %v2302_v63 = vand.u32 8388607, %v2295_v41  ;;  %vm2296_vm7 = vcmp.le.f32.partialorder %v2295_v41, 0.7853982  ;;  %v2488_v41 = vld [vmem:[%s4540_s10 + $0x8] sm:$0xff] }
 0x51f   :  { %v2622_v25 = vadd.s32 4294967169, %v2299_v20  ;;  %v2303_v10 = vor.u32 8388608, %v2302_v63 }
 0x521   :  { %v2305_v49 = vadd.s32 1, %v2622_v25  ;;  %v2343_v39 = vshll.u32 %v2303_v10, 8 }
 0x523   :  { %vm2306_vm15 = vcmp.gt.s32.totalorder %v2305_v49, 0 }
 0x524   :  { %v2307_v40 = vsel %vm2306_vm15, %v2305_v49, 0 }
 0x525   :  { %v2309_v57 = vand.u32 31, %v2307_v40  ;;  %v2308_v60 = vshrl.u32 %v2307_v40, 5 }
 0x527   :  { %v2310_v13 = vsub.s32 32, %v2309_v57  ;;  %v2321_v42 = vshll.u32 %v3793_v54, %v2309_v57  ;;  %v2324_v34 = vshll.u32 %v3794_v58, %v2309_v57  ;;  %v2312_v36 = vshll.u32 %v3790_v44, %v2309_v57 }
 0x528   :  { %v2315_v31 = vshll.u32 %v3791_v46, %v2309_v57  ;;  %v2318_v47 = vshll.u32 %v3792_v51, %v2309_v57  ;;  %vm2330_vm0 = vcmp.lt.s32.totalorder %v2308_v60, 4  ;;  %vm2327_vm1 = vcmp.lt.s32.totalorder %v2308_v60, 1 }
 0x529   :  { %v2322_v62 = vshrl.u32 %v3794_v58, %v2310_v13  ;;  %v2325_v11 = vshrl.u32 %v3795_v61, %v2310_v13  ;;  %v2313_v30 = vshrl.u32 %v3791_v46, %v2310_v13  ;;  %v2316_v1 = vshrl.u32 %v3792_v51, %v2310_v13 }
 0x52a   :  { %v2319_v35 = vshrl.u32 %v3793_v54, %v2310_v13  ;;  %v2311_v58 = vshrl.u32 %v3790_v44, %v2310_v13  ;;  %vm2328_vm2 = vcmp.lt.s32.totalorder %v2308_v60, 2  ;;  %vm2329_vm3 = vcmp.lt.s32.totalorder %v2308_v60, 3 }
 0x52b   :  { %v2323_v19 = vor.u32 %v2322_v62, %v2321_v42  ;;  %v2326_v18 = vor.u32 %v2325_v11, %v2324_v34  ;;  %v2314_v22 = vor.u32 %v2313_v30, %v2312_v36  ;;  %v2317_v52 = vor.u32 %v2316_v1, %v2315_v31 }
 0x52c   :  { %v2320_v61 = vor.u32 %v2319_v35, %v2318_v47  ;;  %v2487_v35 = vld [vmem:[%s4540_s10] sm:$0xff] }
 0x52d   :  { %v2336_v4 = vsel %vm2330_vm0, %v2323_v19, 920167782  ;;  %v2340_v6 = vsel %vm2330_vm0, %v2326_v18, 1326507024  ;;  %v2335_v17 = vsel %vm2327_vm1, %v2314_v22, %v2317_v52  ;;  %v2331_v51 = vsel %vm2327_vm1, %v2311_v58, %v2314_v22 }
 0x52e   :  { %v2332_v46 = vsel %vm2330_vm0, %v2320_v61, 2102212464  ;;  %v2337_v53 = vsel %vm2329_vm3, %v2320_v61, %v2336_v4  ;;  %v2339_v3 = vsel %vm2327_vm1, %v2317_v52, %v2320_v61  ;;  %v2341_v28 = vsel %vm2329_vm3, %v2323_v19, %v2340_v6  ;;  %v2489_v61 = vld [vmem:[%s4540_s10 + $0x10] sm:$0xff]  ;;  %v2490_v4 = vld [vmem:[%s4540_s10 + $0x18] sm:$0xff] }
 0x52f   :  { %v2333_v15 = vsel %vm2329_vm3, %v2317_v52, %v2332_v46  ;;  %v2338_v54 = vsel %vm2328_vm2, %v2335_v17, %v2337_v53  ;;  %v2342_v29 = vsel %vm2328_vm2, %v2339_v3, %v2341_v28  ;;  %v3462_v58 = vpack.c.bf16 %v2488_v41, %v2487_v35  ;;  %v2492_v17 = vld [vmem:[%s4540_s10 + $0x28] sm:$0xff]  ;;  %v2493_v3 = vld [vmem:[%s4540_s10 + $0x30] sm:$0xff] }
 0x530   :  { %v4448_v0 = vmul.u32.u64.low %v2343_v39, %v2338_v54  ;;  %v4449_v48 = vmul.u32.u64.high %v2343_v39, %v2338_v54, %v4448_v0  ;;  %v4451_v44 = vmul.u32.u64.low %v2343_v39, %v2342_v29  ;;  %v4452_v14 = vmul.u32.u64.high %v2343_v39, %v2342_v29, %v4451_v44  ;;  %v2496_v54 = vld [vmem:[%s4540_s10 + $0x48] sm:$0xff]  ;;  %v2497_v29 = vld [vmem:[%s4540_s10 + $0x50] sm:$0xff] }
 0x531   :  { %v2334_v43 = vsel %vm2328_vm2, %v2331_v51, %v2333_v15  ;;  %v3465_v46 = vpack.c.bf16 %v2490_v4, %v2489_v61  ;;  %v2495_v15 = vld [vmem:[%s4540_s10 + $0x40] sm:$0xff] }
 0x532   :  { %v2353_v32 = vadd.s32 1, %v4449_v48  ;;  %v2350_v24 = vmul.u32 %v2343_v39, %v2334_v43  ;;  %vm2352_vm4 = vc.u32 %v4452_v14, %v4448_v0  ;;  %v2351_v45 = vadd.s32 %v4448_v0, %v4452_v14  ;;  %v2498_v0 = vld [vmem:[%s4540_s10 + $0x58] sm:$0xff]  ;;  %v2499_v44 = vld [vmem:[%s4540_s10 + $0x60] sm:$0xff]  ;;  %v2500_v14 = vld [vmem:[%s4540_s10 + $0x68] sm:$0xff] }
 0x533   :  { %v3474_v28 = vpack.c.bf16 %v2496_v54, %v2495_v15  ;;  %v3480_v43 = vpack.c.bf16 %v2500_v14, %v2499_v44 }
 0x534   :  { %v2354_v2 = vsel %vm2352_vm4, %v2353_v32, %v4449_v48  ;;  %v3477_v48 = vpack.c.bf16 %v2498_v0, %v2497_v29  ;;  %v2501_v32 = vld [vmem:[%s4540_s10 + $0x70] sm:$0xff] }
 0x535   :  { %v2355_v26 = vadd.s32 %v2354_v2, %v2350_v24  ;;  %v2502_v24 = vld [vmem:[%s4540_s10 + $0x78] sm:$0xff] }
 0x536   :  { %v3483_v2 = vpack.c.bf16 %v2502_v24, %v2501_v32 }
 0x537   :  { %v2356_v59 = vadd.s32 536870912, %v2355_v26 }
 0x539   :  { %v2357_v21 = vshrl.u32 %v2356_v59, 30 }
 0x53b   :  { %v2358_v9 = vshll.u32 %v2357_v21, 30  ;;  %v2381_v13 = vsub.s32 4, %v2357_v21 }
 0x53d   :  { %v2359_v33 = vsub.s32 %v2355_v26, %v2358_v9  ;;  %v2382_v39 = vsel %vm2297_vm6, %v2381_v13, %v2357_v21  ;;  %v2415_v21 = vld [vmem:[%s4539_s9] sm:$0x1] }
 0x53e   :  { %v2384_v11 = vsel %vm2296_vm7, 0, %v2382_v39 }
 0x53f   :  { %v2361_v37 = vsub.s32 0, %v2359_v33  ;;  %v2388_v36 = vadd.s32 3, %v2384_v11 }
 0x541   :  { %v2623_v5 = vmin.u32 %v2361_v37, %v2359_v33  ;;  %v2389_v30 = vand.u32 3, %v2388_v36 }
 0x543   :  { %v2363_v38 = vclz %v2623_v5  ;;  %vm2394_vm8 = vcmp.eq.s32.totalorder %v2389_v30, 2  ;;  %vm2391_vm9 = vcmp.eq.s32.totalorder %v2389_v30, 0  ;;  %vm2390_vm10 = vcmp.lt.s32.totalorder %v2389_v30, 2 }
 0x545   :  { %v2624_v12 = vadd.s32 4294967294, %v2363_v38 }
 0x547   :  { %vm2625_vm5 = vcmp.lt.s32.totalorder %v2624_v12, 0 }
 0x548   :  { %v2366_v8 = vsel %vm2625_vm5, 0, %v2624_v12 }
 0x549   :  { %v2367_v16 = vsub.s32 32, %v2366_v8  ;;  %v2371_v23 = vsub.s32 4294967266, %v2366_v8  ;;  %v2368_v55 = vshll.u32 %v2359_v33, %v2366_v8  ;;  %v2503_v33 = vld [vmem:[%s4541_s11] sm:$0x1] }
 0x54b   :  { %v2369_v20 = vshrl.u32 %v2351_v45, %v2367_v16  ;;  %v2372_v25 = vadd.s32 127, %v2371_v23  ;;  %v2581_v23 = vand.u32 127, %v657_v56 }
 0x54d   :  { %v2370_v63 = vor.u32 %v2369_v20, %v2368_v55  ;;  %v2373_v49 = vshll.u32 %v2372_v25, 23  ;;  %vm2584_vm12 = vcmp.eq.s32.totalorder %v2581_v23, 2  ;;  %vm2583_vm13 = vcmp.eq.s32.totalorder %v2581_v23, 1 }
 0x54f   :  { %v2374_v40 = vor.u32 4788187, %v2373_v49  ;;  %v2377_v57 = vcvt.s32.f32 %v2370_v63 }
 0x551   :  { %v2375_v10 = vand.u32 2147483647, %v2374_v40 }
 0x553   :  { %v2378_v60 = vmul.f32 %v2377_v57, %v2375_v10 }
 0x555   :  { %v2379_v42 = vxor.u32 2147483648, %v2378_v60 }
 0x557   :  { %v2380_v34 = vsel %vm2297_vm6, %v2379_v42, %v2378_v60 }
 0x558   :  { %v2383_v62 = vsel %vm2296_vm7, %v4431_v50, %v2380_v34  ;;  %v2491_v50 = vld [vmem:[%s4540_s10 + $0x20] sm:$0xff] }
 0x559   :  { %3580 = vcosq.f32 %v2383_v62  ;;  %v3468_v53 = vpack.c.bf16 %v2492_v17, %v2491_v50 }
 0x55a   :  { %3582 = vsinq.f32 %v2383_v62 }
 0x563   :  { %v3581_v31 = vpop.eup %3580 }
 0x564   :  { %v3583_v1 = vpop.eup %3582  ;;  %v2395_v47 = vxor.u32 2147483648, %v3581_v31 }
 0x565   :  { %v2392_v19 = vxor.u32 2147483648, %v3583_v1 }
 0x566   :  { %v2396_v18 = vsel %vm2394_vm8, %v2395_v47, %v3583_v1 }
 0x567   :  { %v2393_v22 = vsel %vm2391_vm9, %v3581_v31, %v2392_v19 }
 0x568   :  { %v2397_v52 = vsel %vm2390_vm10, %v2393_v22, %v2396_v18 }
 0x569   :  { %v2398_v6 = vsel %vm2387_vm11, nan, %v2397_v52 }
 0x56a   :  { %2728 = vmatmul.mubr.f32.vlgmr.msra.gmra.mrb[4].mxu1 %v2398_v6 }
 0x56b   :  { %3463 = vmatpush3.bf16.msra.mxu1 %v3462_v58  ;;  %2762 = vmatprep.mubr.msk.f32.mxu1 %vm3797_vm14, %v3798_v7  ;;  %v2494_v7 = vld [vmem:[%s4540_s10 + $0x38] sm:$0xff]  ;;  %vm2582_vm14 = vcmp.eq.s32.totalorder %v2581_v23, 0 }
 0x56c   :  { %3464 = vmatprep.subr.bf16.mxu1 %v3796_v27  ;;  %v3471_v51 = vpack.c.bf16 %v2494_v7, %v2493_v3 }
 0x56f   :  { %3466 = vmatpush3.bf16.msra.mxu1 %v3465_v46 }
 0x570   :  { %3467 = vmatprep.subr.bf16.mxu1 %v3796_v27 }
 0x573   :  { %3469 = vmatpush3.bf16.msra.mxu1 %v3468_v53 }
 0x574   :  { %3470 = vmatprep.subr.bf16.mxu1 %v3796_v27 }
 0x577   :  { %3472 = vmatpush3.bf16.msra.mxu1 %v3471_v51 }
 0x578   :  { %3473 = vmatprep.subr.bf16.mxu1 %v3796_v27 }
 0x57b   :  { %3475 = vmatpush3.bf16.msra.mxu1 %v3474_v28 }
 0x57c   :  { %3476 = vmatprep.subr.bf16.mxu1 %v3796_v27 }
 0x57f   :  { %3478 = vmatpush3.bf16.msra.mxu1 %v3477_v48 }
 0x580   :  { %3479 = vmatprep.subr.bf16.mxu1 %v3796_v27 }
 0x583   :  { %3481 = vmatpush3.bf16.msra.mxu1 %v3480_v43 }
 0x584   :  { %3482 = vmatprep.subr.bf16.mxu1 %v3796_v27 }
 0x587   :  { %3484 = vmatpush3.bf16.msra.mxu1 %v3483_v2 }
 0x58a   :  { %2763 = vmatmul.mubr.f32.vlgmr.msra.gmra.mrb[6].mxu1 %v2398_v6 }
 0x63d   :  { %v2482_v26 = vpop.f32.mrb[4].mxu1 }
 0x63e   :  { %v2729_v59 = vpop.f32.mrb[5].mxu1  ;;  %v2483_v9 = vadd.f32 %v2482_v26, %v2415_v21 }
 0x640   :  { %3584 = vtanh.f32 %v2483_v9 }
 0x64a   :  { %v3585_v12 = vpop.eup %3584 }
 0x65d   :  { %v2570_v37 = vpop.f32.mrb[6].mxu1 }
 0x65e   :  { %v2571_v5 = vadd.f32 %v2570_v37, %v2503_v33  ;;  %v2764_v38 = vpop.f32.mrb[7].mxu1 }
 0x660   :  { %3586 = vtanh.f32 %v2571_v5 }
 0x66a   :  { %v3587_v27 = vpop.eup %3586 }
 0x66b   :  { %v2575_v8 = vadd.f32 %v3587_v27, %v3585_v12  ;;  %v2576_v45 = vmul.f32 %v3587_v27, %v3585_v12 }
 0x66d   :  { %v2577_v16 = vadd.f32 1.0, %v2576_v45 }
 0x66f   :  { %3588 = vrcp.f32 %v2577_v16 }
 0x679   :  { %v3589_v55 = vpop.eup %3588 }
 0x67a   :  { %v2585_v20 = vsel %vm2584_vm12, %v3589_v55, 0.0 }
 0x67b   :  { %v2586_v25 = vsel %vm2583_vm13, %v2577_v16, %v2585_v20 }
 0x67c   :  { %v2587_v63 = vsel %vm2582_vm14, %v2575_v8, %v2586_v25 }
 0x67d   :  { %2588 = vst [vmem:[%s4542_s12] sm:$0x1] %v2587_v63 }
 0x67e   :  { %2593 = vsyncpa [#allocation3], 1 }
 0x67f   :  { %2594 = vsyncpa [#allocation5], 1 }
 0x680   :  { %2595 = vsyncpa [#allocation8], 1 }
 0x681   :  { %2596 = vsyncpa [#allocation11], 1 }
 0x682   :  { %2597 = vsyncpa [#allocation14], 1 }

</bundles_post_ra>
